<compile_context>
chip_gen: v7x
topology: tpu7x:2x2x1
jax: 0.10.0
libtpu: 0.0.40
codegen_flags: <defaults>
</compile_context>

<pallas_src>
import jax
import jax.numpy as jnp
from jax.experimental import pallas as pl
from jax.experimental.pallas import tpu as pltpu

# ---------------- config ----------------
VOCAB_SIZE = 32
SEQ_LEN = 16
EMBED_DIM = 64
NUM_HEADS = 4
NUM_BLOCKS = 2
FF_MULT = 4
BATCH = 2
LN_EPS = 1e-5
V_PAD = 128          # lane-dense LM-head output width (>= VOCAB_SIZE)
HEAD_DIM = EMBED_DIM // NUM_HEADS


def _layernorm(x, g, b):
    # x: (T, C) f32; g, b: (1, C) f32
    mu = jnp.mean(x, axis=-1, keepdims=True)
    var = jnp.mean((x - mu) ** 2, axis=-1, keepdims=True)
    return (x - mu) * jax.lax.rsqrt(var + LN_EPS) * g + b


# ---------------- single fused kernel: all blocks + final LN + LM head ----------------
def decoder_kernel(x_ref,
                   ln1_g_ref, ln1_b_ref,
                   wq_ref, bq_ref, wk_ref, bk_ref, wv_ref, bv_ref,
                   wo_ref, bo_ref,
                   ln2_g_ref, ln2_b_ref,
                   w1_ref, b1_ref, w2_ref, b2_ref,
                   lnf_g_ref, lnf_b_ref, wout_ref, bout_ref,
                   o_ref):
    T, C, H = SEQ_LEN, EMBED_DIM, NUM_HEADS

    # Residual stream stays in f32, resident for the whole depth.
    x = x_ref[0]  # (T, C)

    # Causal mask built ONCE, reused across all layers / heads.
    row = jax.lax.broadcasted_iota(jnp.int32, (T, T), 0)
    col = jax.lax.broadcasted_iota(jnp.int32, (T, T), 1)
    causal = row >= col

    for l in range(NUM_BLOCKS):          # static unroll: all weights already in VMEM
        # ---- LN1 + multi-head causal self-attention ----
        xn = _layernorm(x, ln1_g_ref[l], ln1_b_ref[l]).astype(jnp.bfloat16)

        attn_out = None
        for h in range(H):               # static unroll; per-head weights pre-split in wrapper
            # 1/sqrt(head_dim) already folded into wq / bq (wrapper side).
            q = jnp.dot(xn, wq_ref[l, h], preferred_element_type=jnp.float32) + bq_ref[l, h]
            k = jnp.dot(xn, wk_ref[l, h], preferred_element_type=jnp.float32) + bk_ref[l, h]
            v = jnp.dot(xn, wv_ref[l, h], preferred_element_type=jnp.float32) + bv_ref[l, h]

            s = jnp.einsum('qd,kd->qk', q.astype(jnp.bfloat16), k.astype(jnp.bfloat16),
                           preferred_element_type=jnp.float32)
            s = jnp.where(causal, s, -jnp.inf)
            p = jax.nn.softmax(s, axis=-1)
            # TODO(synk): nn.Dropout layers are identity (eval / inference path).
            yh = jnp.dot(p.astype(jnp.bfloat16), v.astype(jnp.bfloat16),
                         preferred_element_type=jnp.float32)

            # out_proj(concat(heads)) == sum_h  yh @ Wo[h*hd:(h+1)*hd, :]
            contrib = jnp.dot(yh.astype(jnp.bfloat16), wo_ref[l, h],
                              preferred_element_type=jnp.float32)
            attn_out = contrib if attn_out is None else attn_out + contrib

        x = x + attn_out + bo_ref[l]     # residual 1 (+ shared out-proj bias)

        # ---- LN2 + feed-forward ----
        xn2 = _layernorm(x, ln2_g_ref[l], ln2_b_ref[l]).astype(jnp.bfloat16)
        h1 = jnp.dot(xn2, w1_ref[l], preferred_element_type=jnp.float32) + b1_ref[l]
        h1 = jnp.maximum(h1, 0.0)        # ReLU
        h2 = jnp.dot(h1.astype(jnp.bfloat16), w2_ref[l],
                     preferred_element_type=jnp.float32) + b2_ref[l]
        x = x + h2                       # residual 2

    # ---- final LayerNorm + lane-dense LM head (padded to 128 output lanes) ----
    xnf = _layernorm(x, lnf_g_ref[...], lnf_b_ref[...]).astype(jnp.bfloat16)
    logits = jnp.dot(xnf, wout_ref[...], preferred_element_type=jnp.float32) + bout_ref[...]
    o_ref[0] = logits


def run_decoder(x, p):
    B, T, C = x.shape

    weight_order = ["ln1_g", "ln1_b",
                    "wq", "bq", "wk", "bk", "wv", "bv",
                    "wo", "bo",
                    "ln2_g", "ln2_b",
                    "w1", "b1", "w2", "b2",
                    "lnf_g", "lnf_b", "w_out", "b_out"]
    weights = [p[k] for k in weight_order]

    def fixed(arr):
        shape = arr.shape
        return pl.BlockSpec(shape, lambda b, _r=len(shape): (0,) * _r)

    in_specs = [pl.BlockSpec((1, T, C), lambda b: (b, 0, 0))] + [fixed(w) for w in weights]
    out_specs = pl.BlockSpec((1, T, V_PAD), lambda b: (b, 0, 0))

    return pl.pallas_call(
        decoder_kernel,
        out_shape=jax.ShapeDtypeStruct((B, T, V_PAD), jnp.float32),
        grid=(B,),
        in_specs=in_specs,
        out_specs=out_specs,
        compiler_params=pltpu.CompilerParams(
            dimension_semantics=("parallel",)),   # B=2 -> both TCs on v7x
    )(x, *weights)


# ---------------- parameter init (PyTorch-equivalent layout, deterministic) ----------------
def init_raw_params(key):
    C, F, V, T = EMBED_DIM, EMBED_DIM * FF_MULT, VOCAB_SIZE, SEQ_LEN
    keys = jax.random.split(key, 3 + NUM_BLOCKS)
    params = {
        "tok_emb": 0.02 * jax.random.normal(keys[0], (V, C), jnp.float32),
        "pos_emb": 0.02 * jax.random.normal(keys[1], (T, C), jnp.float32),
        "ln_f_g": jnp.ones((1, C), jnp.float32),
        "ln_f_b": jnp.zeros((1, C), jnp.float32),
        "w_out": 0.02 * jax.random.normal(keys[2], (C, V), jnp.float32),
        "b_out": jnp.zeros((1, V), jnp.float32),
        "blocks": [],
    }
    for i in range(NUM_BLOCKS):
        bkeys = jax.random.split(keys[3 + i], 4)
        params["blocks"].append({
            "ln1_g": jnp.ones((1, C), jnp.float32),
            "ln1_b": jnp.zeros((1, C), jnp.float32),
            # Linear weights in (in, out) orientation (already transposed vs torch).
            "wqkv": 0.02 * jax.random.normal(bkeys[0], (C, 3 * C), jnp.float32),
            "bqkv": jnp.zeros((1, 3 * C), jnp.float32),
            "wo": 0.02 * jax.random.normal(bkeys[1], (C, C), jnp.float32),
            "bo": jnp.zeros((1, C), jnp.float32),
            "ln2_g": jnp.ones((1, C), jnp.float32),
            "ln2_b": jnp.zeros((1, C), jnp.float32),
            "w1": 0.02 * jax.random.normal(bkeys[2], (C, F), jnp.float32),
            "b1": jnp.zeros((1, F), jnp.float32),
            "w2": 0.02 * jax.random.normal(bkeys[3], (F, C), jnp.float32),
            "b2": jnp.zeros((1, C), jnp.float32),
        })
    return params


def prepare_params(raw):
    """Wrapper-side prep: stack layers, split heads, fold the 1/sqrt(hd) scale
    into Q, pad the LM head to 128 lanes, cast big weights to bf16."""
    C, H, hd, L, V = EMBED_DIM, NUM_HEADS, HEAD_DIM, NUM_BLOCKS, VOCAB_SIZE
    scale = hd ** -0.5
    bf16, f32 = jnp.bfloat16, jnp.float32

    def stack(name):
        return jnp.stack([blk[name] for blk in raw["blocks"]], axis=0)

    wqkv = stack("wqkv")                       # (L, C, 3C)
    bqkv = stack("bqkv")                       # (L, 1, 3C)
    wq, wk, wv = wqkv[:, :, :C] * scale, wqkv[:, :, C:2 * C], wqkv[:, :, 2 * C:]
    bq, bk, bv = bqkv[:, :, :C] * scale, bqkv[:, :, C:2 * C], bqkv[:, :, 2 * C:]

    def split_w(w):   # (L, C, C) -> (L, H, C, hd)
        return w.reshape(L, C, H, hd).transpose(0, 2, 1, 3)

    def split_b(b):   # (L, 1, C) -> (L, H, 1, hd)
        return b.reshape(L, 1, H, hd).transpose(0, 2, 1, 3)

    w_out_pad = jnp.zeros((C, V_PAD), f32).at[:, :V].set(raw["w_out"])
    b_out_pad = jnp.zeros((1, V_PAD), f32).at[:, :V].set(raw["b_out"])

    return {
        "tok_emb": raw["tok_emb"],
        "pos_emb": raw["pos_emb"],
        "ln1_g": stack("ln1_g"), "ln1_b": stack("ln1_b"),
        "wq": split_w(wq).astype(bf16), "bq": split_b(bq),
        "wk": split_w(wk).astype(bf16), "bk": split_b(bk),
        "wv": split_w(wv).astype(bf16), "bv": split_b(bv),
        # out-proj weight rows grouped by head: (L, C, C) -> (L, H, hd, C)
        "wo": stack("wo").reshape(L, H, hd, C).astype(bf16),
        "bo": stack("bo"),
        "ln2_g": stack("ln2_g"), "ln2_b": stack("ln2_b"),
        "w1": stack("w1").astype(bf16), "b1": stack("b1"),
        "w2": stack("w2").astype(bf16), "b2": stack("b2"),
        "lnf_g": raw["ln_f_g"], "lnf_b": raw["ln_f_b"],
        "w_out": w_out_pad.astype(bf16), "b_out": b_out_pad,
    }


# ---------------- full forward ----------------
def transformer_decoder_forward(input_ids, p):
    B, T = input_ids.shape
    # Embedding gather is glue — plain JAX.
    tok = jnp.take(p["tok_emb"], input_ids, axis=0)            # (B, T, C)
    pos = p["pos_emb"][:T][None, :, :]                         # (1, T, C)
    x = (tok + pos).astype(jnp.float32)
    logits_pad = run_decoder(x, p)                             # (B, T, V_PAD)
    # TODO(synk): target=None path only (no cross-entropy loss computed).
    return logits_pad[..., :VOCAB_SIZE]                        # (B, T, VOCAB_SIZE)


if __name__ == "__main__":
    key = jax.random.PRNGKey(0)
    pkey, ikey = jax.random.split(key)
    params = prepare_params(init_raw_params(pkey))
    input_ids = jax.random.randint(ikey, (BATCH, SEQ_LEN), 0, VOCAB_SIZE, dtype=jnp.int32)

    fwd = jax.jit(transformer_decoder_forward)
    logits = fwd(input_ids, params)
    logits = jax.block_until_ready(logits)

    assert logits.shape == (BATCH, SEQ_LEN, VOCAB_SIZE)
    assert bool(jnp.all(jnp.isfinite(logits)))
    print("KERNEL_OK")
</pallas_src>

<mosaic_0001>
module attributes {stable_mosaic.version = 11 : i64} {
  func.func @decoder_kernel(%arg0: i32, %arg1: memref<1x16x64xf32, #tpu.memory_space<vmem>>, %arg2: memref<2x1x64xf32, #tpu.memory_space<vmem>>, %arg3: memref<2x1x64xf32, #tpu.memory_space<vmem>>, %arg4: memref<2x4x64x16xbf16, #tpu.memory_space<vmem>>, %arg5: memref<2x4x1x16xf32, #tpu.memory_space<vmem>>, %arg6: memref<2x4x64x16xbf16, #tpu.memory_space<vmem>>, %arg7: memref<2x4x1x16xf32, #tpu.memory_space<vmem>>, %arg8: memref<2x4x64x16xbf16, #tpu.memory_space<vmem>>, %arg9: memref<2x4x1x16xf32, #tpu.memory_space<vmem>>, %arg10: memref<2x4x16x64xbf16, #tpu.memory_space<vmem>>, %arg11: memref<2x1x64xf32, #tpu.memory_space<vmem>>, %arg12: memref<2x1x64xf32, #tpu.memory_space<vmem>>, %arg13: memref<2x1x64xf32, #tpu.memory_space<vmem>>, %arg14: memref<2x64x256xbf16, #tpu.memory_space<vmem>>, %arg15: memref<2x1x256xf32, #tpu.memory_space<vmem>>, %arg16: memref<2x256x64xbf16, #tpu.memory_space<vmem>>, %arg17: memref<2x1x64xf32, #tpu.memory_space<vmem>>, %arg18: memref<1x64xf32, #tpu.memory_space<vmem>>, %arg19: memref<1x64xf32, #tpu.memory_space<vmem>>, %arg20: memref<64x128xbf16, #tpu.memory_space<vmem>>, %arg21: memref<1x128xf32, #tpu.memory_space<vmem>>, %arg22: memref<1x16x128xf32, #tpu.memory_space<vmem>>) attributes {dimension_semantics = [#tpu.dimension_semantics<parallel>], iteration_bounds = array<i64: 2>, scalar_prefetch = 0 : i64, scratch_operands = 0 : i64, tpu.core_type = #tpu.core_type<tc>, window_params = [{transform_indices = @transform_0, window_bounds = array<i64: 1, 16, 64>}, {pipeline_mode = #tpu.pipeline_mode<synchronous>, transform_indices = @transform_1, window_bounds = array<i64: 2, 1, 64>}, {pipeline_mode = #tpu.pipeline_mode<synchronous>, transform_indices = @transform_2, window_bounds = array<i64: 2, 1, 64>}, {pipeline_mode = #tpu.pipeline_mode<synchronous>, transform_indices = @transform_3, window_bounds = array<i64: 2, 4, 64, 16>}, {pipeline_mode = #tpu.pipeline_mode<synchronous>, transform_indices = @transform_4, window_bounds = array<i64: 2, 4, 1, 16>}, {pipeline_mode = #tpu.pipeline_mode<synchronous>, transform_indices = @transform_5, window_bounds = array<i64: 2, 4, 64, 16>}, {pipeline_mode = #tpu.pipeline_mode<synchronous>, transform_indices = @transform_6, window_bounds = array<i64: 2, 4, 1, 16>}, {pipeline_mode = #tpu.pipeline_mode<synchronous>, transform_indices = @transform_7, window_bounds = array<i64: 2, 4, 64, 16>}, {pipeline_mode = #tpu.pipeline_mode<synchronous>, transform_indices = @transform_8, window_bounds = array<i64: 2, 4, 1, 16>}, {pipeline_mode = #tpu.pipeline_mode<synchronous>, transform_indices = @transform_9, window_bounds = array<i64: 2, 4, 16, 64>}, {pipeline_mode = #tpu.pipeline_mode<synchronous>, transform_indices = @transform_10, window_bounds = array<i64: 2, 1, 64>}, {pipeline_mode = #tpu.pipeline_mode<synchronous>, transform_indices = @transform_11, window_bounds = array<i64: 2, 1, 64>}, {pipeline_mode = #tpu.pipeline_mode<synchronous>, transform_indices = @transform_12, window_bounds = array<i64: 2, 1, 64>}, {pipeline_mode = #tpu.pipeline_mode<synchronous>, transform_indices = @transform_13, window_bounds = array<i64: 2, 64, 256>}, {pipeline_mode = #tpu.pipeline_mode<synchronous>, transform_indices = @transform_14, window_bounds = array<i64: 2, 1, 256>}, {pipeline_mode = #tpu.pipeline_mode<synchronous>, transform_indices = @transform_15, window_bounds = array<i64: 2, 256, 64>}, {pipeline_mode = #tpu.pipeline_mode<synchronous>, transform_indices = @transform_16, window_bounds = array<i64: 2, 1, 64>}, {pipeline_mode = #tpu.pipeline_mode<synchronous>, transform_indices = @transform_17, window_bounds = array<i64: 1, 64>}, {pipeline_mode = #tpu.pipeline_mode<synchronous>, transform_indices = @transform_18, window_bounds = array<i64: 1, 64>}, {pipeline_mode = #tpu.pipeline_mode<synchronous>, transform_indices = @transform_19, window_bounds = array<i64: 64, 128>}, {pipeline_mode = #tpu.pipeline_mode<synchronous>, transform_indices = @transform_20, window_bounds = array<i64: 1, 128>}, {transform_indices = @transform_21, window_bounds = array<i64: 1, 16, 128>}]} {
    %c0 = arith.constant 0 : index
    %c0_0 = arith.constant 0 : index
    %c0_1 = arith.constant 0 : index
    %0 = vector.load %arg1[%c0, %c0_0, %c0_1] : memref<1x16x64xf32, #tpu.memory_space<vmem>>, vector<1x16x64xf32>
    %1 = vector.shape_cast %0 : vector<1x16x64xf32> to vector<16x64xf32>
    %2 = tpu.iota {dimensions = array<i32: 0>} : vector<16x16xi32>
    %3 = tpu.iota {dimensions = array<i32: 1>} : vector<16x16xi32>
    %4 = arith.cmpi sge, %2, %3 : vector<16x16xi32>
    %c0_2 = arith.constant 0 : index
    %c0_3 = arith.constant 0 : index
    %c0_4 = arith.constant 0 : index
    %5 = vector.load %arg2[%c0_2, %c0_3, %c0_4] : memref<2x1x64xf32, #tpu.memory_space<vmem>>, vector<1x1x64xf32>
    %6 = vector.shape_cast %5 : vector<1x1x64xf32> to vector<1x64xf32>
    %c0_5 = arith.constant 0 : index
    %c0_6 = arith.constant 0 : index
    %c0_7 = arith.constant 0 : index
    %7 = vector.load %arg3[%c0_5, %c0_6, %c0_7] : memref<2x1x64xf32, #tpu.memory_space<vmem>>, vector<1x1x64xf32>
    %8 = vector.shape_cast %7 : vector<1x1x64xf32> to vector<1x64xf32>
    %cst = arith.constant dense<0.000000e+00> : vector<16xf32>
    %9 = vector.multi_reduction <add>, %1, %cst [1] : vector<16x64xf32> to vector<16xf32>
    %10 = vector.shape_cast %9 : vector<16xf32> to vector<16x1xf32>
    %cst_8 = arith.constant 6.400000e+01 : f32
    %11 = vector.broadcast %cst_8 : f32 to vector<16x1xf32>
    %12 = arith.divf %10, %11 : vector<16x1xf32>
    %13 = vector.broadcast %12 : vector<16x1xf32> to vector<16x64xf32>
    %14 = arith.subf %1, %13 : vector<16x64xf32>
    %15 = arith.mulf %14, %14 : vector<16x64xf32>
    %cst_9 = arith.constant dense<0.000000e+00> : vector<16xf32>
    %16 = vector.multi_reduction <add>, %15, %cst_9 [1] : vector<16x64xf32> to vector<16xf32>
    %17 = vector.shape_cast %16 : vector<16xf32> to vector<16x1xf32>
    %cst_10 = arith.constant 6.400000e+01 : f32
    %18 = vector.broadcast %cst_10 : f32 to vector<16x1xf32>
    %19 = arith.divf %17, %18 : vector<16x1xf32>
    %20 = vector.broadcast %12 : vector<16x1xf32> to vector<16x64xf32>
    %21 = arith.subf %1, %20 : vector<16x64xf32>
    %cst_11 = arith.constant 9.99999974E-6 : f32
    %22 = vector.broadcast %cst_11 : f32 to vector<16x1xf32>
    %23 = arith.addf %19, %22 : vector<16x1xf32>
    %24 = math.rsqrt %23 : vector<16x1xf32>
    %25 = vector.broadcast %24 : vector<16x1xf32> to vector<16x64xf32>
    %26 = arith.mulf %21, %25 : vector<16x64xf32>
    %27 = vector.broadcast %6 : vector<1x64xf32> to vector<16x64xf32>
    %28 = arith.mulf %26, %27 : vector<16x64xf32>
    %29 = vector.broadcast %8 : vector<1x64xf32> to vector<16x64xf32>
    %30 = arith.addf %28, %29 : vector<16x64xf32>
    %31 = arith.truncf %30 : vector<16x64xf32> to vector<16x64xbf16>
    %c0_12 = arith.constant 0 : index
    %c0_13 = arith.constant 0 : index
    %c0_14 = arith.constant 0 : index
    %c0_15 = arith.constant 0 : index
    %32 = vector.load %arg4[%c0_12, %c0_13, %c0_14, %c0_15] : memref<2x4x64x16xbf16, #tpu.memory_space<vmem>>, vector<1x1x64x16xbf16>
    %33 = vector.shape_cast %32 : vector<1x1x64x16xbf16> to vector<64x16xbf16>
    %cst_16 = arith.constant dense<0.000000e+00> : vector<16x16xf32>
    %34 = tpu.matmul %31, %33, %cst_16 {dimension_numbers = #tpu.dot_dimension_numbers<[1], [0], [0], [1], [0, 0, 1, 1], [], []>} : vector<16x64xbf16>, vector<64x16xbf16>, vector<16x16xf32> -> vector<16x16xf32>
    %c0_17 = arith.constant 0 : index
    %c0_18 = arith.constant 0 : index
    %c0_19 = arith.constant 0 : index
    %c0_20 = arith.constant 0 : index
    %35 = vector.load %arg5[%c0_17, %c0_18, %c0_19, %c0_20] : memref<2x4x1x16xf32, #tpu.memory_space<vmem>>, vector<1x1x1x16xf32>
    %36 = vector.shape_cast %35 : vector<1x1x1x16xf32> to vector<1x16xf32>
    %37 = vector.broadcast %36 : vector<1x16xf32> to vector<16x16xf32>
    %38 = arith.addf %34, %37 : vector<16x16xf32>
    %c0_21 = arith.constant 0 : index
    %c0_22 = arith.constant 0 : index
    %c0_23 = arith.constant 0 : index
    %c0_24 = arith.constant 0 : index
    %39 = vector.load %arg6[%c0_21, %c0_22, %c0_23, %c0_24] : memref<2x4x64x16xbf16, #tpu.memory_space<vmem>>, vector<1x1x64x16xbf16>
    %40 = vector.shape_cast %39 : vector<1x1x64x16xbf16> to vector<64x16xbf16>
    %cst_25 = arith.constant dense<0.000000e+00> : vector<16x16xf32>
    %41 = tpu.matmul %31, %40, %cst_25 {dimension_numbers = #tpu.dot_dimension_numbers<[1], [0], [0], [1], [0, 0, 1, 1], [], []>} : vector<16x64xbf16>, vector<64x16xbf16>, vector<16x16xf32> -> vector<16x16xf32>
    %c0_26 = arith.constant 0 : index
    %c0_27 = arith.constant 0 : index
    %c0_28 = arith.constant 0 : index
    %c0_29 = arith.constant 0 : index
    %42 = vector.load %arg7[%c0_26, %c0_27, %c0_28, %c0_29] : memref<2x4x1x16xf32, #tpu.memory_space<vmem>>, vector<1x1x1x16xf32>
    %43 = vector.shape_cast %42 : vector<1x1x1x16xf32> to vector<1x16xf32>
    %44 = vector.broadcast %43 : vector<1x16xf32> to vector<16x16xf32>
    %45 = arith.addf %41, %44 : vector<16x16xf32>
    %c0_30 = arith.constant 0 : index
    %c0_31 = arith.constant 0 : index
    %c0_32 = arith.constant 0 : index
    %c0_33 = arith.constant 0 : index
    %46 = vector.load %arg8[%c0_30, %c0_31, %c0_32, %c0_33] : memref<2x4x64x16xbf16, #tpu.memory_space<vmem>>, vector<1x1x64x16xbf16>
    %47 = vector.shape_cast %46 : vector<1x1x64x16xbf16> to vector<64x16xbf16>
    %cst_34 = arith.constant dense<0.000000e+00> : vector<16x16xf32>
    %48 = tpu.matmul %31, %47, %cst_34 {dimension_numbers = #tpu.dot_dimension_numbers<[1], [0], [0], [1], [0, 0, 1, 1], [], []>} : vector<16x64xbf16>, vector<64x16xbf16>, vector<16x16xf32> -> vector<16x16xf32>
    %c0_35 = arith.constant 0 : index
    %c0_36 = arith.constant 0 : index
    %c0_37 = arith.constant 0 : index
    %c0_38 = arith.constant 0 : index
    %49 = vector.load %arg9[%c0_35, %c0_36, %c0_37, %c0_38] : memref<2x4x1x16xf32, #tpu.memory_space<vmem>>, vector<1x1x1x16xf32>
    %50 = vector.shape_cast %49 : vector<1x1x1x16xf32> to vector<1x16xf32>
    %51 = vector.broadcast %50 : vector<1x16xf32> to vector<16x16xf32>
    %52 = arith.addf %48, %51 : vector<16x16xf32>
    %53 = arith.truncf %38 : vector<16x16xf32> to vector<16x16xbf16>
    %54 = arith.truncf %45 : vector<16x16xf32> to vector<16x16xbf16>
    "tpu.trace_start"() <{level = 10 : i32, message = "qd,kd->qk"}> : () -> ()
    %cst_39 = arith.constant dense<0.000000e+00> : vector<16x16xf32>
    %55 = tpu.matmul %53, %54, %cst_39 {dimension_numbers = #tpu.dot_dimension_numbers<[1], [1], [0], [0], [0, 0, 1, 0], [], []>} : vector<16x16xbf16>, vector<16x16xbf16>, vector<16x16xf32> -> vector<16x16xf32>
    %cst_40 = arith.constant 0xFF800000 : f32
    "tpu.trace_stop"() : () -> ()
    %56 = vector.broadcast %cst_40 : f32 to vector<16x16xf32>
    %57 = arith.select %4, %55, %56 : vector<16x16xi1>, vector<16x16xf32>
    %cst_41 = arith.constant dense<0xFF800000> : vector<16xf32>
    %58 = vector.multi_reduction <maximumf>, %57, %cst_41 [1] : vector<16x16xf32> to vector<16xf32>
    %cst_42 = arith.constant 0xFF800000 : f32
    %59 = vector.broadcast %cst_42 : f32 to vector<16xf32>
    %60 = arith.maximumf %59, %58 : vector<16xf32>
    %61 = vector.shape_cast %60 : vector<16xf32> to vector<16x1xf32>
    %62 = vector.broadcast %61 : vector<16x1xf32> to vector<16x16xf32>
    %63 = arith.subf %57, %62 : vector<16x16xf32>
    %64 = math.exp %63 : vector<16x16xf32>
    %cst_43 = arith.constant dense<0.000000e+00> : vector<16xf32>
    %65 = vector.multi_reduction <add>, %64, %cst_43 [1] : vector<16x16xf32> to vector<16xf32>
    %66 = vector.shape_cast %65 : vector<16xf32> to vector<16x1xf32>
    %67 = vector.broadcast %66 : vector<16x1xf32> to vector<16x16xf32>
    %68 = arith.divf %64, %67 : vector<16x16xf32>
    %69 = arith.truncf %68 : vector<16x16xf32> to vector<16x16xbf16>
    %70 = arith.truncf %52 : vector<16x16xf32> to vector<16x16xbf16>
    %cst_44 = arith.constant dense<0.000000e+00> : vector<16x16xf32>
    %71 = tpu.matmul %69, %70, %cst_44 {dimension_numbers = #tpu.dot_dimension_numbers<[1], [0], [0], [1], [0, 0, 1, 1], [], []>} : vector<16x16xbf16>, vector<16x16xbf16>, vector<16x16xf32> -> vector<16x16xf32>
    %72 = arith.truncf %71 : vector<16x16xf32> to vector<16x16xbf16>
    %c0_45 = arith.constant 0 : index
    %c0_46 = arith.constant 0 : index
    %c0_47 = arith.constant 0 : index
    %c0_48 = arith.constant 0 : index
    %73 = vector.load %arg10[%c0_45, %c0_46, %c0_47, %c0_48] : memref<2x4x16x64xbf16, #tpu.memory_space<vmem>>, vector<1x1x16x64xbf16>
    %74 = vector.shape_cast %73 : vector<1x1x16x64xbf16> to vector<16x64xbf16>
    %cst_49 = arith.constant dense<0.000000e+00> : vector<16x64xf32>
    %75 = tpu.matmul %72, %74, %cst_49 {dimension_numbers = #tpu.dot_dimension_numbers<[1], [0], [0], [1], [0, 0, 1, 1], [], []>} : vector<16x16xbf16>, vector<16x64xbf16>, vector<16x64xf32> -> vector<16x64xf32>
    %c0_50 = arith.constant 0 : index
    %c1 = arith.constant 1 : index
    %c0_51 = arith.constant 0 : index
    %c0_52 = arith.constant 0 : index
    %76 = vector.load %arg4[%c0_50, %c1, %c0_51, %c0_52] : memref<2x4x64x16xbf16, #tpu.memory_space<vmem>>, vector<1x1x64x16xbf16>
    %77 = vector.shape_cast %76 : vector<1x1x64x16xbf16> to vector<64x16xbf16>
    %cst_53 = arith.constant dense<0.000000e+00> : vector<16x16xf32>
    %78 = tpu.matmul %31, %77, %cst_53 {dimension_numbers = #tpu.dot_dimension_numbers<[1], [0], [0], [1], [0, 0, 1, 1], [], []>} : vector<16x64xbf16>, vector<64x16xbf16>, vector<16x16xf32> -> vector<16x16xf32>
    %c0_54 = arith.constant 0 : index
    %c1_55 = arith.constant 1 : index
    %c0_56 = arith.constant 0 : index
    %c0_57 = arith.constant 0 : index
    %79 = vector.load %arg5[%c0_54, %c1_55, %c0_56, %c0_57] : memref<2x4x1x16xf32, #tpu.memory_space<vmem>>, vector<1x1x1x16xf32>
    %80 = vector.shape_cast %79 : vector<1x1x1x16xf32> to vector<1x16xf32>
    %81 = vector.broadcast %80 : vector<1x16xf32> to vector<16x16xf32>
    %82 = arith.addf %78, %81 : vector<16x16xf32>
    %c0_58 = arith.constant 0 : index
    %c1_59 = arith.constant 1 : index
    %c0_60 = arith.constant 0 : index
    %c0_61 = arith.constant 0 : index
    %83 = vector.load %arg6[%c0_58, %c1_59, %c0_60, %c0_61] : memref<2x4x64x16xbf16, #tpu.memory_space<vmem>>, vector<1x1x64x16xbf16>
    %84 = vector.shape_cast %83 : vector<1x1x64x16xbf16> to vector<64x16xbf16>
    %cst_62 = arith.constant dense<0.000000e+00> : vector<16x16xf32>
    %85 = tpu.matmul %31, %84, %cst_62 {dimension_numbers = #tpu.dot_dimension_numbers<[1], [0], [0], [1], [0, 0, 1, 1], [], []>} : vector<16x64xbf16>, vector<64x16xbf16>, vector<16x16xf32> -> vector<16x16xf32>
    %c0_63 = arith.constant 0 : index
    %c1_64 = arith.constant 1 : index
    %c0_65 = arith.constant 0 : index
    %c0_66 = arith.constant 0 : index
    %86 = vector.load %arg7[%c0_63, %c1_64, %c0_65, %c0_66] : memref<2x4x1x16xf32, #tpu.memory_space<vmem>>, vector<1x1x1x16xf32>
    %87 = vector.shape_cast %86 : vector<1x1x1x16xf32> to vector<1x16xf32>
    %88 = vector.broadcast %87 : vector<1x16xf32> to vector<16x16xf32>
    %89 = arith.addf %85, %88 : vector<16x16xf32>
    %c0_67 = arith.constant 0 : index
    %c1_68 = arith.constant 1 : index
    %c0_69 = arith.constant 0 : index
    %c0_70 = arith.constant 0 : index
    %90 = vector.load %arg8[%c0_67, %c1_68, %c0_69, %c0_70] : memref<2x4x64x16xbf16, #tpu.memory_space<vmem>>, vector<1x1x64x16xbf16>
    %91 = vector.shape_cast %90 : vector<1x1x64x16xbf16> to vector<64x16xbf16>
    %cst_71 = arith.constant dense<0.000000e+00> : vector<16x16xf32>
    %92 = tpu.matmul %31, %91, %cst_71 {dimension_numbers = #tpu.dot_dimension_numbers<[1], [0], [0], [1], [0, 0, 1, 1], [], []>} : vector<16x64xbf16>, vector<64x16xbf16>, vector<16x16xf32> -> vector<16x16xf32>
    %c0_72 = arith.constant 0 : index
    %c1_73 = arith.constant 1 : index
    %c0_74 = arith.constant 0 : index
    %c0_75 = arith.constant 0 : index
    %93 = vector.load %arg9[%c0_72, %c1_73, %c0_74, %c0_75] : memref<2x4x1x16xf32, #tpu.memory_space<vmem>>, vector<1x1x1x16xf32>
    %94 = vector.shape_cast %93 : vector<1x1x1x16xf32> to vector<1x16xf32>
    %95 = vector.broadcast %94 : vector<1x16xf32> to vector<16x16xf32>
    %96 = arith.addf %92, %95 : vector<16x16xf32>
    %97 = arith.truncf %82 : vector<16x16xf32> to vector<16x16xbf16>
    %98 = arith.truncf %89 : vector<16x16xf32> to vector<16x16xbf16>
    "tpu.trace_start"() <{level = 10 : i32, message = "qd,kd->qk"}> : () -> ()
    %cst_76 = arith.constant dense<0.000000e+00> : vector<16x16xf32>
    %99 = tpu.matmul %97, %98, %cst_76 {dimension_numbers = #tpu.dot_dimension_numbers<[1], [1], [0], [0], [0, 0, 1, 0], [], []>} : vector<16x16xbf16>, vector<16x16xbf16>, vector<16x16xf32> -> vector<16x16xf32>
    %cst_77 = arith.constant 0xFF800000 : f32
    "tpu.trace_stop"() : () -> ()
    %100 = vector.broadcast %cst_77 : f32 to vector<16x16xf32>
    %101 = arith.select %4, %99, %100 : vector<16x16xi1>, vector<16x16xf32>
    %cst_78 = arith.constant dense<0xFF800000> : vector<16xf32>
    %102 = vector.multi_reduction <maximumf>, %101, %cst_78 [1] : vector<16x16xf32> to vector<16xf32>
    %cst_79 = arith.constant 0xFF800000 : f32
    %103 = vector.broadcast %cst_79 : f32 to vector<16xf32>
    %104 = arith.maximumf %103, %102 : vector<16xf32>
    %105 = vector.shape_cast %104 : vector<16xf32> to vector<16x1xf32>
    %106 = vector.broadcast %105 : vector<16x1xf32> to vector<16x16xf32>
    %107 = arith.subf %101, %106 : vector<16x16xf32>
    %108 = math.exp %107 : vector<16x16xf32>
    %cst_80 = arith.constant dense<0.000000e+00> : vector<16xf32>
    %109 = vector.multi_reduction <add>, %108, %cst_80 [1] : vector<16x16xf32> to vector<16xf32>
    %110 = vector.shape_cast %109 : vector<16xf32> to vector<16x1xf32>
    %111 = vector.broadcast %110 : vector<16x1xf32> to vector<16x16xf32>
    %112 = arith.divf %108, %111 : vector<16x16xf32>
    %113 = arith.truncf %112 : vector<16x16xf32> to vector<16x16xbf16>
    %114 = arith.truncf %96 : vector<16x16xf32> to vector<16x16xbf16>
    %cst_81 = arith.constant dense<0.000000e+00> : vector<16x16xf32>
    %115 = tpu.matmul %113, %114, %cst_81 {dimension_numbers = #tpu.dot_dimension_numbers<[1], [0], [0], [1], [0, 0, 1, 1], [], []>} : vector<16x16xbf16>, vector<16x16xbf16>, vector<16x16xf32> -> vector<16x16xf32>
    %116 = arith.truncf %115 : vector<16x16xf32> to vector<16x16xbf16>
    %c0_82 = arith.constant 0 : index
    %c1_83 = arith.constant 1 : index
    %c0_84 = arith.constant 0 : index
    %c0_85 = arith.constant 0 : index
    %117 = vector.load %arg10[%c0_82, %c1_83, %c0_84, %c0_85] : memref<2x4x16x64xbf16, #tpu.memory_space<vmem>>, vector<1x1x16x64xbf16>
    %118 = vector.shape_cast %117 : vector<1x1x16x64xbf16> to vector<16x64xbf16>
    %cst_86 = arith.constant dense<0.000000e+00> : vector<16x64xf32>
    %119 = tpu.matmul %116, %118, %cst_86 {dimension_numbers = #tpu.dot_dimension_numbers<[1], [0], [0], [1], [0, 0, 1, 1], [], []>} : vector<16x16xbf16>, vector<16x64xbf16>, vector<16x64xf32> -> vector<16x64xf32>
    %120 = arith.addf %75, %119 : vector<16x64xf32>
    %c0_87 = arith.constant 0 : index
    %c2 = arith.constant 2 : index
    %c0_88 = arith.constant 0 : index
    %c0_89 = arith.constant 0 : index
    %121 = vector.load %arg4[%c0_87, %c2, %c0_88, %c0_89] : memref<2x4x64x16xbf16, #tpu.memory_space<vmem>>, vector<1x1x64x16xbf16>
    %122 = vector.shape_cast %121 : vector<1x1x64x16xbf16> to vector<64x16xbf16>
    %cst_90 = arith.constant dense<0.000000e+00> : vector<16x16xf32>
    %123 = tpu.matmul %31, %122, %cst_90 {dimension_numbers = #tpu.dot_dimension_numbers<[1], [0], [0], [1], [0, 0, 1, 1], [], []>} : vector<16x64xbf16>, vector<64x16xbf16>, vector<16x16xf32> -> vector<16x16xf32>
    %c0_91 = arith.constant 0 : index
    %c2_92 = arith.constant 2 : index
    %c0_93 = arith.constant 0 : index
    %c0_94 = arith.constant 0 : index
    %124 = vector.load %arg5[%c0_91, %c2_92, %c0_93, %c0_94] : memref<2x4x1x16xf32, #tpu.memory_space<vmem>>, vector<1x1x1x16xf32>
    %125 = vector.shape_cast %124 : vector<1x1x1x16xf32> to vector<1x16xf32>
    %126 = vector.broadcast %125 : vector<1x16xf32> to vector<16x16xf32>
    %127 = arith.addf %123, %126 : vector<16x16xf32>
    %c0_95 = arith.constant 0 : index
    %c2_96 = arith.constant 2 : index
    %c0_97 = arith.constant 0 : index
    %c0_98 = arith.constant 0 : index
    %128 = vector.load %arg6[%c0_95, %c2_96, %c0_97, %c0_98] : memref<2x4x64x16xbf16, #tpu.memory_space<vmem>>, vector<1x1x64x16xbf16>
    %129 = vector.shape_cast %128 : vector<1x1x64x16xbf16> to vector<64x16xbf16>
    %cst_99 = arith.constant dense<0.000000e+00> : vector<16x16xf32>
    %130 = tpu.matmul %31, %129, %cst_99 {dimension_numbers = #tpu.dot_dimension_numbers<[1], [0], [0], [1], [0, 0, 1, 1], [], []>} : vector<16x64xbf16>, vector<64x16xbf16>, vector<16x16xf32> -> vector<16x16xf32>
    %c0_100 = arith.constant 0 : index
    %c2_101 = arith.constant 2 : index
    %c0_102 = arith.constant 0 : index
    %c0_103 = arith.constant 0 : index
    %131 = vector.load %arg7[%c0_100, %c2_101, %c0_102, %c0_103] : memref<2x4x1x16xf32, #tpu.memory_space<vmem>>, vector<1x1x1x16xf32>
    %132 = vector.shape_cast %131 : vector<1x1x1x16xf32> to vector<1x16xf32>
    %133 = vector.broadcast %132 : vector<1x16xf32> to vector<16x16xf32>
    %134 = arith.addf %130, %133 : vector<16x16xf32>
    %c0_104 = arith.constant 0 : index
    %c2_105 = arith.constant 2 : index
    %c0_106 = arith.constant 0 : index
    %c0_107 = arith.constant 0 : index
    %135 = vector.load %arg8[%c0_104, %c2_105, %c0_106, %c0_107] : memref<2x4x64x16xbf16, #tpu.memory_space<vmem>>, vector<1x1x64x16xbf16>
    %136 = vector.shape_cast %135 : vector<1x1x64x16xbf16> to vector<64x16xbf16>
    %cst_108 = arith.constant dense<0.000000e+00> : vector<16x16xf32>
    %137 = tpu.matmul %31, %136, %cst_108 {dimension_numbers = #tpu.dot_dimension_numbers<[1], [0], [0], [1], [0, 0, 1, 1], [], []>} : vector<16x64xbf16>, vector<64x16xbf16>, vector<16x16xf32> -> vector<16x16xf32>
    %c0_109 = arith.constant 0 : index
    %c2_110 = arith.constant 2 : index
    %c0_111 = arith.constant 0 : index
    %c0_112 = arith.constant 0 : index
    %138 = vector.load %arg9[%c0_109, %c2_110, %c0_111, %c0_112] : memref<2x4x1x16xf32, #tpu.memory_space<vmem>>, vector<1x1x1x16xf32>
    %139 = vector.shape_cast %138 : vector<1x1x1x16xf32> to vector<1x16xf32>
    %140 = vector.broadcast %139 : vector<1x16xf32> to vector<16x16xf32>
    %141 = arith.addf %137, %140 : vector<16x16xf32>
    %142 = arith.truncf %127 : vector<16x16xf32> to vector<16x16xbf16>
    %143 = arith.truncf %134 : vector<16x16xf32> to vector<16x16xbf16>
    "tpu.trace_start"() <{level = 10 : i32, message = "qd,kd->qk"}> : () -> ()
    %cst_113 = arith.constant dense<0.000000e+00> : vector<16x16xf32>
    %144 = tpu.matmul %142, %143, %cst_113 {dimension_numbers = #tpu.dot_dimension_numbers<[1], [1], [0], [0], [0, 0, 1, 0], [], []>} : vector<16x16xbf16>, vector<16x16xbf16>, vector<16x16xf32> -> vector<16x16xf32>
    %cst_114 = arith.constant 0xFF800000 : f32
    "tpu.trace_stop"() : () -> ()
    %145 = vector.broadcast %cst_114 : f32 to vector<16x16xf32>
    %146 = arith.select %4, %144, %145 : vector<16x16xi1>, vector<16x16xf32>
    %cst_115 = arith.constant dense<0xFF800000> : vector<16xf32>
    %147 = vector.multi_reduction <maximumf>, %146, %cst_115 [1] : vector<16x16xf32> to vector<16xf32>
    %cst_116 = arith.constant 0xFF800000 : f32
    %148 = vector.broadcast %cst_116 : f32 to vector<16xf32>
    %149 = arith.maximumf %148, %147 : vector<16xf32>
    %150 = vector.shape_cast %149 : vector<16xf32> to vector<16x1xf32>
    %151 = vector.broadcast %150 : vector<16x1xf32> to vector<16x16xf32>
    %152 = arith.subf %146, %151 : vector<16x16xf32>
    %153 = math.exp %152 : vector<16x16xf32>
    %cst_117 = arith.constant dense<0.000000e+00> : vector<16xf32>
    %154 = vector.multi_reduction <add>, %153, %cst_117 [1] : vector<16x16xf32> to vector<16xf32>
    %155 = vector.shape_cast %154 : vector<16xf32> to vector<16x1xf32>
    %156 = vector.broadcast %155 : vector<16x1xf32> to vector<16x16xf32>
    %157 = arith.divf %153, %156 : vector<16x16xf32>
    %158 = arith.truncf %157 : vector<16x16xf32> to vector<16x16xbf16>
    %159 = arith.truncf %141 : vector<16x16xf32> to vector<16x16xbf16>
    %cst_118 = arith.constant dense<0.000000e+00> : vector<16x16xf32>
    %160 = tpu.matmul %158, %159, %cst_118 {dimension_numbers = #tpu.dot_dimension_numbers<[1], [0], [0], [1], [0, 0, 1, 1], [], []>} : vector<16x16xbf16>, vector<16x16xbf16>, vector<16x16xf32> -> vector<16x16xf32>
    %161 = arith.truncf %160 : vector<16x16xf32> to vector<16x16xbf16>
    %c0_119 = arith.constant 0 : index
    %c2_120 = arith.constant 2 : index
    %c0_121 = arith.constant 0 : index
    %c0_122 = arith.constant 0 : index
    %162 = vector.load %arg10[%c0_119, %c2_120, %c0_121, %c0_122] : memref<2x4x16x64xbf16, #tpu.memory_space<vmem>>, vector<1x1x16x64xbf16>
    %163 = vector.shape_cast %162 : vector<1x1x16x64xbf16> to vector<16x64xbf16>
    %cst_123 = arith.constant dense<0.000000e+00> : vector<16x64xf32>
    %164 = tpu.matmul %161, %163, %cst_123 {dimension_numbers = #tpu.dot_dimension_numbers<[1], [0], [0], [1], [0, 0, 1, 1], [], []>} : vector<16x16xbf16>, vector<16x64xbf16>, vector<16x64xf32> -> vector<16x64xf32>
    %165 = arith.addf %120, %164 : vector<16x64xf32>
    %c0_124 = arith.constant 0 : index
    %c3 = arith.constant 3 : index
    %c0_125 = arith.constant 0 : index
    %c0_126 = arith.constant 0 : index
    %166 = vector.load %arg4[%c0_124, %c3, %c0_125, %c0_126] : memref<2x4x64x16xbf16, #tpu.memory_space<vmem>>, vector<1x1x64x16xbf16>
    %167 = vector.shape_cast %166 : vector<1x1x64x16xbf16> to vector<64x16xbf16>
    %cst_127 = arith.constant dense<0.000000e+00> : vector<16x16xf32>
    %168 = tpu.matmul %31, %167, %cst_127 {dimension_numbers = #tpu.dot_dimension_numbers<[1], [0], [0], [1], [0, 0, 1, 1], [], []>} : vector<16x64xbf16>, vector<64x16xbf16>, vector<16x16xf32> -> vector<16x16xf32>
    %c0_128 = arith.constant 0 : index
    %c3_129 = arith.constant 3 : index
    %c0_130 = arith.constant 0 : index
    %c0_131 = arith.constant 0 : index
    %169 = vector.load %arg5[%c0_128, %c3_129, %c0_130, %c0_131] : memref<2x4x1x16xf32, #tpu.memory_space<vmem>>, vector<1x1x1x16xf32>
    %170 = vector.shape_cast %169 : vector<1x1x1x16xf32> to vector<1x16xf32>
    %171 = vector.broadcast %170 : vector<1x16xf32> to vector<16x16xf32>
    %172 = arith.addf %168, %171 : vector<16x16xf32>
    %c0_132 = arith.constant 0 : index
    %c3_133 = arith.constant 3 : index
    %c0_134 = arith.constant 0 : index
    %c0_135 = arith.constant 0 : index
    %173 = vector.load %arg6[%c0_132, %c3_133, %c0_134, %c0_135] : memref<2x4x64x16xbf16, #tpu.memory_space<vmem>>, vector<1x1x64x16xbf16>
    %174 = vector.shape_cast %173 : vector<1x1x64x16xbf16> to vector<64x16xbf16>
    %cst_136 = arith.constant dense<0.000000e+00> : vector<16x16xf32>
    %175 = tpu.matmul %31, %174, %cst_136 {dimension_numbers = #tpu.dot_dimension_numbers<[1], [0], [0], [1], [0, 0, 1, 1], [], []>} : vector<16x64xbf16>, vector<64x16xbf16>, vector<16x16xf32> -> vector<16x16xf32>
    %c0_137 = arith.constant 0 : index
    %c3_138 = arith.constant 3 : index
    %c0_139 = arith.constant 0 : index
    %c0_140 = arith.constant 0 : index
    %176 = vector.load %arg7[%c0_137, %c3_138, %c0_139, %c0_140] : memref<2x4x1x16xf32, #tpu.memory_space<vmem>>, vector<1x1x1x16xf32>
    %177 = vector.shape_cast %176 : vector<1x1x1x16xf32> to vector<1x16xf32>
    %178 = vector.broadcast %177 : vector<1x16xf32> to vector<16x16xf32>
    %179 = arith.addf %175, %178 : vector<16x16xf32>
    %c0_141 = arith.constant 0 : index
    %c3_142 = arith.constant 3 : index
    %c0_143 = arith.constant 0 : index
    %c0_144 = arith.constant 0 : index
    %180 = vector.load %arg8[%c0_141, %c3_142, %c0_143, %c0_144] : memref<2x4x64x16xbf16, #tpu.memory_space<vmem>>, vector<1x1x64x16xbf16>
    %181 = vector.shape_cast %180 : vector<1x1x64x16xbf16> to vector<64x16xbf16>
    %cst_145 = arith.constant dense<0.000000e+00> : vector<16x16xf32>
    %182 = tpu.matmul %31, %181, %cst_145 {dimension_numbers = #tpu.dot_dimension_numbers<[1], [0], [0], [1], [0, 0, 1, 1], [], []>} : vector<16x64xbf16>, vector<64x16xbf16>, vector<16x16xf32> -> vector<16x16xf32>
    %c0_146 = arith.constant 0 : index
    %c3_147 = arith.constant 3 : index
    %c0_148 = arith.constant 0 : index
    %c0_149 = arith.constant 0 : index
    %183 = vector.load %arg9[%c0_146, %c3_147, %c0_148, %c0_149] : memref<2x4x1x16xf32, #tpu.memory_space<vmem>>, vector<1x1x1x16xf32>
    %184 = vector.shape_cast %183 : vector<1x1x1x16xf32> to vector<1x16xf32>
    %185 = vector.broadcast %184 : vector<1x16xf32> to vector<16x16xf32>
    %186 = arith.addf %182, %185 : vector<16x16xf32>
    %187 = arith.truncf %172 : vector<16x16xf32> to vector<16x16xbf16>
    %188 = arith.truncf %179 : vector<16x16xf32> to vector<16x16xbf16>
    "tpu.trace_start"() <{level = 10 : i32, message = "qd,kd->qk"}> : () -> ()
    %cst_150 = arith.constant dense<0.000000e+00> : vector<16x16xf32>
    %189 = tpu.matmul %187, %188, %cst_150 {dimension_numbers = #tpu.dot_dimension_numbers<[1], [1], [0], [0], [0, 0, 1, 0], [], []>} : vector<16x16xbf16>, vector<16x16xbf16>, vector<16x16xf32> -> vector<16x16xf32>
    %cst_151 = arith.constant 0xFF800000 : f32
    "tpu.trace_stop"() : () -> ()
    %190 = vector.broadcast %cst_151 : f32 to vector<16x16xf32>
    %191 = arith.select %4, %189, %190 : vector<16x16xi1>, vector<16x16xf32>
    %cst_152 = arith.constant dense<0xFF800000> : vector<16xf32>
    %192 = vector.multi_reduction <maximumf>, %191, %cst_152 [1] : vector<16x16xf32> to vector<16xf32>
    %cst_153 = arith.constant 0xFF800000 : f32
    %193 = vector.broadcast %cst_153 : f32 to vector<16xf32>
    %194 = arith.maximumf %193, %192 : vector<16xf32>
    %195 = vector.shape_cast %194 : vector<16xf32> to vector<16x1xf32>
    %196 = vector.broadcast %195 : vector<16x1xf32> to vector<16x16xf32>
    %197 = arith.subf %191, %196 : vector<16x16xf32>
    %198 = math.exp %197 : vector<16x16xf32>
    %cst_154 = arith.constant dense<0.000000e+00> : vector<16xf32>
    %199 = vector.multi_reduction <add>, %198, %cst_154 [1] : vector<16x16xf32> to vector<16xf32>
    %200 = vector.shape_cast %199 : vector<16xf32> to vector<16x1xf32>
    %201 = vector.broadcast %200 : vector<16x1xf32> to vector<16x16xf32>
    %202 = arith.divf %198, %201 : vector<16x16xf32>
    %203 = arith.truncf %202 : vector<16x16xf32> to vector<16x16xbf16>
    %204 = arith.truncf %186 : vector<16x16xf32> to vector<16x16xbf16>
    %cst_155 = arith.constant dense<0.000000e+00> : vector<16x16xf32>
    %205 = tpu.matmul %203, %204, %cst_155 {dimension_numbers = #tpu.dot_dimension_numbers<[1], [0], [0], [1], [0, 0, 1, 1], [], []>} : vector<16x16xbf16>, vector<16x16xbf16>, vector<16x16xf32> -> vector<16x16xf32>
    %206 = arith.truncf %205 : vector<16x16xf32> to vector<16x16xbf16>
    %c0_156 = arith.constant 0 : index
    %c3_157 = arith.constant 3 : index
    %c0_158 = arith.constant 0 : index
    %c0_159 = arith.constant 0 : index
    %207 = vector.load %arg10[%c0_156, %c3_157, %c0_158, %c0_159] : memref<2x4x16x64xbf16, #tpu.memory_space<vmem>>, vector<1x1x16x64xbf16>
    %208 = vector.shape_cast %207 : vector<1x1x16x64xbf16> to vector<16x64xbf16>
    %cst_160 = arith.constant dense<0.000000e+00> : vector<16x64xf32>
    %209 = tpu.matmul %206, %208, %cst_160 {dimension_numbers = #tpu.dot_dimension_numbers<[1], [0], [0], [1], [0, 0, 1, 1], [], []>} : vector<16x16xbf16>, vector<16x64xbf16>, vector<16x64xf32> -> vector<16x64xf32>
    %210 = arith.addf %165, %209 : vector<16x64xf32>
    %211 = arith.addf %1, %210 : vector<16x64xf32>
    %c0_161 = arith.constant 0 : index
    %c0_162 = arith.constant 0 : index
    %c0_163 = arith.constant 0 : index
    %212 = vector.load %arg11[%c0_161, %c0_162, %c0_163] : memref<2x1x64xf32, #tpu.memory_space<vmem>>, vector<1x1x64xf32>
    %213 = vector.shape_cast %212 : vector<1x1x64xf32> to vector<1x64xf32>
    %214 = vector.broadcast %213 : vector<1x64xf32> to vector<16x64xf32>
    %215 = arith.addf %211, %214 : vector<16x64xf32>
    %c0_164 = arith.constant 0 : index
    %c0_165 = arith.constant 0 : index
    %c0_166 = arith.constant 0 : index
    %216 = vector.load %arg12[%c0_164, %c0_165, %c0_166] : memref<2x1x64xf32, #tpu.memory_space<vmem>>, vector<1x1x64xf32>
    %217 = vector.shape_cast %216 : vector<1x1x64xf32> to vector<1x64xf32>
    %c0_167 = arith.constant 0 : index
    %c0_168 = arith.constant 0 : index
    %c0_169 = arith.constant 0 : index
    %218 = vector.load %arg13[%c0_167, %c0_168, %c0_169] : memref<2x1x64xf32, #tpu.memory_space<vmem>>, vector<1x1x64xf32>
    %219 = vector.shape_cast %218 : vector<1x1x64xf32> to vector<1x64xf32>
    %cst_170 = arith.constant dense<0.000000e+00> : vector<16xf32>
    %220 = vector.multi_reduction <add>, %215, %cst_170 [1] : vector<16x64xf32> to vector<16xf32>
    %221 = vector.shape_cast %220 : vector<16xf32> to vector<16x1xf32>
    %cst_171 = arith.constant 6.400000e+01 : f32
    %222 = vector.broadcast %cst_171 : f32 to vector<16x1xf32>
    %223 = arith.divf %221, %222 : vector<16x1xf32>
    %224 = vector.broadcast %223 : vector<16x1xf32> to vector<16x64xf32>
    %225 = arith.subf %215, %224 : vector<16x64xf32>
    %226 = arith.mulf %225, %225 : vector<16x64xf32>
    %cst_172 = arith.constant dense<0.000000e+00> : vector<16xf32>
    %227 = vector.multi_reduction <add>, %226, %cst_172 [1] : vector<16x64xf32> to vector<16xf32>
    %228 = vector.shape_cast %227 : vector<16xf32> to vector<16x1xf32>
    %cst_173 = arith.constant 6.400000e+01 : f32
    %229 = vector.broadcast %cst_173 : f32 to vector<16x1xf32>
    %230 = arith.divf %228, %229 : vector<16x1xf32>
    %231 = vector.broadcast %223 : vector<16x1xf32> to vector<16x64xf32>
    %232 = arith.subf %215, %231 : vector<16x64xf32>
    %cst_174 = arith.constant 9.99999974E-6 : f32
    %233 = vector.broadcast %cst_174 : f32 to vector<16x1xf32>
    %234 = arith.addf %230, %233 : vector<16x1xf32>
    %235 = math.rsqrt %234 : vector<16x1xf32>
    %236 = vector.broadcast %235 : vector<16x1xf32> to vector<16x64xf32>
    %237 = arith.mulf %232, %236 : vector<16x64xf32>
    %238 = vector.broadcast %217 : vector<1x64xf32> to vector<16x64xf32>
    %239 = arith.mulf %237, %238 : vector<16x64xf32>
    %240 = vector.broadcast %219 : vector<1x64xf32> to vector<16x64xf32>
    %241 = arith.addf %239, %240 : vector<16x64xf32>
    %242 = arith.truncf %241 : vector<16x64xf32> to vector<16x64xbf16>
    %c0_175 = arith.constant 0 : index
    %c0_176 = arith.constant 0 : index
    %c0_177 = arith.constant 0 : index
    %243 = vector.load %arg14[%c0_175, %c0_176, %c0_177] : memref<2x64x256xbf16, #tpu.memory_space<vmem>>, vector<1x64x256xbf16>
    %244 = vector.shape_cast %243 : vector<1x64x256xbf16> to vector<64x256xbf16>
    %cst_178 = arith.constant dense<0.000000e+00> : vector<16x256xf32>
    %245 = tpu.matmul %242, %244, %cst_178 {dimension_numbers = #tpu.dot_dimension_numbers<[1], [0], [0], [1], [0, 0, 1, 1], [], []>} : vector<16x64xbf16>, vector<64x256xbf16>, vector<16x256xf32> -> vector<16x256xf32>
    %c0_179 = arith.constant 0 : index
    %c0_180 = arith.constant 0 : index
    %c0_181 = arith.constant 0 : index
    %246 = vector.load %arg15[%c0_179, %c0_180, %c0_181] : memref<2x1x256xf32, #tpu.memory_space<vmem>>, vector<1x1x256xf32>
    %247 = vector.shape_cast %246 : vector<1x1x256xf32> to vector<1x256xf32>
    %248 = vector.broadcast %247 : vector<1x256xf32> to vector<16x256xf32>
    %249 = arith.addf %245, %248 : vector<16x256xf32>
    %cst_182 = arith.constant 0.000000e+00 : f32
    %250 = vector.broadcast %cst_182 : f32 to vector<16x256xf32>
    %251 = arith.maximumf %249, %250 : vector<16x256xf32>
    %252 = arith.truncf %251 : vector<16x256xf32> to vector<16x256xbf16>
    %c0_183 = arith.constant 0 : index
    %c0_184 = arith.constant 0 : index
    %c0_185 = arith.constant 0 : index
    %253 = vector.load %arg16[%c0_183, %c0_184, %c0_185] : memref<2x256x64xbf16, #tpu.memory_space<vmem>>, vector<1x256x64xbf16>
    %254 = vector.shape_cast %253 : vector<1x256x64xbf16> to vector<256x64xbf16>
    %cst_186 = arith.constant dense<0.000000e+00> : vector<16x64xf32>
    %255 = tpu.matmul %252, %254, %cst_186 {dimension_numbers = #tpu.dot_dimension_numbers<[1], [0], [0], [1], [0, 0, 1, 1], [], []>} : vector<16x256xbf16>, vector<256x64xbf16>, vector<16x64xf32> -> vector<16x64xf32>
    %c0_187 = arith.constant 0 : index
    %c0_188 = arith.constant 0 : index
    %c0_189 = arith.constant 0 : index
    %256 = vector.load %arg17[%c0_187, %c0_188, %c0_189] : memref<2x1x64xf32, #tpu.memory_space<vmem>>, vector<1x1x64xf32>
    %257 = vector.shape_cast %256 : vector<1x1x64xf32> to vector<1x64xf32>
    %258 = vector.broadcast %257 : vector<1x64xf32> to vector<16x64xf32>
    %259 = arith.addf %255, %258 : vector<16x64xf32>
    %260 = arith.addf %215, %259 : vector<16x64xf32>
    %c1_190 = arith.constant 1 : index
    %c0_191 = arith.constant 0 : index
    %c0_192 = arith.constant 0 : index
    %261 = vector.load %arg2[%c1_190, %c0_191, %c0_192] : memref<2x1x64xf32, #tpu.memory_space<vmem>>, vector<1x1x64xf32>
    %262 = vector.shape_cast %261 : vector<1x1x64xf32> to vector<1x64xf32>
    %c1_193 = arith.constant 1 : index
    %c0_194 = arith.constant 0 : index
    %c0_195 = arith.constant 0 : index
    %263 = vector.load %arg3[%c1_193, %c0_194, %c0_195] : memref<2x1x64xf32, #tpu.memory_space<vmem>>, vector<1x1x64xf32>
    %264 = vector.shape_cast %263 : vector<1x1x64xf32> to vector<1x64xf32>
    %cst_196 = arith.constant dense<0.000000e+00> : vector<16xf32>
    %265 = vector.multi_reduction <add>, %260, %cst_196 [1] : vector<16x64xf32> to vector<16xf32>
    %266 = vector.shape_cast %265 : vector<16xf32> to vector<16x1xf32>
    %cst_197 = arith.constant 6.400000e+01 : f32
    %267 = vector.broadcast %cst_197 : f32 to vector<16x1xf32>
    %268 = arith.divf %266, %267 : vector<16x1xf32>
    %269 = vector.broadcast %268 : vector<16x1xf32> to vector<16x64xf32>
    %270 = arith.subf %260, %269 : vector<16x64xf32>
    %271 = arith.mulf %270, %270 : vector<16x64xf32>
    %cst_198 = arith.constant dense<0.000000e+00> : vector<16xf32>
    %272 = vector.multi_reduction <add>, %271, %cst_198 [1] : vector<16x64xf32> to vector<16xf32>
    %273 = vector.shape_cast %272 : vector<16xf32> to vector<16x1xf32>
    %cst_199 = arith.constant 6.400000e+01 : f32
    %274 = vector.broadcast %cst_199 : f32 to vector<16x1xf32>
    %275 = arith.divf %273, %274 : vector<16x1xf32>
    %276 = vector.broadcast %268 : vector<16x1xf32> to vector<16x64xf32>
    %277 = arith.subf %260, %276 : vector<16x64xf32>
    %cst_200 = arith.constant 9.99999974E-6 : f32
    %278 = vector.broadcast %cst_200 : f32 to vector<16x1xf32>
    %279 = arith.addf %275, %278 : vector<16x1xf32>
    %280 = math.rsqrt %279 : vector<16x1xf32>
    %281 = vector.broadcast %280 : vector<16x1xf32> to vector<16x64xf32>
    %282 = arith.mulf %277, %281 : vector<16x64xf32>
    %283 = vector.broadcast %262 : vector<1x64xf32> to vector<16x64xf32>
    %284 = arith.mulf %282, %283 : vector<16x64xf32>
    %285 = vector.broadcast %264 : vector<1x64xf32> to vector<16x64xf32>
    %286 = arith.addf %284, %285 : vector<16x64xf32>
    %287 = arith.truncf %286 : vector<16x64xf32> to vector<16x64xbf16>
    %c1_201 = arith.constant 1 : index
    %c0_202 = arith.constant 0 : index
    %c0_203 = arith.constant 0 : index
    %c0_204 = arith.constant 0 : index
    %288 = vector.load %arg4[%c1_201, %c0_202, %c0_203, %c0_204] : memref<2x4x64x16xbf16, #tpu.memory_space<vmem>>, vector<1x1x64x16xbf16>
    %289 = vector.shape_cast %288 : vector<1x1x64x16xbf16> to vector<64x16xbf16>
    %cst_205 = arith.constant dense<0.000000e+00> : vector<16x16xf32>
    %290 = tpu.matmul %287, %289, %cst_205 {dimension_numbers = #tpu.dot_dimension_numbers<[1], [0], [0], [1], [0, 0, 1, 1], [], []>} : vector<16x64xbf16>, vector<64x16xbf16>, vector<16x16xf32> -> vector<16x16xf32>
    %c1_206 = arith.constant 1 : index
    %c0_207 = arith.constant 0 : index
    %c0_208 = arith.constant 0 : index
    %c0_209 = arith.constant 0 : index
    %291 = vector.load %arg5[%c1_206, %c0_207, %c0_208, %c0_209] : memref<2x4x1x16xf32, #tpu.memory_space<vmem>>, vector<1x1x1x16xf32>
    %292 = vector.shape_cast %291 : vector<1x1x1x16xf32> to vector<1x16xf32>
    %293 = vector.broadcast %292 : vector<1x16xf32> to vector<16x16xf32>
    %294 = arith.addf %290, %293 : vector<16x16xf32>
    %c1_210 = arith.constant 1 : index
    %c0_211 = arith.constant 0 : index
    %c0_212 = arith.constant 0 : index
    %c0_213 = arith.constant 0 : index
    %295 = vector.load %arg6[%c1_210, %c0_211, %c0_212, %c0_213] : memref<2x4x64x16xbf16, #tpu.memory_space<vmem>>, vector<1x1x64x16xbf16>
    %296 = vector.shape_cast %295 : vector<1x1x64x16xbf16> to vector<64x16xbf16>
    %cst_214 = arith.constant dense<0.000000e+00> : vector<16x16xf32>
    %297 = tpu.matmul %287, %296, %cst_214 {dimension_numbers = #tpu.dot_dimension_numbers<[1], [0], [0], [1], [0, 0, 1, 1], [], []>} : vector<16x64xbf16>, vector<64x16xbf16>, vector<16x16xf32> -> vector<16x16xf32>
    %c1_215 = arith.constant 1 : index
    %c0_216 = arith.constant 0 : index
    %c0_217 = arith.constant 0 : index
    %c0_218 = arith.constant 0 : index
    %298 = vector.load %arg7[%c1_215, %c0_216, %c0_217, %c0_218] : memref<2x4x1x16xf32, #tpu.memory_space<vmem>>, vector<1x1x1x16xf32>
    %299 = vector.shape_cast %298 : vector<1x1x1x16xf32> to vector<1x16xf32>
    %300 = vector.broadcast %299 : vector<1x16xf32> to vector<16x16xf32>
    %301 = arith.addf %297, %300 : vector<16x16xf32>
    %c1_219 = arith.constant 1 : index
    %c0_220 = arith.constant 0 : index
    %c0_221 = arith.constant 0 : index
    %c0_222 = arith.constant 0 : index
    %302 = vector.load %arg8[%c1_219, %c0_220, %c0_221, %c0_222] : memref<2x4x64x16xbf16, #tpu.memory_space<vmem>>, vector<1x1x64x16xbf16>
    %303 = vector.shape_cast %302 : vector<1x1x64x16xbf16> to vector<64x16xbf16>
    %cst_223 = arith.constant dense<0.000000e+00> : vector<16x16xf32>
    %304 = tpu.matmul %287, %303, %cst_223 {dimension_numbers = #tpu.dot_dimension_numbers<[1], [0], [0], [1], [0, 0, 1, 1], [], []>} : vector<16x64xbf16>, vector<64x16xbf16>, vector<16x16xf32> -> vector<16x16xf32>
    %c1_224 = arith.constant 1 : index
    %c0_225 = arith.constant 0 : index
    %c0_226 = arith.constant 0 : index
    %c0_227 = arith.constant 0 : index
    %305 = vector.load %arg9[%c1_224, %c0_225, %c0_226, %c0_227] : memref<2x4x1x16xf32, #tpu.memory_space<vmem>>, vector<1x1x1x16xf32>
    %306 = vector.shape_cast %305 : vector<1x1x1x16xf32> to vector<1x16xf32>
    %307 = vector.broadcast %306 : vector<1x16xf32> to vector<16x16xf32>
    %308 = arith.addf %304, %307 : vector<16x16xf32>
    %309 = arith.truncf %294 : vector<16x16xf32> to vector<16x16xbf16>
    %310 = arith.truncf %301 : vector<16x16xf32> to vector<16x16xbf16>
    "tpu.trace_start"() <{level = 10 : i32, message = "qd,kd->qk"}> : () -> ()
    %cst_228 = arith.constant dense<0.000000e+00> : vector<16x16xf32>
    %311 = tpu.matmul %309, %310, %cst_228 {dimension_numbers = #tpu.dot_dimension_numbers<[1], [1], [0], [0], [0, 0, 1, 0], [], []>} : vector<16x16xbf16>, vector<16x16xbf16>, vector<16x16xf32> -> vector<16x16xf32>
    %cst_229 = arith.constant 0xFF800000 : f32
    "tpu.trace_stop"() : () -> ()
    %312 = vector.broadcast %cst_229 : f32 to vector<16x16xf32>
    %313 = arith.select %4, %311, %312 : vector<16x16xi1>, vector<16x16xf32>
    %cst_230 = arith.constant dense<0xFF800000> : vector<16xf32>
    %314 = vector.multi_reduction <maximumf>, %313, %cst_230 [1] : vector<16x16xf32> to vector<16xf32>
    %cst_231 = arith.constant 0xFF800000 : f32
    %315 = vector.broadcast %cst_231 : f32 to vector<16xf32>
    %316 = arith.maximumf %315, %314 : vector<16xf32>
    %317 = vector.shape_cast %316 : vector<16xf32> to vector<16x1xf32>
    %318 = vector.broadcast %317 : vector<16x1xf32> to vector<16x16xf32>
    %319 = arith.subf %313, %318 : vector<16x16xf32>
    %320 = math.exp %319 : vector<16x16xf32>
    %cst_232 = arith.constant dense<0.000000e+00> : vector<16xf32>
    %321 = vector.multi_reduction <add>, %320, %cst_232 [1] : vector<16x16xf32> to vector<16xf32>
    %322 = vector.shape_cast %321 : vector<16xf32> to vector<16x1xf32>
    %323 = vector.broadcast %322 : vector<16x1xf32> to vector<16x16xf32>
    %324 = arith.divf %320, %323 : vector<16x16xf32>
    %325 = arith.truncf %324 : vector<16x16xf32> to vector<16x16xbf16>
    %326 = arith.truncf %308 : vector<16x16xf32> to vector<16x16xbf16>
    %cst_233 = arith.constant dense<0.000000e+00> : vector<16x16xf32>
    %327 = tpu.matmul %325, %326, %cst_233 {dimension_numbers = #tpu.dot_dimension_numbers<[1], [0], [0], [1], [0, 0, 1, 1], [], []>} : vector<16x16xbf16>, vector<16x16xbf16>, vector<16x16xf32> -> vector<16x16xf32>
    %328 = arith.truncf %327 : vector<16x16xf32> to vector<16x16xbf16>
    %c1_234 = arith.constant 1 : index
    %c0_235 = arith.constant 0 : index
    %c0_236 = arith.constant 0 : index
    %c0_237 = arith.constant 0 : index
    %329 = vector.load %arg10[%c1_234, %c0_235, %c0_236, %c0_237] : memref<2x4x16x64xbf16, #tpu.memory_space<vmem>>, vector<1x1x16x64xbf16>
    %330 = vector.shape_cast %329 : vector<1x1x16x64xbf16> to vector<16x64xbf16>
    %cst_238 = arith.constant dense<0.000000e+00> : vector<16x64xf32>
    %331 = tpu.matmul %328, %330, %cst_238 {dimension_numbers = #tpu.dot_dimension_numbers<[1], [0], [0], [1], [0, 0, 1, 1], [], []>} : vector<16x16xbf16>, vector<16x64xbf16>, vector<16x64xf32> -> vector<16x64xf32>
    %c1_239 = arith.constant 1 : index
    %c1_240 = arith.constant 1 : index
    %c0_241 = arith.constant 0 : index
    %c0_242 = arith.constant 0 : index
    %332 = vector.load %arg4[%c1_239, %c1_240, %c0_241, %c0_242] : memref<2x4x64x16xbf16, #tpu.memory_space<vmem>>, vector<1x1x64x16xbf16>
    %333 = vector.shape_cast %332 : vector<1x1x64x16xbf16> to vector<64x16xbf16>
    %cst_243 = arith.constant dense<0.000000e+00> : vector<16x16xf32>
    %334 = tpu.matmul %287, %333, %cst_243 {dimension_numbers = #tpu.dot_dimension_numbers<[1], [0], [0], [1], [0, 0, 1, 1], [], []>} : vector<16x64xbf16>, vector<64x16xbf16>, vector<16x16xf32> -> vector<16x16xf32>
    %c1_244 = arith.constant 1 : index
    %c1_245 = arith.constant 1 : index
    %c0_246 = arith.constant 0 : index
    %c0_247 = arith.constant 0 : index
    %335 = vector.load %arg5[%c1_244, %c1_245, %c0_246, %c0_247] : memref<2x4x1x16xf32, #tpu.memory_space<vmem>>, vector<1x1x1x16xf32>
    %336 = vector.shape_cast %335 : vector<1x1x1x16xf32> to vector<1x16xf32>
    %337 = vector.broadcast %336 : vector<1x16xf32> to vector<16x16xf32>
    %338 = arith.addf %334, %337 : vector<16x16xf32>
    %c1_248 = arith.constant 1 : index
    %c1_249 = arith.constant 1 : index
    %c0_250 = arith.constant 0 : index
    %c0_251 = arith.constant 0 : index
    %339 = vector.load %arg6[%c1_248, %c1_249, %c0_250, %c0_251] : memref<2x4x64x16xbf16, #tpu.memory_space<vmem>>, vector<1x1x64x16xbf16>
    %340 = vector.shape_cast %339 : vector<1x1x64x16xbf16> to vector<64x16xbf16>
    %cst_252 = arith.constant dense<0.000000e+00> : vector<16x16xf32>
    %341 = tpu.matmul %287, %340, %cst_252 {dimension_numbers = #tpu.dot_dimension_numbers<[1], [0], [0], [1], [0, 0, 1, 1], [], []>} : vector<16x64xbf16>, vector<64x16xbf16>, vector<16x16xf32> -> vector<16x16xf32>
    %c1_253 = arith.constant 1 : index
    %c1_254 = arith.constant 1 : index
    %c0_255 = arith.constant 0 : index
    %c0_256 = arith.constant 0 : index
    %342 = vector.load %arg7[%c1_253, %c1_254, %c0_255, %c0_256] : memref<2x4x1x16xf32, #tpu.memory_space<vmem>>, vector<1x1x1x16xf32>
    %343 = vector.shape_cast %342 : vector<1x1x1x16xf32> to vector<1x16xf32>
    %344 = vector.broadcast %343 : vector<1x16xf32> to vector<16x16xf32>
    %345 = arith.addf %341, %344 : vector<16x16xf32>
    %c1_257 = arith.constant 1 : index
    %c1_258 = arith.constant 1 : index
    %c0_259 = arith.constant 0 : index
    %c0_260 = arith.constant 0 : index
    %346 = vector.load %arg8[%c1_257, %c1_258, %c0_259, %c0_260] : memref<2x4x64x16xbf16, #tpu.memory_space<vmem>>, vector<1x1x64x16xbf16>
    %347 = vector.shape_cast %346 : vector<1x1x64x16xbf16> to vector<64x16xbf16>
    %cst_261 = arith.constant dense<0.000000e+00> : vector<16x16xf32>
    %348 = tpu.matmul %287, %347, %cst_261 {dimension_numbers = #tpu.dot_dimension_numbers<[1], [0], [0], [1], [0, 0, 1, 1], [], []>} : vector<16x64xbf16>, vector<64x16xbf16>, vector<16x16xf32> -> vector<16x16xf32>
    %c1_262 = arith.constant 1 : index
    %c1_263 = arith.constant 1 : index
    %c0_264 = arith.constant 0 : index
    %c0_265 = arith.constant 0 : index
    %349 = vector.load %arg9[%c1_262, %c1_263, %c0_264, %c0_265] : memref<2x4x1x16xf32, #tpu.memory_space<vmem>>, vector<1x1x1x16xf32>
    %350 = vector.shape_cast %349 : vector<1x1x1x16xf32> to vector<1x16xf32>
    %351 = vector.broadcast %350 : vector<1x16xf32> to vector<16x16xf32>
    %352 = arith.addf %348, %351 : vector<16x16xf32>
    %353 = arith.truncf %338 : vector<16x16xf32> to vector<16x16xbf16>
    %354 = arith.truncf %345 : vector<16x16xf32> to vector<16x16xbf16>
    "tpu.trace_start"() <{level = 10 : i32, message = "qd,kd->qk"}> : () -> ()
    %cst_266 = arith.constant dense<0.000000e+00> : vector<16x16xf32>
    %355 = tpu.matmul %353, %354, %cst_266 {dimension_numbers = #tpu.dot_dimension_numbers<[1], [1], [0], [0], [0, 0, 1, 0], [], []>} : vector<16x16xbf16>, vector<16x16xbf16>, vector<16x16xf32> -> vector<16x16xf32>
    %cst_267 = arith.constant 0xFF800000 : f32
    "tpu.trace_stop"() : () -> ()
    %356 = vector.broadcast %cst_267 : f32 to vector<16x16xf32>
    %357 = arith.select %4, %355, %356 : vector<16x16xi1>, vector<16x16xf32>
    %cst_268 = arith.constant dense<0xFF800000> : vector<16xf32>
    %358 = vector.multi_reduction <maximumf>, %357, %cst_268 [1] : vector<16x16xf32> to vector<16xf32>
    %cst_269 = arith.constant 0xFF800000 : f32
    %359 = vector.broadcast %cst_269 : f32 to vector<16xf32>
    %360 = arith.maximumf %359, %358 : vector<16xf32>
    %361 = vector.shape_cast %360 : vector<16xf32> to vector<16x1xf32>
    %362 = vector.broadcast %361 : vector<16x1xf32> to vector<16x16xf32>
    %363 = arith.subf %357, %362 : vector<16x16xf32>
    %364 = math.exp %363 : vector<16x16xf32>
    %cst_270 = arith.constant dense<0.000000e+00> : vector<16xf32>
    %365 = vector.multi_reduction <add>, %364, %cst_270 [1] : vector<16x16xf32> to vector<16xf32>
    %366 = vector.shape_cast %365 : vector<16xf32> to vector<16x1xf32>
    %367 = vector.broadcast %366 : vector<16x1xf32> to vector<16x16xf32>
    %368 = arith.divf %364, %367 : vector<16x16xf32>
    %369 = arith.truncf %368 : vector<16x16xf32> to vector<16x16xbf16>
    %370 = arith.truncf %352 : vector<16x16xf32> to vector<16x16xbf16>
    %cst_271 = arith.constant dense<0.000000e+00> : vector<16x16xf32>
    %371 = tpu.matmul %369, %370, %cst_271 {dimension_numbers = #tpu.dot_dimension_numbers<[1], [0], [0], [1], [0, 0, 1, 1], [], []>} : vector<16x16xbf16>, vector<16x16xbf16>, vector<16x16xf32> -> vector<16x16xf32>
    %372 = arith.truncf %371 : vector<16x16xf32> to vector<16x16xbf16>
    %c1_272 = arith.constant 1 : index
    %c1_273 = arith.constant 1 : index
    %c0_274 = arith.constant 0 : index
    %c0_275 = arith.constant 0 : index
    %373 = vector.load %arg10[%c1_272, %c1_273, %c0_274, %c0_275] : memref<2x4x16x64xbf16, #tpu.memory_space<vmem>>, vector<1x1x16x64xbf16>
    %374 = vector.shape_cast %373 : vector<1x1x16x64xbf16> to vector<16x64xbf16>
    %cst_276 = arith.constant dense<0.000000e+00> : vector<16x64xf32>
    %375 = tpu.matmul %372, %374, %cst_276 {dimension_numbers = #tpu.dot_dimension_numbers<[1], [0], [0], [1], [0, 0, 1, 1], [], []>} : vector<16x16xbf16>, vector<16x64xbf16>, vector<16x64xf32> -> vector<16x64xf32>
    %376 = arith.addf %331, %375 : vector<16x64xf32>
    %c1_277 = arith.constant 1 : index
    %c2_278 = arith.constant 2 : index
    %c0_279 = arith.constant 0 : index
    %c0_280 = arith.constant 0 : index
    %377 = vector.load %arg4[%c1_277, %c2_278, %c0_279, %c0_280] : memref<2x4x64x16xbf16, #tpu.memory_space<vmem>>, vector<1x1x64x16xbf16>
    %378 = vector.shape_cast %377 : vector<1x1x64x16xbf16> to vector<64x16xbf16>
    %cst_281 = arith.constant dense<0.000000e+00> : vector<16x16xf32>
    %379 = tpu.matmul %287, %378, %cst_281 {dimension_numbers = #tpu.dot_dimension_numbers<[1], [0], [0], [1], [0, 0, 1, 1], [], []>} : vector<16x64xbf16>, vector<64x16xbf16>, vector<16x16xf32> -> vector<16x16xf32>
    %c1_282 = arith.constant 1 : index
    %c2_283 = arith.constant 2 : index
    %c0_284 = arith.constant 0 : index
    %c0_285 = arith.constant 0 : index
    %380 = vector.load %arg5[%c1_282, %c2_283, %c0_284, %c0_285] : memref<2x4x1x16xf32, #tpu.memory_space<vmem>>, vector<1x1x1x16xf32>
    %381 = vector.shape_cast %380 : vector<1x1x1x16xf32> to vector<1x16xf32>
    %382 = vector.broadcast %381 : vector<1x16xf32> to vector<16x16xf32>
    %383 = arith.addf %379, %382 : vector<16x16xf32>
    %c1_286 = arith.constant 1 : index
    %c2_287 = arith.constant 2 : index
    %c0_288 = arith.constant 0 : index
    %c0_289 = arith.constant 0 : index
    %384 = vector.load %arg6[%c1_286, %c2_287, %c0_288, %c0_289] : memref<2x4x64x16xbf16, #tpu.memory_space<vmem>>, vector<1x1x64x16xbf16>
    %385 = vector.shape_cast %384 : vector<1x1x64x16xbf16> to vector<64x16xbf16>
    %cst_290 = arith.constant dense<0.000000e+00> : vector<16x16xf32>
    %386 = tpu.matmul %287, %385, %cst_290 {dimension_numbers = #tpu.dot_dimension_numbers<[1], [0], [0], [1], [0, 0, 1, 1], [], []>} : vector<16x64xbf16>, vector<64x16xbf16>, vector<16x16xf32> -> vector<16x16xf32>
    %c1_291 = arith.constant 1 : index
    %c2_292 = arith.constant 2 : index
    %c0_293 = arith.constant 0 : index
    %c0_294 = arith.constant 0 : index
    %387 = vector.load %arg7[%c1_291, %c2_292, %c0_293, %c0_294] : memref<2x4x1x16xf32, #tpu.memory_space<vmem>>, vector<1x1x1x16xf32>
    %388 = vector.shape_cast %387 : vector<1x1x1x16xf32> to vector<1x16xf32>
    %389 = vector.broadcast %388 : vector<1x16xf32> to vector<16x16xf32>
    %390 = arith.addf %386, %389 : vector<16x16xf32>
    %c1_295 = arith.constant 1 : index
    %c2_296 = arith.constant 2 : index
    %c0_297 = arith.constant 0 : index
    %c0_298 = arith.constant 0 : index
    %391 = vector.load %arg8[%c1_295, %c2_296, %c0_297, %c0_298] : memref<2x4x64x16xbf16, #tpu.memory_space<vmem>>, vector<1x1x64x16xbf16>
    %392 = vector.shape_cast %391 : vector<1x1x64x16xbf16> to vector<64x16xbf16>
    %cst_299 = arith.constant dense<0.000000e+00> : vector<16x16xf32>
    %393 = tpu.matmul %287, %392, %cst_299 {dimension_numbers = #tpu.dot_dimension_numbers<[1], [0], [0], [1], [0, 0, 1, 1], [], []>} : vector<16x64xbf16>, vector<64x16xbf16>, vector<16x16xf32> -> vector<16x16xf32>
    %c1_300 = arith.constant 1 : index
    %c2_301 = arith.constant 2 : index
    %c0_302 = arith.constant 0 : index
    %c0_303 = arith.constant 0 : index
    %394 = vector.load %arg9[%c1_300, %c2_301, %c0_302, %c0_303] : memref<2x4x1x16xf32, #tpu.memory_space<vmem>>, vector<1x1x1x16xf32>
    %395 = vector.shape_cast %394 : vector<1x1x1x16xf32> to vector<1x16xf32>
    %396 = vector.broadcast %395 : vector<1x16xf32> to vector<16x16xf32>
    %397 = arith.addf %393, %396 : vector<16x16xf32>
    %398 = arith.truncf %383 : vector<16x16xf32> to vector<16x16xbf16>
    %399 = arith.truncf %390 : vector<16x16xf32> to vector<16x16xbf16>
    "tpu.trace_start"() <{level = 10 : i32, message = "qd,kd->qk"}> : () -> ()
    %cst_304 = arith.constant dense<0.000000e+00> : vector<16x16xf32>
    %400 = tpu.matmul %398, %399, %cst_304 {dimension_numbers = #tpu.dot_dimension_numbers<[1], [1], [0], [0], [0, 0, 1, 0], [], []>} : vector<16x16xbf16>, vector<16x16xbf16>, vector<16x16xf32> -> vector<16x16xf32>
    %cst_305 = arith.constant 0xFF800000 : f32
    "tpu.trace_stop"() : () -> ()
    %401 = vector.broadcast %cst_305 : f32 to vector<16x16xf32>
    %402 = arith.select %4, %400, %401 : vector<16x16xi1>, vector<16x16xf32>
    %cst_306 = arith.constant dense<0xFF800000> : vector<16xf32>
    %403 = vector.multi_reduction <maximumf>, %402, %cst_306 [1] : vector<16x16xf32> to vector<16xf32>
    %cst_307 = arith.constant 0xFF800000 : f32
    %404 = vector.broadcast %cst_307 : f32 to vector<16xf32>
    %405 = arith.maximumf %404, %403 : vector<16xf32>
    %406 = vector.shape_cast %405 : vector<16xf32> to vector<16x1xf32>
    %407 = vector.broadcast %406 : vector<16x1xf32> to vector<16x16xf32>
    %408 = arith.subf %402, %407 : vector<16x16xf32>
    %409 = math.exp %408 : vector<16x16xf32>
    %cst_308 = arith.constant dense<0.000000e+00> : vector<16xf32>
    %410 = vector.multi_reduction <add>, %409, %cst_308 [1] : vector<16x16xf32> to vector<16xf32>
    %411 = vector.shape_cast %410 : vector<16xf32> to vector<16x1xf32>
    %412 = vector.broadcast %411 : vector<16x1xf32> to vector<16x16xf32>
    %413 = arith.divf %409, %412 : vector<16x16xf32>
    %414 = arith.truncf %413 : vector<16x16xf32> to vector<16x16xbf16>
    %415 = arith.truncf %397 : vector<16x16xf32> to vector<16x16xbf16>
    %cst_309 = arith.constant dense<0.000000e+00> : vector<16x16xf32>
    %416 = tpu.matmul %414, %415, %cst_309 {dimension_numbers = #tpu.dot_dimension_numbers<[1], [0], [0], [1], [0, 0, 1, 1], [], []>} : vector<16x16xbf16>, vector<16x16xbf16>, vector<16x16xf32> -> vector<16x16xf32>
    %417 = arith.truncf %416 : vector<16x16xf32> to vector<16x16xbf16>
    %c1_310 = arith.constant 1 : index
    %c2_311 = arith.constant 2 : index
    %c0_312 = arith.constant 0 : index
    %c0_313 = arith.constant 0 : index
    %418 = vector.load %arg10[%c1_310, %c2_311, %c0_312, %c0_313] : memref<2x4x16x64xbf16, #tpu.memory_space<vmem>>, vector<1x1x16x64xbf16>
    %419 = vector.shape_cast %418 : vector<1x1x16x64xbf16> to vector<16x64xbf16>
    %cst_314 = arith.constant dense<0.000000e+00> : vector<16x64xf32>
    %420 = tpu.matmul %417, %419, %cst_314 {dimension_numbers = #tpu.dot_dimension_numbers<[1], [0], [0], [1], [0, 0, 1, 1], [], []>} : vector<16x16xbf16>, vector<16x64xbf16>, vector<16x64xf32> -> vector<16x64xf32>
    %421 = arith.addf %376, %420 : vector<16x64xf32>
    %c1_315 = arith.constant 1 : index
    %c3_316 = arith.constant 3 : index
    %c0_317 = arith.constant 0 : index
    %c0_318 = arith.constant 0 : index
    %422 = vector.load %arg4[%c1_315, %c3_316, %c0_317, %c0_318] : memref<2x4x64x16xbf16, #tpu.memory_space<vmem>>, vector<1x1x64x16xbf16>
    %423 = vector.shape_cast %422 : vector<1x1x64x16xbf16> to vector<64x16xbf16>
    %cst_319 = arith.constant dense<0.000000e+00> : vector<16x16xf32>
    %424 = tpu.matmul %287, %423, %cst_319 {dimension_numbers = #tpu.dot_dimension_numbers<[1], [0], [0], [1], [0, 0, 1, 1], [], []>} : vector<16x64xbf16>, vector<64x16xbf16>, vector<16x16xf32> -> vector<16x16xf32>
    %c1_320 = arith.constant 1 : index
    %c3_321 = arith.constant 3 : index
    %c0_322 = arith.constant 0 : index
    %c0_323 = arith.constant 0 : index
    %425 = vector.load %arg5[%c1_320, %c3_321, %c0_322, %c0_323] : memref<2x4x1x16xf32, #tpu.memory_space<vmem>>, vector<1x1x1x16xf32>
    %426 = vector.shape_cast %425 : vector<1x1x1x16xf32> to vector<1x16xf32>
    %427 = vector.broadcast %426 : vector<1x16xf32> to vector<16x16xf32>
    %428 = arith.addf %424, %427 : vector<16x16xf32>
    %c1_324 = arith.constant 1 : index
    %c3_325 = arith.constant 3 : index
    %c0_326 = arith.constant 0 : index
    %c0_327 = arith.constant 0 : index
    %429 = vector.load %arg6[%c1_324, %c3_325, %c0_326, %c0_327] : memref<2x4x64x16xbf16, #tpu.memory_space<vmem>>, vector<1x1x64x16xbf16>
    %430 = vector.shape_cast %429 : vector<1x1x64x16xbf16> to vector<64x16xbf16>
    %cst_328 = arith.constant dense<0.000000e+00> : vector<16x16xf32>
    %431 = tpu.matmul %287, %430, %cst_328 {dimension_numbers = #tpu.dot_dimension_numbers<[1], [0], [0], [1], [0, 0, 1, 1], [], []>} : vector<16x64xbf16>, vector<64x16xbf16>, vector<16x16xf32> -> vector<16x16xf32>
    %c1_329 = arith.constant 1 : index
    %c3_330 = arith.constant 3 : index
    %c0_331 = arith.constant 0 : index
    %c0_332 = arith.constant 0 : index
    %432 = vector.load %arg7[%c1_329, %c3_330, %c0_331, %c0_332] : memref<2x4x1x16xf32, #tpu.memory_space<vmem>>, vector<1x1x1x16xf32>
    %433 = vector.shape_cast %432 : vector<1x1x1x16xf32> to vector<1x16xf32>
    %434 = vector.broadcast %433 : vector<1x16xf32> to vector<16x16xf32>
    %435 = arith.addf %431, %434 : vector<16x16xf32>
    %c1_333 = arith.constant 1 : index
    %c3_334 = arith.constant 3 : index
    %c0_335 = arith.constant 0 : index
    %c0_336 = arith.constant 0 : index
    %436 = vector.load %arg8[%c1_333, %c3_334, %c0_335, %c0_336] : memref<2x4x64x16xbf16, #tpu.memory_space<vmem>>, vector<1x1x64x16xbf16>
    %437 = vector.shape_cast %436 : vector<1x1x64x16xbf16> to vector<64x16xbf16>
    %cst_337 = arith.constant dense<0.000000e+00> : vector<16x16xf32>
    %438 = tpu.matmul %287, %437, %cst_337 {dimension_numbers = #tpu.dot_dimension_numbers<[1], [0], [0], [1], [0, 0, 1, 1], [], []>} : vector<16x64xbf16>, vector<64x16xbf16>, vector<16x16xf32> -> vector<16x16xf32>
    %c1_338 = arith.constant 1 : index
    %c3_339 = arith.constant 3 : index
    %c0_340 = arith.constant 0 : index
    %c0_341 = arith.constant 0 : index
    %439 = vector.load %arg9[%c1_338, %c3_339, %c0_340, %c0_341] : memref<2x4x1x16xf32, #tpu.memory_space<vmem>>, vector<1x1x1x16xf32>
    %440 = vector.shape_cast %439 : vector<1x1x1x16xf32> to vector<1x16xf32>
    %441 = vector.broadcast %440 : vector<1x16xf32> to vector<16x16xf32>
    %442 = arith.addf %438, %441 : vector<16x16xf32>
    %443 = arith.truncf %428 : vector<16x16xf32> to vector<16x16xbf16>
    %444 = arith.truncf %435 : vector<16x16xf32> to vector<16x16xbf16>
    "tpu.trace_start"() <{level = 10 : i32, message = "qd,kd->qk"}> : () -> ()
    %cst_342 = arith.constant dense<0.000000e+00> : vector<16x16xf32>
    %445 = tpu.matmul %443, %444, %cst_342 {dimension_numbers = #tpu.dot_dimension_numbers<[1], [1], [0], [0], [0, 0, 1, 0], [], []>} : vector<16x16xbf16>, vector<16x16xbf16>, vector<16x16xf32> -> vector<16x16xf32>
    %cst_343 = arith.constant 0xFF800000 : f32
    "tpu.trace_stop"() : () -> ()
    %446 = vector.broadcast %cst_343 : f32 to vector<16x16xf32>
    %447 = arith.select %4, %445, %446 : vector<16x16xi1>, vector<16x16xf32>
    %cst_344 = arith.constant dense<0xFF800000> : vector<16xf32>
    %448 = vector.multi_reduction <maximumf>, %447, %cst_344 [1] : vector<16x16xf32> to vector<16xf32>
    %cst_345 = arith.constant 0xFF800000 : f32
    %449 = vector.broadcast %cst_345 : f32 to vector<16xf32>
    %450 = arith.maximumf %449, %448 : vector<16xf32>
    %451 = vector.shape_cast %450 : vector<16xf32> to vector<16x1xf32>
    %452 = vector.broadcast %451 : vector<16x1xf32> to vector<16x16xf32>
    %453 = arith.subf %447, %452 : vector<16x16xf32>
    %454 = math.exp %453 : vector<16x16xf32>
    %cst_346 = arith.constant dense<0.000000e+00> : vector<16xf32>
    %455 = vector.multi_reduction <add>, %454, %cst_346 [1] : vector<16x16xf32> to vector<16xf32>
    %456 = vector.shape_cast %455 : vector<16xf32> to vector<16x1xf32>
    %457 = vector.broadcast %456 : vector<16x1xf32> to vector<16x16xf32>
    %458 = arith.divf %454, %457 : vector<16x16xf32>
    %459 = arith.truncf %458 : vector<16x16xf32> to vector<16x16xbf16>
    %460 = arith.truncf %442 : vector<16x16xf32> to vector<16x16xbf16>
    %cst_347 = arith.constant dense<0.000000e+00> : vector<16x16xf32>
    %461 = tpu.matmul %459, %460, %cst_347 {dimension_numbers = #tpu.dot_dimension_numbers<[1], [0], [0], [1], [0, 0, 1, 1], [], []>} : vector<16x16xbf16>, vector<16x16xbf16>, vector<16x16xf32> -> vector<16x16xf32>
    %462 = arith.truncf %461 : vector<16x16xf32> to vector<16x16xbf16>
    %c1_348 = arith.constant 1 : index
    %c3_349 = arith.constant 3 : index
    %c0_350 = arith.constant 0 : index
    %c0_351 = arith.constant 0 : index
    %463 = vector.load %arg10[%c1_348, %c3_349, %c0_350, %c0_351] : memref<2x4x16x64xbf16, #tpu.memory_space<vmem>>, vector<1x1x16x64xbf16>
    %464 = vector.shape_cast %463 : vector<1x1x16x64xbf16> to vector<16x64xbf16>
    %cst_352 = arith.constant dense<0.000000e+00> : vector<16x64xf32>
    %465 = tpu.matmul %462, %464, %cst_352 {dimension_numbers = #tpu.dot_dimension_numbers<[1], [0], [0], [1], [0, 0, 1, 1], [], []>} : vector<16x16xbf16>, vector<16x64xbf16>, vector<16x64xf32> -> vector<16x64xf32>
    %466 = arith.addf %421, %465 : vector<16x64xf32>
    %467 = arith.addf %260, %466 : vector<16x64xf32>
    %c1_353 = arith.constant 1 : index
    %c0_354 = arith.constant 0 : index
    %c0_355 = arith.constant 0 : index
    %468 = vector.load %arg11[%c1_353, %c0_354, %c0_355] : memref<2x1x64xf32, #tpu.memory_space<vmem>>, vector<1x1x64xf32>
    %469 = vector.shape_cast %468 : vector<1x1x64xf32> to vector<1x64xf32>
    %470 = vector.broadcast %469 : vector<1x64xf32> to vector<16x64xf32>
    %471 = arith.addf %467, %470 : vector<16x64xf32>
    %c1_356 = arith.constant 1 : index
    %c0_357 = arith.constant 0 : index
    %c0_358 = arith.constant 0 : index
    %472 = vector.load %arg12[%c1_356, %c0_357, %c0_358] : memref<2x1x64xf32, #tpu.memory_space<vmem>>, vector<1x1x64xf32>
    %473 = vector.shape_cast %472 : vector<1x1x64xf32> to vector<1x64xf32>
    %c1_359 = arith.constant 1 : index
    %c0_360 = arith.constant 0 : index
    %c0_361 = arith.constant 0 : index
    %474 = vector.load %arg13[%c1_359, %c0_360, %c0_361] : memref<2x1x64xf32, #tpu.memory_space<vmem>>, vector<1x1x64xf32>
    %475 = vector.shape_cast %474 : vector<1x1x64xf32> to vector<1x64xf32>
    %cst_362 = arith.constant dense<0.000000e+00> : vector<16xf32>
    %476 = vector.multi_reduction <add>, %471, %cst_362 [1] : vector<16x64xf32> to vector<16xf32>
    %477 = vector.shape_cast %476 : vector<16xf32> to vector<16x1xf32>
    %cst_363 = arith.constant 6.400000e+01 : f32
    %478 = vector.broadcast %cst_363 : f32 to vector<16x1xf32>
    %479 = arith.divf %477, %478 : vector<16x1xf32>
    %480 = vector.broadcast %479 : vector<16x1xf32> to vector<16x64xf32>
    %481 = arith.subf %471, %480 : vector<16x64xf32>
    %482 = arith.mulf %481, %481 : vector<16x64xf32>
    %cst_364 = arith.constant dense<0.000000e+00> : vector<16xf32>
    %483 = vector.multi_reduction <add>, %482, %cst_364 [1] : vector<16x64xf32> to vector<16xf32>
    %484 = vector.shape_cast %483 : vector<16xf32> to vector<16x1xf32>
    %cst_365 = arith.constant 6.400000e+01 : f32
    %485 = vector.broadcast %cst_365 : f32 to vector<16x1xf32>
    %486 = arith.divf %484, %485 : vector<16x1xf32>
    %487 = vector.broadcast %479 : vector<16x1xf32> to vector<16x64xf32>
    %488 = arith.subf %471, %487 : vector<16x64xf32>
    %cst_366 = arith.constant 9.99999974E-6 : f32
    %489 = vector.broadcast %cst_366 : f32 to vector<16x1xf32>
    %490 = arith.addf %486, %489 : vector<16x1xf32>
    %491 = math.rsqrt %490 : vector<16x1xf32>
    %492 = vector.broadcast %491 : vector<16x1xf32> to vector<16x64xf32>
    %493 = arith.mulf %488, %492 : vector<16x64xf32>
    %494 = vector.broadcast %473 : vector<1x64xf32> to vector<16x64xf32>
    %495 = arith.mulf %493, %494 : vector<16x64xf32>
    %496 = vector.broadcast %475 : vector<1x64xf32> to vector<16x64xf32>
    %497 = arith.addf %495, %496 : vector<16x64xf32>
    %498 = arith.truncf %497 : vector<16x64xf32> to vector<16x64xbf16>
    %c1_367 = arith.constant 1 : index
    %c0_368 = arith.constant 0 : index
    %c0_369 = arith.constant 0 : index
    %499 = vector.load %arg14[%c1_367, %c0_368, %c0_369] : memref<2x64x256xbf16, #tpu.memory_space<vmem>>, vector<1x64x256xbf16>
    %500 = vector.shape_cast %499 : vector<1x64x256xbf16> to vector<64x256xbf16>
    %cst_370 = arith.constant dense<0.000000e+00> : vector<16x256xf32>
    %501 = tpu.matmul %498, %500, %cst_370 {dimension_numbers = #tpu.dot_dimension_numbers<[1], [0], [0], [1], [0, 0, 1, 1], [], []>} : vector<16x64xbf16>, vector<64x256xbf16>, vector<16x256xf32> -> vector<16x256xf32>
    %c1_371 = arith.constant 1 : index
    %c0_372 = arith.constant 0 : index
    %c0_373 = arith.constant 0 : index
    %502 = vector.load %arg15[%c1_371, %c0_372, %c0_373] : memref<2x1x256xf32, #tpu.memory_space<vmem>>, vector<1x1x256xf32>
    %503 = vector.shape_cast %502 : vector<1x1x256xf32> to vector<1x256xf32>
    %504 = vector.broadcast %503 : vector<1x256xf32> to vector<16x256xf32>
    %505 = arith.addf %501, %504 : vector<16x256xf32>
    %cst_374 = arith.constant 0.000000e+00 : f32
    %506 = vector.broadcast %cst_374 : f32 to vector<16x256xf32>
    %507 = arith.maximumf %505, %506 : vector<16x256xf32>
    %508 = arith.truncf %507 : vector<16x256xf32> to vector<16x256xbf16>
    %c1_375 = arith.constant 1 : index
    %c0_376 = arith.constant 0 : index
    %c0_377 = arith.constant 0 : index
    %509 = vector.load %arg16[%c1_375, %c0_376, %c0_377] : memref<2x256x64xbf16, #tpu.memory_space<vmem>>, vector<1x256x64xbf16>
    %510 = vector.shape_cast %509 : vector<1x256x64xbf16> to vector<256x64xbf16>
    %cst_378 = arith.constant dense<0.000000e+00> : vector<16x64xf32>
    %511 = tpu.matmul %508, %510, %cst_378 {dimension_numbers = #tpu.dot_dimension_numbers<[1], [0], [0], [1], [0, 0, 1, 1], [], []>} : vector<16x256xbf16>, vector<256x64xbf16>, vector<16x64xf32> -> vector<16x64xf32>
    %c1_379 = arith.constant 1 : index
    %c0_380 = arith.constant 0 : index
    %c0_381 = arith.constant 0 : index
    %512 = vector.load %arg17[%c1_379, %c0_380, %c0_381] : memref<2x1x64xf32, #tpu.memory_space<vmem>>, vector<1x1x64xf32>
    %513 = vector.shape_cast %512 : vector<1x1x64xf32> to vector<1x64xf32>
    %514 = vector.broadcast %513 : vector<1x64xf32> to vector<16x64xf32>
    %515 = arith.addf %511, %514 : vector<16x64xf32>
    %516 = arith.addf %471, %515 : vector<16x64xf32>
    %c0_382 = arith.constant 0 : index
    %c0_383 = arith.constant 0 : index
    %517 = vector.load %arg18[%c0_382, %c0_383] : memref<1x64xf32, #tpu.memory_space<vmem>>, vector<1x64xf32>
    %c0_384 = arith.constant 0 : index
    %c0_385 = arith.constant 0 : index
    %518 = vector.load %arg19[%c0_384, %c0_385] : memref<1x64xf32, #tpu.memory_space<vmem>>, vector<1x64xf32>
    %cst_386 = arith.constant dense<0.000000e+00> : vector<16xf32>
    %519 = vector.multi_reduction <add>, %516, %cst_386 [1] : vector<16x64xf32> to vector<16xf32>
    %520 = vector.shape_cast %519 : vector<16xf32> to vector<16x1xf32>
    %cst_387 = arith.constant 6.400000e+01 : f32
    %521 = vector.broadcast %cst_387 : f32 to vector<16x1xf32>
    %522 = arith.divf %520, %521 : vector<16x1xf32>
    %523 = vector.broadcast %522 : vector<16x1xf32> to vector<16x64xf32>
    %524 = arith.subf %516, %523 : vector<16x64xf32>
    %525 = arith.mulf %524, %524 : vector<16x64xf32>
    %cst_388 = arith.constant dense<0.000000e+00> : vector<16xf32>
    %526 = vector.multi_reduction <add>, %525, %cst_388 [1] : vector<16x64xf32> to vector<16xf32>
    %527 = vector.shape_cast %526 : vector<16xf32> to vector<16x1xf32>
    %cst_389 = arith.constant 6.400000e+01 : f32
    %528 = vector.broadcast %cst_389 : f32 to vector<16x1xf32>
    %529 = arith.divf %527, %528 : vector<16x1xf32>
    %530 = vector.broadcast %522 : vector<16x1xf32> to vector<16x64xf32>
    %531 = arith.subf %516, %530 : vector<16x64xf32>
    %cst_390 = arith.constant 9.99999974E-6 : f32
    %532 = vector.broadcast %cst_390 : f32 to vector<16x1xf32>
    %533 = arith.addf %529, %532 : vector<16x1xf32>
    %534 = math.rsqrt %533 : vector<16x1xf32>
    %535 = vector.broadcast %534 : vector<16x1xf32> to vector<16x64xf32>
    %536 = arith.mulf %531, %535 : vector<16x64xf32>
    %537 = vector.broadcast %517 : vector<1x64xf32> to vector<16x64xf32>
    %538 = arith.mulf %536, %537 : vector<16x64xf32>
    %539 = vector.broadcast %518 : vector<1x64xf32> to vector<16x64xf32>
    %540 = arith.addf %538, %539 : vector<16x64xf32>
    %541 = arith.truncf %540 : vector<16x64xf32> to vector<16x64xbf16>
    %c0_391 = arith.constant 0 : index
    %c0_392 = arith.constant 0 : index
    %542 = vector.load %arg20[%c0_391, %c0_392] : memref<64x128xbf16, #tpu.memory_space<vmem>>, vector<64x128xbf16>
    %cst_393 = arith.constant dense<0.000000e+00> : vector<16x128xf32>
    %543 = tpu.matmul %541, %542, %cst_393 {dimension_numbers = #tpu.dot_dimension_numbers<[1], [0], [0], [1], [0, 0, 1, 1], [], []>} : vector<16x64xbf16>, vector<64x128xbf16>, vector<16x128xf32> -> vector<16x128xf32>
    %c0_394 = arith.constant 0 : index
    %c0_395 = arith.constant 0 : index
    %544 = vector.load %arg21[%c0_394, %c0_395] : memref<1x128xf32, #tpu.memory_space<vmem>>, vector<1x128xf32>
    %545 = vector.broadcast %544 : vector<1x128xf32> to vector<16x128xf32>
    %546 = arith.addf %543, %545 : vector<16x128xf32>
    %c0_396 = arith.constant 0 : index
    %c0_397 = arith.constant 0 : index
    %c0_398 = arith.constant 0 : index
    %547 = vector.load %arg22[%c0_396, %c0_397, %c0_398] : memref<1x16x128xf32, #tpu.memory_space<vmem>>, vector<1x16x128xf32>
    %548 = vector.shape_cast %547 : vector<1x16x128xf32> to vector<16x128xf32>
    %549 = vector.shape_cast %546 : vector<16x128xf32> to vector<1x16x128xf32>
    tpu.vector_store %arg22[%c0_396, %c0_397, %c0_398], %549 {strides = array<i32>} : memref<1x16x128xf32, #tpu.memory_space<vmem>>, vector<1x16x128xf32>,
    return
  }
  func.func @transform_0(%arg0: i32) -> (i32, i32, i32) {
    %c0_i32 = arith.constant 0 : i32
    %c0_i32_0 = arith.constant 0 : i32
    %c0_i32_1 = arith.constant 0 : i32
    return %arg0, %c0_i32, %c0_i32_0 : i32, i32, i32
  }
  func.func @transform_1(%arg0: i32) -> (i32, i32, i32) {
    %c0_i32 = arith.constant 0 : i32
    %c0_i32_0 = arith.constant 0 : i32
    %c0_i32_1 = arith.constant 0 : i32
    %c0_i32_2 = arith.constant 0 : i32
    return %c0_i32, %c0_i32_0, %c0_i32_1 : i32, i32, i32
  }
  func.func @transform_2(%arg0: i32) -> (i32, i32, i32) {
    %c0_i32 = arith.constant 0 : i32
    %c0_i32_0 = arith.constant 0 : i32
    %c0_i32_1 = arith.constant 0 : i32
    %c0_i32_2 = arith.constant 0 : i32
    return %c0_i32, %c0_i32_0, %c0_i32_1 : i32, i32, i32
  }
  func.func @transform_3(%arg0: i32) -> (i32, i32, i32, i32) {
    %c0_i32 = arith.constant 0 : i32
    %c0_i32_0 = arith.constant 0 : i32
    %c0_i32_1 = arith.constant 0 : i32
    %c0_i32_2 = arith.constant 0 : i32
    %c0_i32_3 = arith.constant 0 : i32
    return %c0_i32, %c0_i32_0, %c0_i32_1, %c0_i32_2 : i32, i32, i32, i32
  }
  func.func @transform_4(%arg0: i32) -> (i32, i32, i32, i32) {
    %c0_i32 = arith.constant 0 : i32
    %c0_i32_0 = arith.constant 0 : i32
    %c0_i32_1 = arith.constant 0 : i32
    %c0_i32_2 = arith.constant 0 : i32
    %c0_i32_3 = arith.constant 0 : i32
    return %c0_i32, %c0_i32_0, %c0_i32_1, %c0_i32_2 : i32, i32, i32, i32
  }
  func.func @transform_5(%arg0: i32) -> (i32, i32, i32, i32) {
    %c0_i32 = arith.constant 0 : i32
    %c0_i32_0 = arith.constant 0 : i32
    %c0_i32_1 = arith.constant 0 : i32
    %c0_i32_2 = arith.constant 0 : i32
    %c0_i32_3 = arith.constant 0 : i32
    return %c0_i32, %c0_i32_0, %c0_i32_1, %c0_i32_2 : i32, i32, i32, i32
  }
  func.func @transform_6(%arg0: i32) -> (i32, i32, i32, i32) {
    %c0_i32 = arith.constant 0 : i32
    %c0_i32_0 = arith.constant 0 : i32
    %c0_i32_1 = arith.constant 0 : i32
    %c0_i32_2 = arith.constant 0 : i32
    %c0_i32_3 = arith.constant 0 : i32
    return %c0_i32, %c0_i32_0, %c0_i32_1, %c0_i32_2 : i32, i32, i32, i32
  }
  func.func @transform_7(%arg0: i32) -> (i32, i32, i32, i32) {
    %c0_i32 = arith.constant 0 : i32
    %c0_i32_0 = arith.constant 0 : i32
    %c0_i32_1 = arith.constant 0 : i32
    %c0_i32_2 = arith.constant 0 : i32
    %c0_i32_3 = arith.constant 0 : i32
    return %c0_i32, %c0_i32_0, %c0_i32_1, %c0_i32_2 : i32, i32, i32, i32
  }
  func.func @transform_8(%arg0: i32) -> (i32, i32, i32, i32) {
    %c0_i32 = arith.constant 0 : i32
    %c0_i32_0 = arith.constant 0 : i32
    %c0_i32_1 = arith.constant 0 : i32
    %c0_i32_2 = arith.constant 0 : i32
    %c0_i32_3 = arith.constant 0 : i32
    return %c0_i32, %c0_i32_0, %c0_i32_1, %c0_i32_2 : i32, i32, i32, i32
  }
  func.func @transform_9(%arg0: i32) -> (i32, i32, i32, i32) {
    %c0_i32 = arith.constant 0 : i32
    %c0_i32_0 = arith.constant 0 : i32
    %c0_i32_1 = arith.constant 0 : i32
    %c0_i32_2 = arith.constant 0 : i32
    %c0_i32_3 = arith.constant 0 : i32
    return %c0_i32, %c0_i32_0, %c0_i32_1, %c0_i32_2 : i32, i32, i32, i32
  }
  func.func @transform_10(%arg0: i32) -> (i32, i32, i32) {
    %c0_i32 = arith.constant 0 : i32
    %c0_i32_0 = arith.constant 0 : i32
    %c0_i32_1 = arith.constant 0 : i32
    %c0_i32_2 = arith.constant 0 : i32
    return %c0_i32, %c0_i32_0, %c0_i32_1 : i32, i32, i32
  }
  func.func @transform_11(%arg0: i32) -> (i32, i32, i32) {
    %c0_i32 = arith.constant 0 : i32
    %c0_i32_0 = arith.constant 0 : i32
    %c0_i32_1 = arith.constant 0 : i32
    %c0_i32_2 = arith.constant 0 : i32
    return %c0_i32, %c0_i32_0, %c0_i32_1 : i32, i32, i32
  }
  func.func @transform_12(%arg0: i32) -> (i32, i32, i32) {
    %c0_i32 = arith.constant 0 : i32
    %c0_i32_0 = arith.constant 0 : i32
    %c0_i32_1 = arith.constant 0 : i32
    %c0_i32_2 = arith.constant 0 : i32
    return %c0_i32, %c0_i32_0, %c0_i32_1 : i32, i32, i32
  }
  func.func @transform_13(%arg0: i32) -> (i32, i32, i32) {
    %c0_i32 = arith.constant 0 : i32
    %c0_i32_0 = arith.constant 0 : i32
    %c0_i32_1 = arith.constant 0 : i32
    %c0_i32_2 = arith.constant 0 : i32
    return %c0_i32, %c0_i32_0, %c0_i32_1 : i32, i32, i32
  }
  func.func @transform_14(%arg0: i32) -> (i32, i32, i32) {
    %c0_i32 = arith.constant 0 : i32
    %c0_i32_0 = arith.constant 0 : i32
    %c0_i32_1 = arith.constant 0 : i32
    %c0_i32_2 = arith.constant 0 : i32
    return %c0_i32, %c0_i32_0, %c0_i32_1 : i32, i32, i32
  }
  func.func @transform_15(%arg0: i32) -> (i32, i32, i32) {
    %c0_i32 = arith.constant 0 : i32
    %c0_i32_0 = arith.constant 0 : i32
    %c0_i32_1 = arith.constant 0 : i32
    %c0_i32_2 = arith.constant 0 : i32
    return %c0_i32, %c0_i32_0, %c0_i32_1 : i32, i32, i32
  }
  func.func @transform_16(%arg0: i32) -> (i32, i32, i32) {
    %c0_i32 = arith.constant 0 : i32
    %c0_i32_0 = arith.constant 0 : i32
    %c0_i32_1 = arith.constant 0 : i32
    %c0_i32_2 = arith.constant 0 : i32
    return %c0_i32, %c0_i32_0, %c0_i32_1 : i32, i32, i32
  }
  func.func @transform_17(%arg0: i32) -> (i32, i32) {
    %c0_i32 = arith.constant 0 : i32
    %c0_i32_0 = arith.constant 0 : i32
    %c0_i32_1 = arith.constant 0 : i32
    return %c0_i32, %c0_i32_0 : i32, i32
  }
  func.func @transform_18(%arg0: i32) -> (i32, i32) {
    %c0_i32 = arith.constant 0 : i32
    %c0_i32_0 = arith.constant 0 : i32
    %c0_i32_1 = arith.constant 0 : i32
    return %c0_i32, %c0_i32_0 : i32, i32
  }
  func.func @transform_19(%arg0: i32) -> (i32, i32) {
    %c0_i32 = arith.constant 0 : i32
    %c0_i32_0 = arith.constant 0 : i32
    %c0_i32_1 = arith.constant 0 : i32
    return %c0_i32, %c0_i32_0 : i32, i32
  }
  func.func @transform_20(%arg0: i32) -> (i32, i32) {
    %c0_i32 = arith.constant 0 : i32
    %c0_i32_0 = arith.constant 0 : i32
    %c0_i32_1 = arith.constant 0 : i32
    return %c0_i32, %c0_i32_0 : i32, i32
  }
  func.func @transform_21(%arg0: i32) -> (i32, i32, i32) {
    %c0_i32 = arith.constant 0 : i32
    %c0_i32_0 = arith.constant 0 : i32
    %c0_i32_1 = arith.constant 0 : i32
    return %arg0, %c0_i32, %c0_i32_0 : i32, i32, i32
  }
}

</mosaic_0001>

<bundles_post_ra>
// kernel: transformer_decoder_forward.1
= control target key start
LH: loop header
LB: loop body
LE: loop exit
PB: predicated region body
PF: predicated region fallthrough
CT: control target
= control target key end

     0   :  { %s7870_s0 = inlined_call_operand.vmem [shape: f32[2,16,64], index: 0, kind: input, shape index: {}]   ;;  %s7871_s1 = inlined_call_operand.vmem [shape: f32[2,1,64], index: 1, kind: input, shape index: {}]   ;;  %s7872_s2 = inlined_call_operand.vmem [shape: f32[2,1,64], index: 2, kind: input, shape index: {}]   ;;  %s7873_s3 = inlined_call_operand.vmem [shape: bf16[2,4,64,16], index: 3, kind: input, shape index: {}]   ;;  %s7874_s4 = inlined_call_operand.vmem [shape: f32[2,4,1,16], index: 4, kind: input, shape index: {}]   ;;  %s7875_s5 = inlined_call_operand.vmem [shape: bf16[2,4,64,16], index: 5, kind: input, shape index: {}]   ;;  %s7876_s6 = inlined_call_operand.vmem [shape: f32[2,4,1,16], index: 6, kind: input, shape index: {}]   ;;  %s7877_s7 = inlined_call_operand.vmem [shape: bf16[2,4,64,16], index: 7, kind: input, shape index: {}]   ;;  %s7878_s8 = inlined_call_operand.vmem [shape: f32[2,4,1,16], index: 8, kind: input, shape index: {}]   ;;  %s7879_s9 = inlined_call_operand.vmem [shape: bf16[2,4,16,64], index: 9, kind: input, shape index: {}]   ;;  %s7880_s10 = inlined_call_operand.vmem [shape: f32[2,1,64], index: 10, kind: input, shape index: {}]   ;;  %s7881_s11 = inlined_call_operand.vmem [shape: f32[2,1,64], index: 11, kind: input, shape index: {}]   ;;  %s7882_s12 = inlined_call_operand.vmem [shape: f32[2,1,64], index: 12, kind: input, shape index: {}]   ;;  %s7883_s13 = inlined_call_operand.vmem [shape: bf16[2,64,256], index: 13, kind: input, shape index: {}]   ;;  %s7884_s14 = inlined_call_operand.vmem [shape: f32[2,1,256], index: 14, kind: input, shape index: {}]   ;;  %s7885_s15 = inlined_call_operand.vmem [shape: bf16[2,256,64], index: 15, kind: input, shape index: {}]   ;;  %s7886_s16 = inlined_call_operand.vmem [shape: f32[2,1,64], index: 16, kind: input, shape index: {}]   ;;  %s7887_s17 = inlined_call_operand.vmem [shape: f32[1,64], index: 17, kind: input, shape index: {}]   ;;  %s7888_s18 = inlined_call_operand.vmem [shape: f32[1,64], index: 18, kind: input, shape index: {}]   ;;  %s7889_s19 = inlined_call_operand.vmem [shape: bf16[64,128], index: 19, kind: input, shape index: {}]   ;;  %s7890_s20 = inlined_call_operand.vmem [shape: f32[1,128], index: 20, kind: input, shape index: {}]   ;;  %s7891_s21 = inlined_call_operand.hbm [shape: f32[2,16,128], index: 21, kind: output, shape index: {}]  }
   0x1   :  { %7906 = sst [smem:[#allocation12_spill]] %s7870_s0 }
   0x2   :  { %7907 = sst [smem:[#allocation13_spill]] %s7871_s1 }
   0x3   :  { %7908 = sst [smem:[#allocation14_spill]] %s7872_s2 }
   0x4   :  { %7909 = sst [smem:[#allocation15_spill]] %s7873_s3 }
   0x5   :  { %7910 = sst [smem:[#allocation16_spill]] %s7874_s4 }
   0x6   :  { %7911 = sst [smem:[#allocation17_spill]] %s7875_s5 }
   0x7   :  { %7912 = sst [smem:[#allocation18_spill]] %s7876_s6 }
   0x8   :  { %7913 = sst [smem:[#allocation19_spill]] %s7877_s7 }
   0x9   :  { %7914 = sst [smem:[#allocation20_spill]] %s7878_s8 }
   0xa   :  { %7915 = sst [smem:[#allocation21_spill]] %s7890_s20 }
   0xb   :  { %7916 = sst [smem:[#allocation22_spill]] %s7891_s21 }
   0xc   :  { %26 = vsyncpa [#allocation3], 0 }
   0xd   :  { %28 = vsyncpa [#allocation3 + $0x1], 0  ;;  %s6669_s2 = smov 0   ;;  %s6671_s25 = smov 0  }
   0xe   :  { %s6673_s26 = smov 0   ;;  %s6675_s27 = smov 0  }
   0xf LB: > { %7917 = sst [smem:[#allocation5_spill]] %s6539_s2  ;;  %s6690_s3 = sadd.s32 4294967295, %s6551_s27   ;;  %s6551_s27 = sphi %s6675_s27, %s7946_s27   ;;  %s6547_s26 = sphi %s6673_s26, %s7948_s26   ;;  %s6543_s25 = sphi %s6671_s25, %s7950_s25   ;;  %s6539_s2 = sphi %s6669_s2, %s7949_s2  }
  0x10   : > { %7918 = sst [smem:[#allocation6_spill]] %s6547_s26  ;;  %s5024_s28 = sadd.s32 4294967294, %s6551_s27  }
  0x11   : > { %7919 = sst [smem:[#allocation7_spill]] %s6551_s27  ;;  %s6694_s29 = sadd.s32 1, %s6551_s27  }
  0x12   : > { %7920 = sst [smem:[#allocation8_spill]] %s6694_s29  ;;  %s487_s0 = sadd.s32 1, %s6547_s26 }
  0x13   : > { %s484_s4 = ssub.s32 %s6551_s27, %s6694_s29  ;;  %p497_p0 = scmp.ne.s32.totalorder %s6547_s26, %s6543_s25 }
  0x14   : > { %p485_p1 = scmp.eq.s32.totalorder %s484_s4, 0  ;;  %p498_p2 = scmp.eq.s32.totalorder %s6690_s3, 1 }
  0x15   : > { %p503_p3 = scmp.ne.s32.totalorder %s6543_s25, %s6539_s2  ;;  %p504_p4 = scmp.eq.s32.totalorder %s5024_s28, 1 }
  0x16   : > { %s6705_s30 = scalar_select %p485_p1, %s6547_s26, %s487_s0  }
  0x17   : > { %p6707_p5 = por %p498_p2, %p497_p0  ;;  %p6711_p6 = por %p504_p4, %p503_p3 }
  0x18   : > { %7921 = sst [smem:[#allocation9_spill]] %s6705_s30  ;;  %p5027_p7 = scmp.ge.s32.totalorder %s6551_s27, 1 }
  0x19   : > { %s7922_s5 = scalar_select %p6707_p5, 1, 0 }
  0x1a   : > { %s7924_s22 = scalar_select %p6711_p6, 1, 0 }
  0x1b   : > { %7923 = sst [smem:[#allocation10_spill]] %s7922_s5  ;;  %p590_p8 = scmp.lt.s32.totalorder %s6551_s27, 3 }
  0x1c   : > { %7925 = sst [smem:[#allocation11_spill]] %s7924_s22 }
  0x1d   : > { %p591_p9 = pnand %p5027_p7, %p590_p8 }
  0x1e   : > { %p650_p10 = scmp.lt.s32.totalorder (!%p591_p9), %s6690_s3, 1  ;;  %vm667_vm0 = vcmask (!%p591_p9), 523264   ;;  %s7926_s0 = sld [smem:[#allocation12_spill]] (!%p591_p9)  ;;  %v6553_v15 = vmov (!%p591_p9), 0.0   ;;  %vm6554_vm1 = vmmov (!%p591_p9), 0   ;;  %vm957_vm2 = vcmask (!%p591_p9), 130048  }
  0x1f   : > { %594 = sbr.rel (%p591_p9) target bundleno = 10627 (0x2983), region = 104  ;;  %s7927_s24 = sld [smem:[#allocation15_spill]] (!%p591_p9)  ;;  %5751 = vmatprep.subr.bf16.mxu0 (!%p591_p9), %v6553_v15  ;;  %5763 = vmatprep.subr.bf16.mxu1 (!%p591_p9), %v6553_v15 }
  0x20   : > { %s7928_s30 = sld [smem:[#allocation17_spill]] (!%p591_p9)  ;;  %5759 = vmatprep.mubr.msk.bf16.mxu0 (!%p591_p9), %vm6554_vm1, %v6553_v15  ;;  %5771 = vmatprep.mubr.msk.bf16.mxu1 (!%p591_p9), %vm6554_vm1, %v6553_v15  ;;  %s7929_s28 = sld [smem:[#allocation13_spill]] (!%p591_p9) }
  0x21   : > { %s7930_s29 = sld [smem:[#allocation14_spill]] (!%p591_p9)  ;;  %s7931_s7 = sld [smem:[#allocation19_spill]] (!%p591_p9) }
  0x22   : > { %s7932_s2 = sld [smem:[#allocation16_spill]] (!%p591_p9)  ;;  %s7934_s6 = sld [smem:[#allocation18_spill]] (!%p591_p9) }
  0x23   : > { %s7935_s8 = sld [smem:[#allocation20_spill]] (!%p591_p9)  ;;  %s647_s21 = sand.u32 (!%p591_p9), 1, %s6543_s25  }
  0x24   : > { %s5028_s27 = sshll.u32 (!%p591_p9), %s647_s21, 4  ;;  %s7940_s26 = sld [smem:[#allocation21_spill]] (!%p591_p9) }
  0x25   : > { %v6239_v14 = vld [vmem:[%s7927_s24] sm:$0xff] (!%p591_p9)   ;;  %v6241_v17 = vld [vmem:[%s7927_s24 + $0x8] sm:$0xff] (!%p591_p9)   ;;  %v6243_v19 = vld [vmem:[%s7927_s24 + $0x10] sm:$0xff] (!%p591_p9)  }
  0x26   : > { %s651_s23 = scalar_select %p650_p10, %s6690_s3, 1  ;;  %v6240_v16 = vld [vmem:[%s7928_s30] sm:$0xff]   ;;  %5752 = vmatpush3.bf16.msra.mxu0 %v6239_v14  ;;  %v6242_v18 = vld [vmem:[%s7928_s30 + $0x8] sm:$0xff]   ;;  %v6244_v20 = vld [vmem:[%s7928_s30 + $0x10] sm:$0xff]  }
  0x27   : > { %5764 = vmatpush3.bf16.msra.mxu1 %v6240_v16  ;;  %5753 = vmatprep.subr.bf16.mxu0 %v6553_v15  ;;  %v6245_v21 = vld [vmem:[%s7927_s24 + $0x18] sm:$0xff]   ;;  %v5031_v31 = vld [vmem:[%s7929_s28] ss:$0 sm:$0xff]  ;;  %v6248_v41 = vld [vmem:[%s7931_s7 + $0x8] sm:$0xff]  }
  0x28   : > { %s5532_s1 = sshll.u32 %s651_s23, 4  ;;  %5765 = vmatprep.subr.bf16.mxu1 %v6553_v15  ;;  %v6246_v22 = vld [vmem:[%s7928_s30 + $0x18] sm:$0xff]   ;;  %v5032_v35 = vld [vmem:[%s7930_s29] ss:$0 sm:$0xff]  ;;  %v6249_v42 = vld [vmem:[%s7931_s7 + $0x10] sm:$0xff]   ;;  %s7933_s22 = smov %s7932_s2 }
  0x29   : > { %s6722_s4 = scalar_lea.vmem %s7926_s0, %s5532_s1  ;;  %v6247_v39 = vld [vmem:[%s7931_s7] sm:$0xff]   ;;  %v6250_v43 = vld [vmem:[%s7931_s7 + $0x18] sm:$0xff]   ;;  %v6252_v45 = vld [vmem:[%s7927_s24 + $0x28] sm:$0xff]   ;;  %s649_s23 = scalar_lea.vmem [#allocation2], %s5028_s27 }
  0x2a   : > { %v656_v0 = vld [vmem:[%s6722_s4] sm:$0xff]  ;;  %v657_v1 = vld [vmem:[%s6722_s4 + $0x8] sm:$0xff]  ;;  %5754 = vmatpush3.bf16.msra.mxu0 %v6241_v17  ;;  %v6253_v46 = vld [vmem:[%s7927_s24 + $0x30] sm:$0xff]   ;;  %s7829_s27 = scalar_lea.sflag [#allocation3], %s647_s21 }
  0x2b   : > { %v668_v2 = vsel %vm667_vm0, %v656_v0, 0.0  ;;  %v671_v3 = vsel %vm667_vm0, %v657_v1, 0.0  ;;  %5766 = vmatpush3.bf16.msra.mxu1 %v6242_v18  ;;  %5755 = vmatprep.subr.bf16.mxu0 %v6553_v15  ;;  %v6251_v44 = vld [vmem:[%s7927_s24 + $0x20] sm:$0xff]   ;;  %v6254_v47 = vld [vmem:[%s7927_s24 + $0x38] sm:$0xff]   ;;  %v6256_v49 = vld [vmem:[%s7931_s7 + $0x28] sm:$0xff]  }
  0x2c   : > { %669 = vadd.xlane.f32.xlu0 %v668_v2  ;;  %5767 = vmatprep.subr.bf16.mxu1 %v6553_v15  ;;  %v6255_v48 = vld [vmem:[%s7931_s7 + $0x20] sm:$0xff]   ;;  %v6257_v50 = vld [vmem:[%s7931_s7 + $0x30] sm:$0xff]   ;;  %v6258_v51 = vld [vmem:[%s7931_s7 + $0x38] sm:$0xff]  }
  0x2d   : > { %v5033_v52 = vld [vmem:[%s7932_s2] ss:$0 sm:$0xff]  ;;  %s4962_s2 = sshll.u32 %s649_s23, 4  ;;  %s7822_s2 = int_to_ptr.vmem [resolvable:$true] %s4962_s2 }
  0x2e   : > { %5756 = vmatpush3.bf16.msra.mxu0 %v6243_v19  ;;  %v5039_v54 = vld [vmem:[%s7934_s6] ss:$0 sm:$0xff] }
  0x2f   : > { %5768 = vmatpush3.bf16.msra.mxu1 %v6244_v20  ;;  %5757 = vmatprep.subr.bf16.mxu0 %v6553_v15 }
  0x30   : > { %672 = vadd.xlane.f32.xlu0 %v671_v3  ;;  %5769 = vmatprep.subr.bf16.mxu1 %v6553_v15 }
  0x32   : > { %5758 = vmatpush3.bf16.msra.mxu0 %v6245_v21 }
  0x33   : > { %5770 = vmatpush3.bf16.msra.mxu1 %v6246_v22  ;;  %5775 = vmatprep.subr.bf16.mxu0 %v6553_v15  ;;  %v5092_v22 = vld [vmem:[%s7935_s8 + $0x1] ss:$0 sm:$0xff] }
  0x34   : > { %5787 = vmatprep.subr.bf16.mxu1 %v6553_v15 }
  0xb9   : > { %v670_v4 = vpop.xlane.xlu0 %669 }
  0xba   : > { %v675_v5 = vmul.f32 0.015625, %v670_v4 }
  0xbc   : > { %v677_v6 = vsub.f32 %v656_v0, %v675_v5  ;;  %v5045_v5 = vld [vmem:[%s7935_s8] ss:$0 sm:$0xff] }
  0xbd   : > { %v673_v7 = vpop.xlane.xlu0 %672 }
  0xbe   : > { %v676_v8 = vmul.f32 0.015625, %v673_v7  ;;  %v679_v9 = vmul.f32 %v677_v6, %v677_v6 }
  0xc0   : > { %v678_v10 = vsub.f32 %v657_v1, %v676_v8  ;;  %v681_v11 = vsel %vm667_vm0, %v679_v9, 0.0 }
  0xc1   : > { %682 = vadd.xlane.f32.xlu1 %v681_v11 }
  0xc2   : > { %v680_v12 = vmul.f32 %v678_v10, %v678_v10 }
  0xc4   : > { %v684_v13 = vsel %vm667_vm0, %v680_v12, 0.0 }
  0xc5   : > { %685 = vadd.xlane.f32.xlu1 %v684_v13  ;;  %v5062_v13 = vld [vmem:[%s7933_s22 + $0x1] ss:$0 sm:$0xff] }
 0x14e   : > { %v683_v23 = vpop.xlane.xlu1 %682 }
 0x14f   : > { %v687_v24 = vmul.f32 0.015625, %v683_v23 }
 0x151   : > { %v689_v25 = vadd.f32 1e-05, %v687_v24 }
 0x152   : > { %v686_v26 = vpop.xlane.xlu1 %685 }
 0x153   : > { %6403 = vrsqrt.f32 %v689_v25  ;;  %v688_v27 = vmul.f32 0.015625, %v686_v26 }
 0x155   : > { %v690_v28 = vadd.f32 1e-05, %v688_v27 }
 0x157   : > { %6405 = vrsqrt.f32 %v690_v28 }
 0x15d   : > { %v6404_v29 = vpop.eup %6403 }
 0x15e   : > { %v693_v30 = vmul.f32 %v6404_v29, %v677_v6 }
 0x160   : > { %v701_v33 = vmul.f32 %v5031_v31, %v693_v30  ;;  %v658_v30 = vlaneseq }
 0x161   : > { %v6406_v32 = vpop.eup %6405 }
 0x162   : > { %v694_v34 = vmul.f32 %v6406_v32, %v678_v10  ;;  %v709_v37 = vadd.f32 %v5032_v35, %v701_v33  ;;  %v662_v32 = vand.u32 127, %v658_v30 }
 0x164   : > { %v702_v36 = vmul.f32 %v5031_v31, %v694_v34  ;;  %v6877_v31 = vshrl.u32 %v658_v30, 7 }
 0x166   : > { %v710_v38 = vadd.f32 %v5032_v35, %v702_v36  ;;  %v660_v33 = vadd.s32 8, %v6877_v31  ;;  %vm6881_vm3 = vcmp.ge.s32.totalorder %v6877_v31, %v662_v32 }
 0x168   : > { %v6777_v40 = vpack.c.bf16 %v710_v38, %v709_v37  ;;  %vm6885_vm4 = vcmp.ge.s32.totalorder %v660_v33, %v662_v32 }
 0x16a   : > { %5760 = vmatmul.mubr.msk.bf16.vlgmr.msra.gmra.mrb[0].mxu0 %vm667_vm0, %v6777_v40  ;;  %5772 = vmatmul.mubr.msk.bf16.vlgmr.msra.gmra.mrb[0].mxu1 %vm667_vm0, %v6777_v40 }
 0x16b   : > { %5776 = vmatpush3.bf16.msra.mxu0 %v6247_v39  ;;  %5783 = vmatprep.mubr.msk.bf16.mxu0 %vm6554_vm1, %v6553_v15 }
 0x16c   : > { %5777 = vmatprep.subr.bf16.mxu0 %v6553_v15  ;;  %5789 = vmatprep.mubr.msk.bf16.mxu1 %vm6554_vm1, %v6553_v15 }
 0x16f   : > { %5778 = vmatpush3.bf16.msra.mxu0 %v6248_v41 }
 0x170   : > { %5779 = vmatprep.subr.bf16.mxu0 %v6553_v15 }
 0x173   : > { %5780 = vmatpush3.bf16.msra.mxu0 %v6249_v42 }
 0x174   : > { %5781 = vmatprep.subr.bf16.mxu0 %v6553_v15 }
 0x177   : > { %5782 = vmatpush3.bf16.msra.mxu0 %v6250_v43 }
 0x178   : > { %5799 = vmatprep.subr.bf16.mxu0 %v6553_v15 }
 0x17a   : > { %5784 = vmatmul.mubr.msk.bf16.vlgmr.msra.gmra.mrb[4].mxu0 %vm667_vm0, %v6777_v40 }
 0x17b   : > { %5800 = vmatpush3.bf16.msra.mxu0 %v6251_v44  ;;  %5807 = vmatprep.mubr.msk.bf16.mxu0 %vm6554_vm1, %v6553_v15 }
 0x17c   : > { %5801 = vmatprep.subr.bf16.mxu0 %v6553_v15 }
 0x17f   : > { %5802 = vmatpush3.bf16.msra.mxu0 %v6252_v45 }
 0x180   : > { %5803 = vmatprep.subr.bf16.mxu0 %v6553_v15 }
 0x183   : > { %5804 = vmatpush3.bf16.msra.mxu0 %v6253_v46 }
 0x184   : > { %5805 = vmatprep.subr.bf16.mxu0 %v6553_v15 }
 0x187   : > { %5806 = vmatpush3.bf16.msra.mxu0 %v6254_v47 }
 0x188   : > { %5823 = vmatprep.subr.bf16.mxu0 %v6553_v15 }
 0x18a   : > { %5808 = vmatmul.mubr.msk.bf16.vlgmr.msra.gmra.mrb[8].mxu0 %vm667_vm0, %v6777_v40 }
 0x18b   : > { %5824 = vmatpush3.bf16.msra.mxu0 %v6255_v48  ;;  %5831 = vmatprep.mubr.msk.bf16.mxu0 %vm6554_vm1, %v6553_v15 }
 0x18c   : > { %5825 = vmatprep.subr.bf16.mxu0 %v6553_v15 }
 0x18f   : > { %5826 = vmatpush3.bf16.msra.mxu0 %v6256_v49 }
 0x190   : > { %5827 = vmatprep.subr.bf16.mxu0 %v6553_v15 }
 0x193   : > { %5828 = vmatpush3.bf16.msra.mxu0 %v6257_v50 }
 0x194   : > { %5829 = vmatprep.subr.bf16.mxu0 %v6553_v15 }
 0x197   : > { %5830 = vmatpush3.bf16.msra.mxu0 %v6258_v51 }
 0x198   : > { %5847 = vmatprep.subr.bf16.mxu0 %v6553_v15 }
 0x19a   : > { %5832 = vmatmul.mubr.msk.bf16.vlgmr.msra.gmra.mrb[12].mxu0 %vm667_vm0, %v6777_v40 }
 0x19b   : > { %5849 = vmatprep.mubr.msk.bf16.mxu0 %vm6554_vm1, %v6553_v15 }
 0x23d   : > { %v788_v53 = vpop.f32.mrb[0].mxu0  ;;  %v868_v55 = vpop.f32.mrb[0].mxu1 }
 0x23e   : > { %v5761_v56 = vpop.f32.mrb[1].mxu0  ;;  %v5773_v57 = vpop.f32.mrb[1].mxu1  ;;  %v789_v60 = vadd.f32 %v5033_v52, %v788_v53  ;;  %v869_v61 = vadd.f32 %v5039_v54, %v868_v55 }
 0x23f   : > { %v791_v58 = vpop.f32.mrb[2].mxu0  ;;  %v871_v59 = vpop.f32.mrb[2].mxu1 }
 0x240   : > { %v792_v62 = vadd.f32 %v5033_v52, %v791_v58  ;;  %v872_v63 = vadd.f32 %v5039_v54, %v871_v59  ;;  %v5762_v0 = vpop.f32.mrb[3].mxu0  ;;  %v5774_v1 = vpop.f32.mrb[3].mxu1 }
 0x241   : > { %v6261_v0 = vld [vmem:[%s7928_s30 + $0x30] sm:$0xff]   ;;  %v6262_v1 = vld [vmem:[%s7928_s30 + $0x38] sm:$0xff]  }
 0x242   : > { %v955_v2 = vpack.c.bf16 %v792_v62, %v789_v60  ;;  %v956_v3 = vpack.c.bf16 %v872_v63, %v869_v61  ;;  %v6259_v61 = vld [vmem:[%s7928_s30 + $0x20] sm:$0xff]   ;;  %v6260_v63 = vld [vmem:[%s7928_s30 + $0x28] sm:$0xff]  }
 0x244   : > { %v962_v4 = vsel %vm957_vm2, %v956_v3, 0 }
 0x245   : > { %5788 = vmatpush3.bf16.xpose.msra.mxu1 %v962_v4 }
 0x246   : > { %5793 = vmatprep.subr.bf16.mxu1 %v6553_v15 }
 0x24c   : > { %5790 = vmatmul.mubr.msk.bf16.vlgmr.msra.gmra.mrb[4].mxu1 %vm957_vm2, %v955_v2 }
 0x24d   : > { %v948_v6 = vpop.f32.mrb[4].mxu0  ;;  %5795 = vmatprep.mubr.msk.bf16.mxu1 %vm6554_vm1, %v6553_v15 }
 0x24e   : > { %v5785_v7 = vpop.f32.mrb[5].mxu0  ;;  %v949_v9 = vadd.f32 %v5045_v5, %v948_v6 }
 0x24f   : > { %v951_v8 = vpop.f32.mrb[6].mxu0  ;;  %v5077_v7 = vld [vmem:[%s7934_s6 + $0x1] ss:$0 sm:$0xff] }
 0x250   : > { %v952_v10 = vadd.f32 %v5045_v5, %v951_v8  ;;  %v5786_v11 = vpop.f32.mrb[7].mxu0 }
 0x252   : > { %v1030_v12 = vpack.c.bf16 %v952_v10, %v949_v9 }
 0x254   : > { %5794 = vmatpush3.bf16.msra.mxu1 %v1030_v12 }
 0x255   : > { %5811 = vmatprep.subr.bf16.mxu1 %v6553_v15 }
 0x25d   : > { %v1153_v14 = vpop.f32.mrb[8].mxu0 }
 0x25e   : > { %v5809_v16 = vpop.f32.mrb[9].mxu0  ;;  %v6862_v18 = vadd.f32 %v5062_v13, %v1153_v14 }
 0x25f   : > { %v1156_v17 = vpop.f32.mrb[10].mxu0 }
 0x260   : > { %v6864_v19 = vadd.f32 %v5062_v13, %v1156_v17  ;;  %v5810_v20 = vpop.f32.mrb[11].mxu0 }
 0x262   : > { %v1324_v21 = vpack.c.bf16 %v6864_v19, %v6862_v18 }
 0x26d   : > { %v1317_v23 = vpop.f32.mrb[12].mxu0 }
 0x26e   : > { %v5833_v24 = vpop.f32.mrb[13].mxu0  ;;  %v6871_v26 = vadd.f32 %v5092_v22, %v1317_v23 }
 0x26f   : > { %v1320_v25 = vpop.f32.mrb[14].mxu0 }
 0x270   : > { %v6873_v27 = vadd.f32 %v5092_v22, %v1320_v25  ;;  %v5834_v28 = vpop.f32.mrb[15].mxu0 }
 0x272   : > { %v1398_v29 = vpack.c.bf16 %v6873_v27, %v6871_v26 }
 0x31f   : > { %v998_v35 = vpop.f32.mrb[4].mxu1 }
 0x320   : > { %v1005_v37 = vsel %vm6881_vm3, %v998_v35, -inf  ;;  %v5791_v38 = vpop.f32.mrb[5].mxu1 }
 0x321   : > { %v1001_v39 = vpop.f32.mrb[6].mxu1  ;;  %v1007_v41 = vsel %vm957_vm2, %v1005_v37, -inf  ;;  %v6268_v38 = vld [vmem:[%s7879_s9 + $0x8] sm:$0xff]  }
 0x322   : > { %v1006_v42 = vsel %vm6885_vm4, %v1001_v39, -inf  ;;  %1008 = vmax.xlane.f32.xlu0 %v1007_v41  ;;  %v5792_v43 = vpop.f32.mrb[7].mxu1  ;;  %5848 = vmatpush3.bf16.msra.mxu0 %v6268_v38 }
 0x323   : > { %v1010_v44 = vsel %vm957_vm2, %v1006_v42, -inf  ;;  %5859 = vmatprep.subr.bf16.mxu0 %v6553_v15 }
 0x324   : > { %1011 = vmax.xlane.f32.xlu1 %v1010_v44 }
 0x3af   : > { %v1009_v45 = vpop.xlane.xlu0 %1008 }
 0x3b0   : > { %v1013_v46 = vsub.f32 %v1005_v37, %v1009_v45 }
 0x3b1   : > { %v1012_v47 = vpop.xlane.xlu1 %1011 }
 0x3b2   : > { %v1015_v48 = vmul.f32 1.442695, %v1013_v46  ;;  %v1014_v49 = vsub.f32 %v1006_v42, %v1012_v47  ;;  %v6263_v46 = vld [vmem:[%s7879_s9] sm:$0xff]  }
 0x3b4   : > { %6407 = vpow2.f32 %v1015_v48  ;;  %v1017_v50 = vmul.f32 1.442695, %v1014_v49  ;;  %v6264_v48 = vld [vmem:[%s7928_s30 + $0x40] sm:$0xff]   ;;  %v6265_v49 = vld [vmem:[%s7928_s30 + $0x48] sm:$0xff]  }
 0x3b6   : > { %6409 = vpow2.f32 %v1017_v50  ;;  %v6266_v50 = vld [vmem:[%s7928_s30 + $0x50] sm:$0xff]  }
 0x3be   : > { %v6408_v51 = vpop.eup %6407 }
 0x3bf   : > { %v1019_v52 = vsel %vm957_vm2, %v6408_v51, 0.0 }
 0x3c0   : > { %v6410_v53 = vpop.eup %6409  ;;  %1020 = vadd.xlane.f32.xlu0 %v1019_v52 }
 0x3c1   : > { %v1022_v54 = vsel %vm957_vm2, %v6410_v53, 0.0 }
 0x3c2   : > { %1023 = vadd.xlane.f32.xlu1 %v1022_v54 }
 0x44d   : > { %v1021_v55 = vpop.xlane.xlu0 %1020 }
 0x44e   : > { %6411 = vrcp.f32 %v1021_v55  ;;  %v6269_v55 = vld [vmem:[%s7927_s24 + $0x40] sm:$0xff]  }
 0x44f   : > { %v1024_v56 = vpop.xlane.xlu1 %1023 }
 0x450   : > { %6413 = vrcp.f32 %v1024_v56 }
 0x458   : > { %v6412_v57 = vpop.eup %6411 }
 0x459   : > { %v1026_v59 = vmul.f32 %v6412_v57, %v6408_v51  ;;  %v6267_v51 = vld [vmem:[%s7928_s30 + $0x58] sm:$0xff]  }
 0x45a   : > { %v6414_v58 = vpop.eup %6413 }
 0x45b   : > { %v1028_v60 = vmul.f32 %v6414_v58, %v6410_v53  ;;  %v6270_v58 = vld [vmem:[%s7927_s24 + $0x48] sm:$0xff]  }
 0x45d   : > { %v1029_v62 = vpack.c.bf16 %v1028_v60, %v1026_v59 }
 0x45f   : > { %5796 = vmatmul.mubr.msk.bf16.vlgmr.msra.gmra.mrb[8].mxu1 %vm957_vm2, %v1029_v62  ;;  %v6271_v62 = vld [vmem:[%s7927_s24 + $0x50] sm:$0xff]  }
 0x460   : > { %5812 = vmatpush3.bf16.msra.mxu1 %v6259_v61  ;;  %5819 = vmatprep.mubr.msk.bf16.mxu1 %vm6554_vm1, %v6553_v15 }
 0x461   : > { %5813 = vmatprep.subr.bf16.mxu1 %v6553_v15 }
 0x464   : > { %5814 = vmatpush3.bf16.msra.mxu1 %v6260_v63 }
 0x465   : > { %5815 = vmatprep.subr.bf16.mxu1 %v6553_v15 }
 0x468   : > { %5816 = vmatpush3.bf16.msra.mxu1 %v6261_v0  ;;  %v6272_v0 = vld [vmem:[%s7927_s24 + $0x58] sm:$0xff]  }
 0x469   : > { %5817 = vmatprep.subr.bf16.mxu1 %v6553_v15 }
 0x46c   : > { %5818 = vmatpush3.bf16.msra.mxu1 %v6262_v1  ;;  %v6273_v1 = vld [vmem:[%s7931_s7 + $0x40] sm:$0xff]  }
 0x46d   : > { %5835 = vmatprep.subr.bf16.mxu1 %v6553_v15 }
 0x46f   : > { %5820 = vmatmul.mubr.msk.bf16.vlgmr.msra.gmra.mrb[12].mxu1 %vm667_vm0, %v6777_v40 }
 0x470   : > { %5837 = vmatprep.mubr.msk.bf16.mxu1 %vm6554_vm1, %v6553_v15 }
 0x532   : > { %v6920_v2 = vpop.f32.mrb[8].mxu1 }
 0x533   : > { %v5797_v3 = vpop.f32.mrb[9].mxu1 }
 0x534   : > { %v1071_v4 = vpop.f32.mrb[10].mxu1  ;;  %v5130_v3 = vld [vmem:[%s7934_s6 + $0x2] ss:$0 sm:$0xff] }
 0x535   : > { %v1075_v5 = vpack.c.bf16 %v1071_v4, %v6920_v2  ;;  %v5798_v6 = vpop.f32.mrb[11].mxu1  ;;  %v6274_v2 = vld [vmem:[%s7931_s7 + $0x48] sm:$0xff]  }
 0x542   : > { %v1235_v8 = vpop.f32.mrb[12].mxu1 }
 0x543   : > { %v5821_v9 = vpop.f32.mrb[13].mxu1  ;;  %v1236_v11 = vadd.f32 %v5077_v7, %v1235_v8 }
 0x544   : > { %v1238_v10 = vpop.f32.mrb[14].mxu1 }
 0x545   : > { %v1239_v12 = vadd.f32 %v5077_v7, %v1238_v10  ;;  %v5822_v13 = vpop.f32.mrb[15].mxu1  ;;  %v6275_v7 = vld [vmem:[%s7931_s7 + $0x50] sm:$0xff]  }
 0x547   : > { %v1325_v14 = vpack.c.bf16 %v1239_v12, %v1236_v11  ;;  %v6276_v12 = vld [vmem:[%s7931_s7 + $0x58] sm:$0xff]  }
 0x549   : > { %v1330_v16 = vsel %vm957_vm2, %v1325_v14, 0 }
 0x54a   : > { %5836 = vmatpush3.bf16.xpose.msra.mxu1 %v1330_v16 }
 0x54b   : > { %5841 = vmatprep.subr.bf16.mxu1 %v6553_v15 }
 0x551   : > { %5838 = vmatmul.mubr.msk.bf16.vlgmr.msra.gmra.mrb[16].mxu1 %vm957_vm2, %v1324_v21 }
 0x552   : > { %5842 = vmatpush3.bf16.msra.mxu1 %v1398_v29  ;;  %5843 = vmatprep.mubr.msk.bf16.mxu1 %vm6554_vm1, %v6553_v15 }
 0x553   : > { %5853 = vmatprep.subr.bf16.mxu1 %v6553_v15 }
 0x624   : > { %v1366_v17 = vpop.f32.mrb[16].mxu1 }
 0x625   : > { %v1373_v20 = vsel %vm6881_vm3, %v1366_v17, -inf  ;;  %v5839_v22 = vpop.f32.mrb[17].mxu1 }
 0x626   : > { %v1369_v23 = vpop.f32.mrb[18].mxu1  ;;  %v1375_v24 = vsel %vm957_vm2, %v1373_v20, -inf }
 0x627   : > { %v1374_v18 = vsel %vm6885_vm4, %v1369_v23, -inf  ;;  %1376 = vmax.xlane.f32.xlu0 %v1375_v24  ;;  %v5840_v19 = vpop.f32.mrb[19].mxu1  ;;  %v5115_v24 = vld [vmem:[%s7933_s22 + $0x2] ss:$0 sm:$0xff] }
 0x628   : > { %v1378_v21 = vsel %vm957_vm2, %v1374_v18, -inf }
 0x629   : > { %1379 = vmax.xlane.f32.xlu1 %v1378_v21 }
 0x6b4   : > { %v1377_v25 = vpop.xlane.xlu0 %1376 }
 0x6b5   : > { %v1381_v26 = vsub.f32 %v1373_v20, %v1377_v25 }
 0x6b6   : > { %v1380_v27 = vpop.xlane.xlu1 %1379 }
 0x6b7   : > { %v1383_v28 = vmul.f32 1.442695, %v1381_v26  ;;  %v1382_v29 = vsub.f32 %v1374_v18, %v1380_v27 }
 0x6b9   : > { %6415 = vpow2.f32 %v1383_v28  ;;  %v1385_v30 = vmul.f32 1.442695, %v1382_v29  ;;  %v5145_v29 = vld [vmem:[%s7935_s8 + $0x2] ss:$0 sm:$0xff] }
 0x6bb   : > { %6417 = vpow2.f32 %v1385_v30 }
 0x6c3   : > { %v6416_v32 = vpop.eup %6415 }
 0x6c4   : > { %v1387_v33 = vsel %vm957_vm2, %v6416_v32, 0.0 }
 0x6c5   : > { %v6418_v35 = vpop.eup %6417  ;;  %1388 = vadd.xlane.f32.xlu0 %v1387_v33 }
 0x6c6   : > { %v1390_v37 = vsel %vm957_vm2, %v6418_v35, 0.0 }
 0x6c7   : > { %1391 = vadd.xlane.f32.xlu1 %v1390_v37 }
 0x752   : > { %v1389_v39 = vpop.xlane.xlu0 %1388 }
 0x753   : > { %6419 = vrcp.f32 %v1389_v39 }
 0x754   : > { %v1392_v41 = vpop.xlane.xlu1 %1391 }
 0x755   : > { %6421 = vrcp.f32 %v1392_v41 }
 0x75d   : > { %v6420_v42 = vpop.eup %6419 }
 0x75e   : > { %v1394_v44 = vmul.f32 %v6420_v42, %v6416_v32 }
 0x75f   : > { %v6422_v43 = vpop.eup %6421 }
 0x760   : > { %v1396_v45 = vmul.f32 %v6422_v43, %v6418_v35 }
 0x762   : > { %v1397_v47 = vpack.c.bf16 %v1396_v45, %v1394_v44 }
 0x764   : > { %5844 = vmatmul.mubr.msk.bf16.vlgmr.msra.gmra.mrb[20].mxu1 %vm957_vm2, %v1397_v47 }
 0x765   : > { %5854 = vmatpush3.bf16.msra.mxu1 %v6263_v46  ;;  %5855 = vmatprep.mubr.msk.bf16.mxu1 %vm6554_vm1, %v6553_v15 }
 0x766   : > { %5871 = vmatprep.subr.bf16.mxu1 %v6553_v15 }
 0x76c   : > { %5856 = vmatmul.mubr.msk.bf16.vlgmr.msra.gmra.mrb[24].mxu1 %vm957_vm2, %v1075_v5 }
 0x76d   : > { %5872 = vmatpush3.bf16.msra.mxu1 %v6264_v48  ;;  %5879 = vmatprep.mubr.msk.bf16.mxu1 %vm6554_vm1, %v6553_v15 }
 0x76e   : > { %5873 = vmatprep.subr.bf16.mxu1 %v6553_v15 }
 0x771   : > { %5874 = vmatpush3.bf16.msra.mxu1 %v6265_v49 }
 0x772   : > { %5875 = vmatprep.subr.bf16.mxu1 %v6553_v15 }
 0x775   : > { %5876 = vmatpush3.bf16.msra.mxu1 %v6266_v50 }
 0x776   : > { %5877 = vmatprep.subr.bf16.mxu1 %v6553_v15 }
 0x779   : > { %5878 = vmatpush3.bf16.msra.mxu1 %v6267_v51 }
 0x77a   : > { %5895 = vmatprep.subr.bf16.mxu1 %v6553_v15 }
 0x77c   : > { %5880 = vmatmul.mubr.msk.bf16.vlgmr.msra.gmra.mrb[28].mxu1 %vm667_vm0, %v6777_v40 }
 0x77d   : > { %5897 = vmatprep.mubr.msk.bf16.mxu1 %vm6554_vm1, %v6553_v15 }
 0x837   : > { %v1436_v52 = vpop.f32.mrb[20].mxu1 }
 0x838   : > { %v5845_v53 = vpop.f32.mrb[21].mxu1 }
 0x839   : > { %v1439_v54 = vpop.f32.mrb[22].mxu1 }
 0x83a   : > { %v1443_v56 = vpack.c.bf16 %v1439_v54, %v1436_v52  ;;  %v5846_v57 = vpop.f32.mrb[23].mxu1 }
 0x83c   : > { %5850 = vmatmul.mubr.msk.bf16.vlgmr.msra.gmra.mrb[16].mxu0 %vm957_vm2, %v1443_v56 }
 0x83d   : > { %5860 = vmatpush3.bf16.msra.mxu0 %v6269_v55  ;;  %5867 = vmatprep.mubr.msk.bf16.mxu0 %vm6554_vm1, %v6553_v15 }
 0x83e   : > { %5861 = vmatprep.subr.bf16.mxu0 %v6553_v15 }
 0x83f   : > { %v1540_v59 = vpop.f32.mrb[24].mxu1 }
 0x840   : > { %v5857_v60 = vpop.f32.mrb[25].mxu1 }
 0x841   : > { %5862 = vmatpush3.bf16.msra.mxu0 %v6270_v58  ;;  %v1543_v61 = vpop.f32.mrb[26].mxu1 }
 0x842   : > { %v5858_v63 = vpop.f32.mrb[27].mxu1  ;;  %5863 = vmatprep.subr.bf16.mxu0 %v6553_v15 }
 0x845   : > { %5864 = vmatpush3.bf16.msra.mxu0 %v6271_v62 }
 0x846   : > { %5865 = vmatprep.subr.bf16.mxu0 %v6553_v15 }
 0x849   : > { %5866 = vmatpush3.bf16.msra.mxu0 %v6272_v0 }
 0x84a   : > { %5883 = vmatprep.subr.bf16.mxu0 %v6553_v15 }
 0x84c   : > { %5868 = vmatmul.mubr.msk.bf16.vlgmr.msra.gmra.mrb[20].mxu0 %vm667_vm0, %v6777_v40 }
 0x84d   : > { %5884 = vmatpush3.bf16.msra.mxu0 %v6273_v1  ;;  %5891 = vmatprep.mubr.msk.bf16.mxu0 %vm6554_vm1, %v6553_v15 }
 0x84e   : > { %5885 = vmatprep.subr.bf16.mxu0 %v6553_v15 }
 0x84f   : > { %v1704_v4 = vpop.f32.mrb[28].mxu1 }
 0x850   : > { %v5881_v5 = vpop.f32.mrb[29].mxu1  ;;  %v1705_v8 = vadd.f32 %v5130_v3, %v1704_v4  ;;  %v6278_v4 = vld [vmem:[%s7927_s24 + $0x68] sm:$0xff]  }
 0x851   : > { %v1707_v6 = vpop.f32.mrb[30].mxu1  ;;  %5886 = vmatpush3.bf16.msra.mxu0 %v6274_v2  ;;  %v6277_v2 = vld [vmem:[%s7927_s24 + $0x60] sm:$0xff]   ;;  %v6279_v5 = vld [vmem:[%s7927_s24 + $0x70] sm:$0xff]  }
 0x852   : > { %v1708_v9 = vadd.f32 %v5130_v3, %v1707_v6  ;;  %v5882_v10 = vpop.f32.mrb[31].mxu1  ;;  %5887 = vmatprep.subr.bf16.mxu0 %v6553_v15  ;;  %v6280_v6 = vld [vmem:[%s7927_s24 + $0x78] sm:$0xff]  }
 0x853   : > { %v6284_v10 = vld [vmem:[%s7931_s7 + $0x78] sm:$0xff]  }
 0x854   : > { %v1794_v11 = vpack.c.bf16 %v1708_v9, %v1705_v8  ;;  %v6282_v8 = vld [vmem:[%s7931_s7 + $0x68] sm:$0xff]   ;;  %v6283_v9 = vld [vmem:[%s7931_s7 + $0x70] sm:$0xff]  }
 0x855   : > { %5888 = vmatpush3.bf16.msra.mxu0 %v6275_v7  ;;  %v6281_v7 = vld [vmem:[%s7931_s7 + $0x60] sm:$0xff]  }
 0x856   : > { %v1799_v13 = vsel %vm957_vm2, %v1794_v11, 0  ;;  %5889 = vmatprep.subr.bf16.mxu0 %v6553_v15 }
 0x857   : > { %5896 = vmatpush3.bf16.xpose.msra.mxu1 %v1799_v13 }
 0x858   : > { %5901 = vmatprep.subr.bf16.mxu1 %v6553_v15 }
 0x859   : > { %5890 = vmatpush3.bf16.msra.mxu0 %v6276_v12 }
 0x85a   : > { %5907 = vmatprep.subr.bf16.mxu0 %v6553_v15 }
 0x85c   : > { %5892 = vmatmul.mubr.msk.bf16.vlgmr.msra.gmra.mrb[24].mxu0 %vm667_vm0, %v6777_v40 }
 0x85d   : > { %5909 = vmatprep.mubr.msk.bf16.mxu0 %vm6554_vm1, %v6553_v15 }
 0x90f   : > { %v1490_v14 = vpop.f32.mrb[16].mxu0 }
 0x910   : > { %v7028_v16 = vadd.f32 %v1540_v59, %v1490_v14  ;;  %v5851_v17 = vpop.f32.mrb[17].mxu0  ;;  %v6285_v59 = vld [vmem:[%s7879_s9 + $0x10] sm:$0xff]   ;;  %v6286_v14 = vld [vmem:[%s7928_s30 + $0x60] sm:$0xff]  }
 0x911   : > { %v1493_v20 = vpop.f32.mrb[18].mxu0  ;;  %5908 = vmatpush3.bf16.msra.mxu0 %v6285_v59 }
 0x912   : > { %v7030_v22 = vadd.f32 %v1543_v61, %v1493_v20  ;;  %v5852_v23 = vpop.f32.mrb[19].mxu0  ;;  %5925 = vmatprep.subr.bf16.mxu0 %v6553_v15 }
 0x913   : > { %v6287_v23 = vld [vmem:[%s7928_s30 + $0x68] sm:$0xff]  }
 0x91f   : > { %v1622_v18 = vpop.f32.mrb[20].mxu0 }
 0x920   : > { %v5869_v19 = vpop.f32.mrb[21].mxu0  ;;  %v1623_v25 = vadd.f32 %v5115_v24, %v1622_v18  ;;  %v6289_v18 = vld [vmem:[%s7928_s30 + $0x78] sm:$0xff]  }
 0x921   : > { %v1625_v21 = vpop.f32.mrb[22].mxu0  ;;  %v5166_v19 = vld [vmem:[%s7933_s22 + $0x3] ss:$0 sm:$0xff] }
 0x922   : > { %v1626_v26 = vadd.f32 %v5115_v24, %v1625_v21  ;;  %v5870_v27 = vpop.f32.mrb[23].mxu0  ;;  %v6288_v24 = vld [vmem:[%s7928_s30 + $0x70] sm:$0xff]  }
 0x924   : > { %v1793_v28 = vpack.c.bf16 %v1626_v26, %v1623_v25 }
 0x926   : > { %5898 = vmatmul.mubr.msk.bf16.vlgmr.msra.gmra.mrb[32].mxu1 %vm957_vm2, %v1793_v28 }
 0x927   : > { %5903 = vmatprep.mubr.msk.bf16.mxu1 %vm6554_vm1, %v6553_v15 }
 0x92f   : > { %v1786_v30 = vpop.f32.mrb[24].mxu0 }
 0x930   : > { %v5893_v32 = vpop.f32.mrb[25].mxu0  ;;  %v1787_v35 = vadd.f32 %v5145_v29, %v1786_v30 }
 0x931   : > { %v1789_v33 = vpop.f32.mrb[26].mxu0  ;;  %v5196_v32 = vld [vmem:[%s7935_s8 + $0x3] ss:$0 sm:$0xff] }
 0x932   : > { %v1790_v37 = vadd.f32 %v5145_v29, %v1789_v33  ;;  %v5894_v38 = vpop.f32.mrb[27].mxu0 }
 0x934   : > { %v1867_v39 = vpack.c.bf16 %v1790_v37, %v1787_v35 }
 0x936   : > { %5902 = vmatpush3.bf16.msra.mxu1 %v1867_v39 }
 0x937   : > { %5913 = vmatprep.subr.bf16.mxu1 %v6553_v15 }
 0x9f9   : > { %v1835_v41 = vpop.f32.mrb[32].mxu1 }
 0x9fa   : > { %v1842_v42 = vsel %vm6881_vm3, %v1835_v41, -inf  ;;  %v5899_v43 = vpop.f32.mrb[33].mxu1 }
 0x9fb   : > { %v1838_v44 = vpop.f32.mrb[34].mxu1  ;;  %v1844_v45 = vsel %vm957_vm2, %v1842_v42, -inf }
 0x9fc   : > { %v1843_v46 = vsel %vm6885_vm4, %v1838_v44, -inf  ;;  %1845 = vmax.xlane.f32.xlu0 %v1844_v45  ;;  %v5900_v47 = vpop.f32.mrb[35].mxu1 }
 0x9fd   : > { %v1847_v48 = vsel %vm957_vm2, %v1843_v46, -inf }
 0x9fe   : > { %1848 = vmax.xlane.f32.xlu1 %v1847_v48  ;;  %v5181_v48 = vld [vmem:[%s7934_s6 + $0x3] ss:$0 sm:$0xff] }
 0xa89   : > { %v1846_v49 = vpop.xlane.xlu0 %1845 }
 0xa8a   : > { %v1850_v50 = vsub.f32 %v1842_v42, %v1846_v49 }
 0xa8b   : > { %v1849_v51 = vpop.xlane.xlu1 %1848 }
 0xa8c   : > { %v1852_v52 = vmul.f32 1.442695, %v1850_v50  ;;  %v1851_v53 = vsub.f32 %v1843_v46, %v1849_v51 }
 0xa8e   : > { %6423 = vpow2.f32 %v1852_v52  ;;  %v1854_v54 = vmul.f32 1.442695, %v1851_v53 }
 0xa90   : > { %6425 = vpow2.f32 %v1854_v54 }
 0xa98   : > { %v6424_v55 = vpop.eup %6423 }
 0xa99   : > { %v1856_v56 = vsel %vm957_vm2, %v6424_v55, 0.0 }
 0xa9a   : > { %v6426_v57 = vpop.eup %6425  ;;  %1857 = vadd.xlane.f32.xlu0 %v1856_v56 }
 0xa9b   : > { %v1859_v58 = vsel %vm957_vm2, %v6426_v57, 0.0 }
 0xa9c   : > { %1860 = vadd.xlane.f32.xlu1 %v1859_v58 }
 0xb27   : > { %v1858_v60 = vpop.xlane.xlu0 %1857 }
 0xb28   : > { %6427 = vrcp.f32 %v1858_v60 }
 0xb29   : > { %v1861_v61 = vpop.xlane.xlu1 %1860 }
 0xb2a   : > { %6429 = vrcp.f32 %v1861_v61 }
 0xb32   : > { %v6428_v62 = vpop.eup %6427 }
 0xb33   : > { %v1863_v0 = vmul.f32 %v6428_v62, %v6424_v55 }
 0xb34   : > { %v6430_v63 = vpop.eup %6429 }
 0xb35   : > { %v1865_v1 = vmul.f32 %v6430_v63, %v6426_v57 }
 0xb37   : > { %v1866_v3 = vpack.c.bf16 %v1865_v1, %v1863_v0 }
 0xb39   : > { %5904 = vmatmul.mubr.msk.bf16.vlgmr.msra.gmra.mrb[36].mxu1 %vm957_vm2, %v1866_v3 }
 0xb3a   : > { %5914 = vmatpush3.bf16.msra.mxu1 %v6277_v2  ;;  %5921 = vmatprep.mubr.msk.bf16.mxu1 %vm6554_vm1, %v6553_v15 }
 0xb3b   : > { %5915 = vmatprep.subr.bf16.mxu1 %v6553_v15 }
 0xb3e   : > { %5916 = vmatpush3.bf16.msra.mxu1 %v6278_v4 }
 0xb3f   : > { %5917 = vmatprep.subr.bf16.mxu1 %v6553_v15 }
 0xb42   : > { %5918 = vmatpush3.bf16.msra.mxu1 %v6279_v5 }
 0xb43   : > { %5919 = vmatprep.subr.bf16.mxu1 %v6553_v15 }
 0xb46   : > { %5920 = vmatpush3.bf16.msra.mxu1 %v6280_v6 }
 0xb47   : > { %5937 = vmatprep.subr.bf16.mxu1 %v6553_v15 }
 0xb49   : > { %5922 = vmatmul.mubr.msk.bf16.vlgmr.msra.gmra.mrb[40].mxu1 %vm667_vm0, %v6777_v40 }
 0xb4a   : > { %5938 = vmatpush3.bf16.msra.mxu1 %v6281_v7  ;;  %5945 = vmatprep.mubr.msk.bf16.mxu1 %vm6554_vm1, %v6553_v15 }
 0xb4b   : > { %5939 = vmatprep.subr.bf16.mxu1 %v6553_v15 }
 0xb4e   : > { %5940 = vmatpush3.bf16.msra.mxu1 %v6282_v8 }
 0xb4f   : > { %5941 = vmatprep.subr.bf16.mxu1 %v6553_v15 }
 0xb52   : > { %5942 = vmatpush3.bf16.msra.mxu1 %v6283_v9  ;;  %v6290_v9 = vld [vmem:[%s7879_s9 + $0x18] sm:$0xff]  }
 0xb53   : > { %5943 = vmatprep.subr.bf16.mxu1 %v6553_v15 }
 0xb56   : > { %5944 = vmatpush3.bf16.msra.mxu1 %v6284_v10 }
 0xb57   : > { %5961 = vmatprep.subr.bf16.mxu1 %v6553_v15 }
 0xb59   : > { %5946 = vmatmul.mubr.msk.bf16.vlgmr.msra.gmra.mrb[44].mxu1 %vm667_vm0, %v6777_v40 }
 0xb5a   : > { %5963 = vmatprep.mubr.msk.bf16.mxu1 %vm6554_vm1, %v6553_v15  ;;  %5962 = vmatpush3.bf16.msra.mxu1 %v6290_v9 }
 0xc0c   : > { %v1905_v11 = vpop.f32.mrb[36].mxu1 }
 0xc0d   : > { %v5905_v12 = vpop.f32.mrb[37].mxu1 }
 0xc0e   : > { %v1908_v13 = vpop.f32.mrb[38].mxu1 }
 0xc0f   : > { %v1912_v17 = vpack.c.bf16 %v1908_v13, %v1905_v11  ;;  %v5906_v20 = vpop.f32.mrb[39].mxu1 }
 0xc11   : > { %5910 = vmatmul.mubr.msk.bf16.vlgmr.msra.gmra.mrb[28].mxu0 %vm957_vm2, %v1912_v17 }
 0xc12   : > { %5926 = vmatpush3.bf16.msra.mxu0 %v6286_v14  ;;  %5933 = vmatprep.mubr.msk.bf16.mxu0 %vm6554_vm1, %v6553_v15 }
 0xc13   : > { %5927 = vmatprep.subr.bf16.mxu0 %v6553_v15 }
 0xc16   : > { %5928 = vmatpush3.bf16.msra.mxu0 %v6287_v23 }
 0xc17   : > { %5929 = vmatprep.subr.bf16.mxu0 %v6553_v15 }
 0xc1a   : > { %5930 = vmatpush3.bf16.msra.mxu0 %v6288_v24 }
 0xc1b   : > { %5931 = vmatprep.subr.bf16.mxu0 %v6553_v15 }
 0xc1c   : > { %v2043_v21 = vpop.f32.mrb[40].mxu1 }
 0xc1d   : > { %v5923_v25 = vpop.f32.mrb[41].mxu1  ;;  %v2044_v27 = vadd.f32 %v5166_v19, %v2043_v21 }
 0xc1e   : > { %v2046_v26 = vpop.f32.mrb[42].mxu1  ;;  %5932 = vmatpush3.bf16.msra.mxu0 %v6289_v18 }
 0xc1f   : > { %v2047_v28 = vadd.f32 %v5166_v19, %v2046_v26  ;;  %v5924_v29 = vpop.f32.mrb[43].mxu1  ;;  %5949 = vmatprep.subr.bf16.mxu0 %v6553_v15 }
 0xc21   : > { %v2214_v30 = vpack.c.bf16 %v2047_v28, %v2044_v27  ;;  %5934 = vmatmul.mubr.msk.bf16.vlgmr.msra.gmra.mrb[32].mxu0 %vm667_vm0, %v6777_v40  ;;  %v5208_v28 = vld [vmem:[%s7880_s10] ss:$0 sm:$0xff] }
 0xc22   : > { %5951 = vmatprep.mubr.msk.bf16.mxu0 %vm6554_vm1, %v6553_v15 }
 0xc2c   : > { %v2207_v33 = vpop.f32.mrb[44].mxu1 }
 0xc2d   : > { %v5947_v35 = vpop.f32.mrb[45].mxu1  ;;  %v2208_v38 = vadd.f32 %v5196_v32, %v2207_v33 }
 0xc2e   : > { %v2210_v37 = vpop.f32.mrb[46].mxu1 }
 0xc2f   : > { %v2211_v39 = vadd.f32 %v5196_v32, %v2210_v37  ;;  %v5948_v41 = vpop.f32.mrb[47].mxu1 }
 0xc31   : > { %v2288_v42 = vpack.c.bf16 %v2211_v39, %v2208_v38  ;;  %v6488_v38 = vld [vmem:[%s6722_s4 + $0x8] sm:$0xff] }
 0xce4   : > { %v1959_v43 = vpop.f32.mrb[28].mxu0 }
 0xce5   : > { %v1966_v44 = vadd.f32 %v1959_v43, %v7028_v16  ;;  %v5911_v45 = vpop.f32.mrb[29].mxu0 }
 0xce6   : > { %v1962_v46 = vpop.f32.mrb[30].mxu0 }
 0xce7   : > { %v7128_v40 = vadd.f32 %v1962_v46, %v7030_v22  ;;  %v5912_v47 = vpop.f32.mrb[31].mxu0 }
 0xcf4   : > { %v2125_v49 = vpop.f32.mrb[32].mxu0 }
 0xcf5   : > { %v5935_v50 = vpop.f32.mrb[33].mxu0  ;;  %v2126_v52 = vadd.f32 %v5181_v48, %v2125_v49 }
 0xcf6   : > { %v2128_v51 = vpop.f32.mrb[34].mxu0 }
 0xcf7   : > { %v2129_v53 = vadd.f32 %v5181_v48, %v2128_v51  ;;  %v5936_v54 = vpop.f32.mrb[35].mxu0 }
 0xcf8   : > { %v6291_v54 = vld [vmem:[%s7883_s13] ss:$8 sps:$4 sm:$0xff]  }
 0xcf9   : > { %v2215_v55 = vpack.c.bf16 %v2129_v53, %v2126_v52  ;;  %v6293_v53 = vld [vmem:[%s7883_s13 + $0x4] ss:$8 sps:$4 sm:$0xff]  }
 0xcfb   : > { %v2220_v56 = vsel %vm957_vm2, %v2215_v55, 0  ;;  %v6296_v55 = vld [vmem:[%s7883_s13 + $0x14] ss:$8 sps:$4 sm:$0xff]  }
 0xcfc   : > { %5950 = vmatpush3.bf16.xpose.msra.mxu0 %v2220_v56  ;;  %v6294_v56 = vld [vmem:[%s7883_s13 + $0x10] ss:$8 sps:$4 sm:$0xff]  }
 0xcfd   : > { %5955 = vmatprep.subr.bf16.mxu0 %v6553_v15 }
 0xd03   : > { %5952 = vmatmul.mubr.msk.bf16.vlgmr.msra.gmra.mrb[36].mxu0 %vm957_vm2, %v2214_v30  ;;  %v6487_v30 = vld [vmem:[%s6722_s4] sm:$0xff]  ;;  %s6556_s4 = smov [#allocation2]  }
 0xd04   : > { %5956 = vmatpush3.bf16.msra.mxu0 %v2288_v42  ;;  %5957 = vmatprep.mubr.msk.bf16.mxu0 %vm6554_vm1, %v6553_v15  ;;  %s6493_s0 = sshll.u32 %s6556_s4, 4  ;;  %s6494_s0 = int_to_ptr.vmem [resolvable:$false] %s6493_s0 }
 0xd05   : > { %2508 = vmatprep.subr.bf16.mxu0 %v6293_v53  ;;  %p6496_p0 = scmp.lt.s32.totalorder %s7822_s2, %s6494_s0 }
 0xdd6   : > { %v2256_v16 = vpop.f32.mrb[36].mxu0 }
 0xdd7   : > { %v2263_v22 = vsel %vm6881_vm3, %v2256_v16, -inf  ;;  %v5953_v57 = vpop.f32.mrb[37].mxu0  ;;  %v6299_v16 = vld [vmem:[%s7883_s13 + $0x24] ss:$8 sps:$4 sm:$0xff]  }
 0xdd8   : > { %v2259_v58 = vpop.f32.mrb[38].mxu0  ;;  %v2265_v59 = vsel %vm957_vm2, %v2263_v22, -inf  ;;  %v6300_v57 = vld [vmem:[%s7883_s13 + $0x30] ss:$8 sps:$4 sm:$0xff]  }
 0xdd9   : > { %v2264_v60 = vsel %vm6885_vm4, %v2259_v58, -inf  ;;  %2266 = vmax.xlane.f32.xlu0 %v2265_v59  ;;  %v5954_v61 = vpop.f32.mrb[39].mxu0  ;;  %v6302_v58 = vld [vmem:[%s7883_s13 + $0x34] ss:$8 sps:$4 sm:$0xff]   ;;  %v6555_v59 = vmov 0  }
 0xdda   : > { %v2268_v62 = vsel %vm957_vm2, %v2264_v60, -inf  ;;  %v6304_v61 = vld [vmem:[%s7885_s15] sm:$0xff]  }
 0xddb   : > { %2269 = vmax.xlane.f32.xlu1 %v2268_v62  ;;  %v6305_v62 = vld [vmem:[%s7885_s15 + $0x48] sm:$0xff]  }
 0xe66   : > { %v2267_v63 = vpop.xlane.xlu0 %2266 }
 0xe67   : > { %v2271_v0 = vsub.f32 %v2263_v22, %v2267_v63  ;;  %v6297_v22 = vld [vmem:[%s7883_s13 + $0x20] ss:$8 sps:$4 sm:$0xff]  }
 0xe68   : > { %v2270_v1 = vpop.xlane.xlu1 %2269  ;;  %v6306_v63 = vld [vmem:[%s7885_s15 + $0x8] sm:$0xff]  }
 0xe69   : > { %v2273_v2 = vmul.f32 1.442695, %v2271_v0  ;;  %v2272_v3 = vsub.f32 %v2264_v60, %v2270_v1  ;;  %v6303_v60 = vld [vmem:[%s7885_s15 + $0x40] sm:$0xff]   ;;  %v6307_v0 = vld [vmem:[%s7885_s15 + $0x50] sm:$0xff]  }
 0xe6a   : > { %5618 = vmatprep.subr.bf16.mxu1 %v6303_v60  ;;  %v6308_v1 = vld [vmem:[%s7885_s15 + $0x10] sm:$0xff]  }
 0xe6b   : > { %6431 = vpow2.f32 %v2273_v2  ;;  %v2275_v4 = vmul.f32 1.442695, %v2272_v3  ;;  %v6309_v2 = vld [vmem:[%s7885_s15 + $0x58] sm:$0xff]  }
 0xe6c   : > { %v6310_v3 = vld [vmem:[%s7885_s15 + $0x18] sm:$0xff]  }
 0xe6d   : > { %6433 = vpow2.f32 %v2275_v4  ;;  %v6311_v4 = vld [vmem:[%s7885_s15 + $0x60] sm:$0xff]  }
 0xe75   : > { %v6432_v5 = vpop.eup %6431 }
 0xe76   : > { %v2277_v6 = vsel %vm957_vm2, %v6432_v5, 0.0 }
 0xe77   : > { %v6434_v7 = vpop.eup %6433  ;;  %2278 = vadd.xlane.f32.xlu0 %v2277_v6  ;;  %v6313_v6 = vld [vmem:[%s7885_s15 + $0x68] sm:$0xff]  }
 0xe78   : > { %v2280_v8 = vsel %vm957_vm2, %v6434_v7, 0.0 }
 0xe79   : > { %2281 = vadd.xlane.f32.xlu1 %v2280_v8 }
 0xf04   : > { %v2279_v10 = vpop.xlane.xlu0 %2278 }
 0xf05   : > { %6435 = vrcp.f32 %v2279_v10 }
 0xf06   : > { %v2282_v11 = vpop.xlane.xlu1 %2281 }
 0xf07   : > { %6437 = vrcp.f32 %v2282_v11 }
 0xf0f   : > { %v6436_v12 = vpop.eup %6435 }
 0xf10   : > { %v2284_v14 = vmul.f32 %v6436_v12, %v6432_v5  ;;  %v6312_v5 = vld [vmem:[%s7885_s15 + $0x20] sm:$0xff]  }
 0xf11   : > { %v6438_v13 = vpop.eup %6437 }
 0xf12   : > { %v2286_v17 = vmul.f32 %v6438_v13, %v6434_v7 }
 0xf14   : > { %v2287_v20 = vpack.c.bf16 %v2286_v17, %v2284_v14  ;;  %v5209_v14 = vld [vmem:[%s7881_s11] ss:$0 sm:$0xff] }
 0xf16   : > { %5958 = vmatmul.mubr.msk.bf16.vlgmr.msra.gmra.mrb[40].mxu0 %vm957_vm2, %v2287_v20 }
 0xf17   : > { %2509 = vmatpush1.bf16.msra.mxu0 %v6291_v54  ;;  %2540 = vmatprep.mubr.bf16.mxu0 %v6555_v59 }
 0xf18   : > { %2510 = vmatprep.subr.bf16.mxu0 %v6296_v55 }
 0xf1b   : > { %2511 = vmatpush1.bf16.msra.mxu0 %v6294_v56 }
 0xf1c   : > { %2512 = vmatprep.subr.bf16.mxu0 %v6299_v16  ;;  %v5220_v16 = vld [vmem:[%s7886_s16] ss:$0 sm:$0xff] }
 0xf1f   : > { %2513 = vmatpush1.bf16.msra.mxu0 %v6297_v22 }
 0xf20   : > { %2514 = vmatprep.subr.bf16.mxu0 %v6302_v58 }
 0xf23   : > { %2515 = vmatpush1.bf16.msra.mxu0 %v6300_v57 }
 0xf24   : > { %5967 = vmatprep.subr.bf16.mxu0 %v6553_v15 }
 0xfe9   : > { %v2326_v23 = vpop.f32.mrb[40].mxu0 }
 0xfea   : > { %v5959_v24 = vpop.f32.mrb[41].mxu0 }
 0xfeb   : > { %v2329_v18 = vpop.f32.mrb[42].mxu0 }
 0xfec   : > { %v2333_v19 = vpack.c.bf16 %v2329_v18, %v2326_v23  ;;  %v5960_v21 = vpop.f32.mrb[43].mxu0  ;;  %v5210_v18 = vld [vmem:[%s7882_s12] ss:$0 sm:$0xff] }
 0xfee   : > { %5964 = vmatmul.mubr.msk.bf16.vlgmr.msra.gmra.mrb[48].mxu1 %vm957_vm2, %v2333_v19 }
 0xfef   : > { %5619 = vmatpush3.bf16.msra.mxu1 %v6304_v61 }
 0xff0   : > { %5620 = vmatprep.subr.bf16.mxu1 %v6305_v62 }
 0xff3   : > { %5621 = vmatpush3.bf16.msra.mxu1 %v6306_v63 }
 0xff4   : > { %5622 = vmatprep.subr.bf16.mxu1 %v6307_v0 }
 0xff7   : > { %5623 = vmatpush3.bf16.msra.mxu1 %v6308_v1 }
 0xff8   : > { %5624 = vmatprep.subr.bf16.mxu1 %v6309_v2 }
 0xffb   : > { %5625 = vmatpush3.bf16.msra.mxu1 %v6310_v3 }
 0xffc   : > { %5626 = vmatprep.subr.bf16.mxu1 %v6311_v4 }
 0xfff   : > { %5627 = vmatpush3.bf16.msra.mxu1 %v6312_v5 }
0x1000   : > { %5628 = vmatprep.subr.bf16.mxu1 %v6313_v6 }
0x10c1   : > { %v2380_v25 = vpop.f32.mrb[48].mxu1 }
0x10c2   : > { %v2387_v26 = vadd.f32 %v2380_v25, %v1966_v44  ;;  %v5965_v27 = vpop.f32.mrb[49].mxu1 }
0x10c3   : > { %v2383_v29 = vpop.f32.mrb[50].mxu1  ;;  %v6314_v27 = vld [vmem:[%s7885_s15 + $0x28] sm:$0xff]  }
0x10c4   : > { %v2389_v32 = vadd.f32 %v6487_v30, %v2387_v26  ;;  %v2388_v33 = vadd.f32 %v2383_v29, %v7128_v40  ;;  %v5966_v35 = vpop.f32.mrb[51].mxu1  ;;  %5629 = vmatpush3.bf16.msra.mxu1 %v6314_v27  ;;  %v6316_v29 = vld [vmem:[%s7885_s15 + $0x30] sm:$0xff]   ;;  %v6317_v30 = vld [vmem:[%s7885_s15 + $0x78] sm:$0xff]  }
0x10c5   : > { %v2453_v35 = vld [vmem:[%s7884_s14] sm:$0x3] }
0x10c6   : > { %v7156_v37 = vadd.f32 %v5208_v28, %v2389_v32  ;;  %v2390_v39 = vadd.f32 %v6488_v38, %v2388_v33  ;;  %v6318_v32 = vld [vmem:[%s7885_s15 + $0x38] sm:$0xff]   ;;  %v2457_v33 = vsub.s32 0, %v6877_v31  ;;  %v2461_v38 = vsub.s32 1, %v6877_v31  ;;  %v5502_v31 = vld [vmem:[%s7886_s16 + $0x1] ss:$0 sm:$0xff] }
0x10c8   : > { %v7159_v41 = vadd.f32 %v5208_v28, %v2390_v39  ;;  %v2402_v42 = vsel %vm667_vm0, %v7156_v37, 0.0  ;;  %v6315_v28 = vld [vmem:[%s7885_s15 + $0x70] sm:$0xff]   ;;  %v2458_v39 = vrot.slane %v2453_v35, %v2457_v33 }
0x10c9   : > { %2403 = vadd.xlane.f32.xlu0 %v2402_v42  ;;  %5630 = vmatprep.subr.bf16.mxu1 %v6315_v28  ;;  %v2462_v42 = vrot.slane %v2453_v35, %v2461_v38 }
0x10ca   : > { %v2405_v43 = vsel %vm667_vm0, %v7159_v41, 0.0  ;;  %5631 = vmatpush3.bf16.msra.mxu1 %v6316_v29 }
0x10cb   : > { %2406 = vadd.xlane.f32.xlu1 %v2405_v43  ;;  %5632 = vmatprep.subr.bf16.mxu1 %v6317_v30  ;;  %v5239_v30 = vld [vmem:[%s7929_s28 + $0x1] ss:$0 sm:$0xff] }
0x10ce   : > { %5633 = vmatpush3.bf16.msra.mxu1 %v6318_v32 }
0x10cf   : > { %5991 = vmatprep.subr.bf16.mxu1 %v6553_v15 }
0x1156   : > { %v2404_v44 = vpop.xlane.xlu0 %2403 }
0x1157   : > { %v2408_v45 = vmul.f32 0.015625, %v2404_v44 }
0x1158   : > { %v2407_v46 = vpop.xlane.xlu1 %2406 }
0x1159   : > { %v2410_v40 = vsub.f32 %v7156_v37, %v2408_v45  ;;  %v2409_v47 = vmul.f32 0.015625, %v2407_v46 }
0x115b   : > { %v2411_v48 = vsub.f32 %v7159_v41, %v2409_v47  ;;  %v2412_v49 = vmul.f32 %v2410_v40, %v2410_v40 }
0x115d   : > { %v2414_v50 = vsel %vm667_vm0, %v2412_v49, 0.0  ;;  %v2413_v51 = vmul.f32 %v2411_v48, %v2411_v48 }
0x115e   : > { %2415 = vadd.xlane.f32.xlu0 %v2414_v50 }
0x115f   : > { %v2417_v52 = vsel %vm667_vm0, %v2413_v51, 0.0 }
0x1160   : > { %2418 = vadd.xlane.f32.xlu1 %v2417_v52 }
0x11eb   : > { %v2416_v7 = vpop.xlane.xlu0 %2415 }
0x11ec   : > { %v2420_v8 = vmul.f32 0.015625, %v2416_v7 }
0x11ed   : > { %v2419_v9 = vpop.xlane.xlu1 %2418 }
0x11ee   : > { %v2422_v10 = vadd.f32 1e-05, %v2420_v8  ;;  %v2421_v11 = vmul.f32 0.015625, %v2419_v9 }
0x11f0   : > { %6439 = vrsqrt.f32 %v2422_v10  ;;  %v2423_v12 = vadd.f32 1e-05, %v2421_v11 }
0x11f2   : > { %6441 = vrsqrt.f32 %v2423_v12  ;;  %v6319_v12 = vld [vmem:[%s7927_s24 + $0x80] sm:$0xff]  }
0x11fa   : > { %v6440_v13 = vpop.eup %6439 }
0x11fb   : > { %v2426_v17 = vmul.f32 %v6440_v13, %v2410_v40  ;;  %v6320_v13 = vld [vmem:[%s7931_s7 + $0x80] sm:$0xff]  }
0x11fc   : > { %v6442_v20 = vpop.eup %6441 }
0x11fd   : > { %v2434_v23 = vmul.f32 %v5209_v14, %v2426_v17  ;;  %v2427_v24 = vmul.f32 %v6442_v20, %v2411_v48  ;;  %v6322_v17 = vld [vmem:[%s7931_s7 + $0x88] sm:$0xff]   ;;  %v6323_v20 = vld [vmem:[%s7927_s24 + $0x90] sm:$0xff]  }
0x11ff   : > { %v2435_v19 = vmul.f32 %v5209_v14, %v2427_v24  ;;  %v2442_v21 = vadd.f32 %v5210_v18, %v2434_v23  ;;  %v6321_v14 = vld [vmem:[%s7927_s24 + $0x88] sm:$0xff]   ;;  %v6324_v23 = vld [vmem:[%s7931_s7 + $0x90] sm:$0xff]   ;;  %v6325_v24 = vld [vmem:[%s7927_s24 + $0x98] sm:$0xff]  }
0x1201   : > { %v2443_v25 = vadd.f32 %v5210_v18, %v2435_v19  ;;  %v6326_v18 = vld [vmem:[%s7931_s7 + $0x98] sm:$0xff]  }
0x1203   : > { %v2444_v26 = vpack.c.bf16 %v2443_v25, %v2442_v21 }
0x1205   : > { %5219 = vmatmul.mubr.msk.bf16.vlgmr.msra.gmra.mrb[44].mxu0 %vm667_vm0, %v2444_v26 }
0x1206   : > { %5975 = vmatprep.mubr.msk.bf16.mxu0 %vm6554_vm1, %v6553_v15  ;;  %5968 = vmatpush3.bf16.msra.mxu0 %v6319_v12  ;;  %v6332_v12 = vld [vmem:[%s7927_s24 + $0xa8] sm:$0xff]  }
0x1207   : > { %5969 = vmatprep.subr.bf16.mxu0 %v6553_v15 }
0x120a   : > { %5970 = vmatpush3.bf16.msra.mxu0 %v6321_v14  ;;  %v6334_v14 = vld [vmem:[%s7927_s24 + $0xb8] sm:$0xff]  }
0x120b   : > { %5971 = vmatprep.subr.bf16.mxu0 %v6553_v15 }
0x120e   : > { %5972 = vmatpush3.bf16.msra.mxu0 %v6323_v20  ;;  %v6336_v20 = vld [vmem:[%s7931_s7 + $0xa8] sm:$0xff]  }
0x120f   : > { %5973 = vmatprep.subr.bf16.mxu0 %v6553_v15 }
0x1212   : > { %5974 = vmatpush3.bf16.msra.mxu0 %v6325_v24  ;;  %v6338_v24 = vld [vmem:[%s7931_s7 + $0xb8] sm:$0xff]  }
0x1213   : > { %5979 = vmatprep.subr.bf16.mxu0 %v6553_v15 }
0x12d8   : > { %v2542_v43 = vpop.f32.mrb[44].mxu0 }
0x12d9   : > { %v2543_v44 = vadd.f32 %v2542_v43, %v2458_v39  ;;  %v2544_v45 = vpop.f32.mrb[45].mxu0  ;;  %v5240_v43 = vld [vmem:[%s7930_s29 + $0x1] ss:$0 sm:$0xff] }
0x12da   : > { %v2545_v46 = vadd.f32 %v2544_v45, %v2462_v42  ;;  %v2546_v40 = vpop.f32.mrb[46].mxu0 }
0x12db   : > { %v2547_v47 = vadd.f32 %v2546_v40, %v2458_v39  ;;  %v2548_v48 = vpop.f32.mrb[47].mxu0  ;;  %v2551_v50 = vmax.f32 %v2543_v44, 0.0  ;;  %v6327_v40 = vld [vmem:[%s7928_s30 + $0x80] sm:$0xff]  }
0x12dc   : > { %v2549_v49 = vadd.f32 %v2548_v48, %v2462_v42  ;;  %v2552_v52 = vmax.f32 %v2545_v46, 0.0  ;;  %v6328_v48 = vld [vmem:[%s7928_s30 + $0x88] sm:$0xff]  }
0x12dd   : > { %v2553_v51 = vmax.f32 %v2547_v47, 0.0 }
0x12de   : > { %v2554_v53 = vmax.f32 %v2549_v49, 0.0  ;;  %v6329_v49 = vld [vmem:[%s7928_s30 + $0x90] sm:$0xff]  }
0x12df   : > { %v2555_v54 = vpack.c.bf16 %v2553_v51, %v2551_v50  ;;  %v6330_v50 = vld [vmem:[%s7928_s30 + $0x98] sm:$0xff]   ;;  %v5250_v51 = vld [vmem:[%s7933_s22 + $0x4] ss:$0 sm:$0xff] }
0x12e0   : > { %v2556_v55 = vpack.c.bf16 %v2554_v53, %v2552_v52  ;;  %v5280_v53 = vld [vmem:[%s7935_s8 + $0x4] ss:$0 sm:$0xff] }
0x12e2   : > { %2724 = vmatprep.mubr.bf16.mxu1 %v2556_v55 }
0x12e3   : > { %2725 = vmatmul.mubr.bf16.vlgmr.msra.gmra.mrb[52].mxu1 %v2555_v54 }
0x12e4   : > { %5999 = vmatprep.mubr.msk.bf16.mxu1 %vm6554_vm1, %v6553_v15  ;;  %5992 = vmatpush3.bf16.msra.mxu1 %v6320_v13  ;;  %v6333_v13 = vld [vmem:[%s7927_s24 + $0xb0] sm:$0xff]  }
0x12e5   : > { %5993 = vmatprep.subr.bf16.mxu1 %v6553_v15 }
0x12e8   : > { %5994 = vmatpush3.bf16.msra.mxu1 %v6322_v17  ;;  %v6335_v17 = vld [vmem:[%s7931_s7 + $0xa0] sm:$0xff]  }
0x12e9   : > { %5995 = vmatprep.subr.bf16.mxu1 %v6553_v15 }
0x12ec   : > { %5996 = vmatpush3.bf16.msra.mxu1 %v6324_v23  ;;  %v6337_v23 = vld [vmem:[%s7931_s7 + $0xb0] sm:$0xff]  }
0x12ed   : > { %5997 = vmatprep.subr.bf16.mxu1 %v6553_v15 }
0x12f0   : > { %5998 = vmatpush3.bf16.msra.mxu1 %v6326_v18 }
0x12f1   : > { %6009 = vmatprep.subr.bf16.mxu1 %v6553_v15 }
0x13b6   : > { %v5634_v56 = vpop.f32.mrb[52].mxu1 }
0x13b7   : > { %v5635_v22 = vpop.f32.mrb[53].mxu1 }
0x13b8   : > { %v5636_v57 = vadd.f32 %v5635_v22, %v5634_v56  ;;  %v5637_v58 = vpop.f32.mrb[54].mxu1 }
0x13b9   : > { %v5638_v60 = vpop.f32.mrb[55].mxu1 }
0x13ba   : > { %v2727_v61 = vadd.f32 %v5636_v57, %v5220_v16  ;;  %v5639_v62 = vadd.f32 %v5638_v60, %v5637_v58 }
0x13bc   : > { %v7268_v63 = vadd.f32 %v2727_v61, %v7156_v37  ;;  %v2730_v0 = vadd.f32 %v5639_v62, %v5220_v16 }
0x13be   : > { %v7271_v1 = vadd.f32 %v2730_v0, %v7159_v41  ;;  %v2739_v2 = vsel %vm667_vm0, %v7268_v63, 0.0 }
0x13bf   : > { %2740 = vadd.xlane.f32.xlu0 %v2739_v2 }
0x13c0   : > { %v2742_v3 = vsel %vm667_vm0, %v7271_v1, 0.0 }
0x13c1   : > { %2743 = vadd.xlane.f32.xlu1 %v2742_v3 }
0x144c   : > { %v2741_v4 = vpop.xlane.xlu0 %2740 }
0x144d   : > { %v2745_v5 = vmul.f32 0.015625, %v2741_v4  ;;  %v5265_v4 = vld [vmem:[%s7934_s6 + $0x4] ss:$0 sm:$0xff] }
0x144e   : > { %v2744_v6 = vpop.xlane.xlu1 %2743 }
0x144f   : > { %v2747_v7 = vsub.f32 %v7268_v63, %v2745_v5  ;;  %v2746_v8 = vmul.f32 0.015625, %v2744_v6 }
0x1451   : > { %v2748_v37 = vsub.f32 %v7271_v1, %v2746_v8  ;;  %v2749_v9 = vmul.f32 %v2747_v7, %v2747_v7 }
0x1453   : > { %v2751_v41 = vsel %vm667_vm0, %v2749_v9, 0.0  ;;  %v2750_v10 = vmul.f32 %v2748_v37, %v2748_v37 }
0x1454   : > { %2752 = vadd.xlane.f32.xlu0 %v2751_v41 }
0x1455   : > { %v2754_v11 = vsel %vm667_vm0, %v2750_v10, 0.0 }
0x1456   : > { %2755 = vadd.xlane.f32.xlu1 %v2754_v11  ;;  %v6331_v11 = vld [vmem:[%s7927_s24 + $0xa0] sm:$0xff]  }
0x14e1   : > { %v2753_v19 = vpop.xlane.xlu0 %2752 }
0x14e2   : > { %v2757_v21 = vmul.f32 0.015625, %v2753_v19 }
0x14e3   : > { %v2756_v25 = vpop.xlane.xlu1 %2755 }
0x14e4   : > { %v2759_v26 = vadd.f32 1e-05, %v2757_v21  ;;  %v2758_v27 = vmul.f32 0.015625, %v2756_v25 }
0x14e6   : > { %6443 = vrsqrt.f32 %v2759_v26  ;;  %v2760_v28 = vadd.f32 1e-05, %v2758_v27 }
0x14e8   : > { %6445 = vrsqrt.f32 %v2760_v28 }
0x14f0   : > { %v6444_v29 = vpop.eup %6443 }
0x14f1   : > { %v2763_v32 = vmul.f32 %v6444_v29, %v2747_v7 }
0x14f2   : > { %v6446_v35 = vpop.eup %6445 }
0x14f3   : > { %v2771_v39 = vmul.f32 %v5239_v30, %v2763_v32  ;;  %v2764_v42 = vmul.f32 %v6446_v35, %v2748_v37 }
0x14f5   : > { %v2772_v44 = vmul.f32 %v5239_v30, %v2764_v42  ;;  %v2779_v45 = vadd.f32 %v5240_v43, %v2771_v39  ;;  %v5299_v30 = vld [vmem:[%s7933_s22 + $0x5] ss:$0 sm:$0xff] }
0x14f7   : > { %v2780_v46 = vadd.f32 %v5240_v43, %v2772_v44 }
0x14f9   : > { %v7322_v47 = vpack.c.bf16 %v2780_v46, %v2779_v45  ;;  %v5329_v46 = vld [vmem:[%s7935_s8 + $0x5] ss:$0 sm:$0xff] }
0x14fb   : > { %5976 = vmatmul.mubr.msk.bf16.vlgmr.msra.gmra.mrb[48].mxu0 %vm667_vm0, %v7322_v47  ;;  %6000 = vmatmul.mubr.msk.bf16.vlgmr.msra.gmra.mrb[56].mxu1 %vm667_vm0, %v7322_v47 }
0x14fc   : > { %5980 = vmatpush3.bf16.msra.mxu0 %v6327_v40  ;;  %5987 = vmatprep.mubr.msk.bf16.mxu0 %vm6554_vm1, %v6553_v15 }
0x14fd   : > { %5981 = vmatprep.subr.bf16.mxu0 %v6553_v15  ;;  %6011 = vmatprep.mubr.msk.bf16.mxu1 %vm6554_vm1, %v6553_v15 }
0x1500   : > { %5982 = vmatpush3.bf16.msra.mxu0 %v6328_v48 }
0x1501   : > { %5983 = vmatprep.subr.bf16.mxu0 %v6553_v15 }
0x1504   : > { %5984 = vmatpush3.bf16.msra.mxu0 %v6329_v49 }
0x1505   : > { %5985 = vmatprep.subr.bf16.mxu0 %v6553_v15 }
0x1508   : > { %5986 = vmatpush3.bf16.msra.mxu0 %v6330_v50 }
0x1509   : > { %6003 = vmatprep.subr.bf16.mxu0 %v6553_v15 }
0x150b   : > { %5988 = vmatmul.mubr.msk.bf16.vlgmr.msra.gmra.mrb[52].mxu0 %vm667_vm0, %v7322_v47 }
0x150c   : > { %6005 = vmatprep.mubr.msk.bf16.mxu0 %vm6554_vm1, %v6553_v15 }
0x15ce   : > { %v2860_v52 = vpop.f32.mrb[48].mxu0  ;;  %v3024_v54 = vpop.f32.mrb[56].mxu1 }
0x15cf   : > { %v5977_v55 = vpop.f32.mrb[49].mxu0  ;;  %v6001_v56 = vpop.f32.mrb[57].mxu1  ;;  %v2861_v57 = vadd.f32 %v5250_v51, %v2860_v52  ;;  %v3025_v58 = vadd.f32 %v5280_v53, %v3024_v54 }
0x15d0   : > { %v2863_v16 = vpop.f32.mrb[50].mxu0  ;;  %v3027_v22 = vpop.f32.mrb[58].mxu1 }
0x15d1   : > { %v2864_v60 = vadd.f32 %v5250_v51, %v2863_v16  ;;  %v3028_v61 = vadd.f32 %v5280_v53, %v3027_v22  ;;  %v5978_v62 = vpop.f32.mrb[51].mxu0  ;;  %v6002_v0 = vpop.f32.mrb[59].mxu1 }
0x15d3   : > { %v3031_v2 = vpack.c.bf16 %v2864_v60, %v2861_v57  ;;  %v3105_v3 = vpack.c.bf16 %v3028_v61, %v3025_v58 }
0x15d5   : > { %6010 = vmatpush3.bf16.msra.mxu1 %v3105_v3 }
0x15d6   : > { %6027 = vmatprep.subr.bf16.mxu1 %v6553_v15 }
0x15de   : > { %v2942_v5 = vpop.f32.mrb[52].mxu0 }
0x15df   : > { %v5989_v6 = vpop.f32.mrb[53].mxu0  ;;  %v2943_v8 = vadd.f32 %v5265_v4, %v2942_v5 }
0x15e0   : > { %v2945_v7 = vpop.f32.mrb[54].mxu0 }
0x15e1   : > { %v2946_v37 = vadd.f32 %v5265_v4, %v2945_v7  ;;  %v5990_v9 = vpop.f32.mrb[55].mxu0  ;;  %v6339_v7 = vld [vmem:[%s7928_s30 + $0xa0] sm:$0xff]  }
0x15e2   : > { %v6341_v9 = vld [vmem:[%s7928_s30 + $0xb0] sm:$0xff]  }
0x15e3   : > { %v3032_v41 = vpack.c.bf16 %v2946_v37, %v2943_v8  ;;  %v6340_v37 = vld [vmem:[%s7928_s30 + $0xa8] sm:$0xff]  }
0x15e5   : > { %v3037_v10 = vsel %vm957_vm2, %v3032_v41, 0  ;;  %v6342_v41 = vld [vmem:[%s7928_s30 + $0xb8] sm:$0xff]  }
0x15e6   : > { %6004 = vmatpush3.bf16.xpose.msra.mxu0 %v3037_v10 }
0x15e7   : > { %6015 = vmatprep.subr.bf16.mxu0 %v6553_v15 }
0x15ed   : > { %6006 = vmatmul.mubr.msk.bf16.vlgmr.msra.gmra.mrb[56].mxu0 %vm957_vm2, %v3031_v2 }
0x15ee   : > { %6016 = vmatpush3.bf16.msra.mxu0 %v6331_v11  ;;  %6023 = vmatprep.mubr.msk.bf16.mxu0 %vm6554_vm1, %v6553_v15 }
0x15ef   : > { %6017 = vmatprep.subr.bf16.mxu0 %v6553_v15 }
0x15f2   : > { %6018 = vmatpush3.bf16.msra.mxu0 %v6332_v12 }
0x15f3   : > { %6019 = vmatprep.subr.bf16.mxu0 %v6553_v15 }
0x15f6   : > { %6020 = vmatpush3.bf16.msra.mxu0 %v6333_v13 }
0x15f7   : > { %6021 = vmatprep.subr.bf16.mxu0 %v6553_v15 }
0x15fa   : > { %6022 = vmatpush3.bf16.msra.mxu0 %v6334_v14 }
0x15fb   : > { %6039 = vmatprep.subr.bf16.mxu0 %v6553_v15 }
0x15fd   : > { %6024 = vmatmul.mubr.msk.bf16.vlgmr.msra.gmra.mrb[60].mxu0 %vm667_vm0, %v7322_v47 }
0x15fe   : > { %6040 = vmatpush3.bf16.msra.mxu0 %v6335_v17  ;;  %6047 = vmatprep.mubr.msk.bf16.mxu0 %vm6554_vm1, %v6553_v15  ;;  %v5314_v17 = vld [vmem:[%s7934_s6 + $0x5] ss:$0 sm:$0xff] }
0x15ff   : > { %6041 = vmatprep.subr.bf16.mxu0 %v6553_v15 }
0x1602   : > { %6042 = vmatpush3.bf16.msra.mxu0 %v6336_v20 }
0x1603   : > { %6043 = vmatprep.subr.bf16.mxu0 %v6553_v15 }
0x1606   : > { %6044 = vmatpush3.bf16.msra.mxu0 %v6337_v23 }
0x1607   : > { %6045 = vmatprep.subr.bf16.mxu0 %v6553_v15 }
0x160a   : > { %6046 = vmatpush3.bf16.msra.mxu0 %v6338_v24 }
0x160b   : > { %6063 = vmatprep.subr.bf16.mxu0 %v6553_v15 }
0x160d   : > { %6048 = vmatmul.mubr.msk.bf16.vlgmr.msra.gmra.mrb[64].mxu0 %vm667_vm0, %v7322_v47 }
0x160e   : > { %6065 = vmatprep.mubr.msk.bf16.mxu0 %vm6554_vm1, %v6553_v15 }
0x16c0   : > { %v3073_v18 = vpop.f32.mrb[56].mxu0 }
0x16c1   : > { %v3080_v19 = vsel %vm6881_vm3, %v3073_v18, -inf  ;;  %v6007_v21 = vpop.f32.mrb[57].mxu0 }
0x16c2   : > { %v3076_v25 = vpop.f32.mrb[58].mxu0  ;;  %v3082_v26 = vsel %vm957_vm2, %v3080_v19, -inf }
0x16c3   : > { %v3081_v27 = vsel %vm6885_vm4, %v3076_v25, -inf  ;;  %3083 = vmax.xlane.f32.xlu0 %v3082_v26  ;;  %v6008_v28 = vpop.f32.mrb[59].mxu0 }
0x16c4   : > { %v3085_v29 = vsel %vm957_vm2, %v3081_v27, -inf }
0x16c5   : > { %3086 = vmax.xlane.f32.xlu1 %v3085_v29 }
0x16d0   : > { %v3229_v32 = vpop.f32.mrb[60].mxu0 }
0x16d1   : > { %v6025_v35 = vpop.f32.mrb[61].mxu0  ;;  %v7413_v42 = vadd.f32 %v5299_v30, %v3229_v32 }
0x16d2   : > { %v3232_v39 = vpop.f32.mrb[62].mxu0 }
0x16d3   : > { %v7415_v43 = vadd.f32 %v5299_v30, %v3232_v39  ;;  %v6026_v44 = vpop.f32.mrb[63].mxu0 }
0x16d5   : > { %v3400_v45 = vpack.c.bf16 %v7415_v43, %v7413_v42 }
0x16e0   : > { %v3393_v40 = vpop.f32.mrb[64].mxu0 }
0x16e1   : > { %v6049_v48 = vpop.f32.mrb[65].mxu0  ;;  %v3394_v50 = vadd.f32 %v5329_v46, %v3393_v40 }
0x16e2   : > { %v3396_v49 = vpop.f32.mrb[66].mxu0 }
0x16e3   : > { %v3397_v51 = vadd.f32 %v5329_v46, %v3396_v49  ;;  %v6050_v52 = vpop.f32.mrb[67].mxu0 }
0x16e5   : > { %v3474_v53 = vpack.c.bf16 %v3397_v51, %v3394_v50 }
0x1750   : > { %v3084_v54 = vpop.xlane.xlu0 %3083 }
0x1751   : > { %v3088_v55 = vsub.f32 %v3080_v19, %v3084_v54 }
0x1752   : > { %v3087_v56 = vpop.xlane.xlu1 %3086 }
0x1753   : > { %v3090_v16 = vmul.f32 1.442695, %v3088_v55  ;;  %v3089_v22 = vsub.f32 %v3081_v27, %v3087_v56 }
0x1755   : > { %6447 = vpow2.f32 %v3090_v16  ;;  %v3092_v57 = vmul.f32 1.442695, %v3089_v22 }
0x1757   : > { %6449 = vpow2.f32 %v3092_v57 }
0x175f   : > { %v6448_v58 = vpop.eup %6447 }
0x1760   : > { %v3094_v60 = vsel %vm957_vm2, %v6448_v58, 0.0 }
0x1761   : > { %v6450_v61 = vpop.eup %6449  ;;  %3095 = vadd.xlane.f32.xlu0 %v3094_v60 }
0x1762   : > { %v3097_v62 = vsel %vm957_vm2, %v6450_v61, 0.0 }
0x1763   : > { %3098 = vadd.xlane.f32.xlu1 %v3097_v62  ;;  %v6345_v62 = vld [vmem:[%s7928_s30 + $0xc8] sm:$0xff]  }
0x17ee   : > { %v3096_v0 = vpop.xlane.xlu0 %3095 }
0x17ef   : > { %6451 = vrcp.f32 %v3096_v0  ;;  %v6346_v0 = vld [vmem:[%s7928_s30 + $0xd0] sm:$0xff]  }
0x17f0   : > { %v3099_v2 = vpop.xlane.xlu1 %3098 }
0x17f1   : > { %6453 = vrcp.f32 %v3099_v2  ;;  %v6347_v2 = vld [vmem:[%s7928_s30 + $0xd8] sm:$0xff]  }
0x17f9   : > { %v6452_v3 = vpop.eup %6451 }
0x17fa   : > { %v3101_v5 = vmul.f32 %v6452_v3, %v6448_v58  ;;  %v6343_v58 = vld [vmem:[%s7879_s9 + $0x20] sm:$0xff]  }
0x17fb   : > { %v6454_v4 = vpop.eup %6453 }
0x17fc   : > { %v3103_v6 = vmul.f32 %v6454_v4, %v6450_v61  ;;  %v6344_v61 = vld [vmem:[%s7928_s30 + $0xc0] sm:$0xff]  }
0x17fe   : > { %v3104_v8 = vpack.c.bf16 %v3103_v6, %v3101_v5  ;;  %v6349_v6 = vld [vmem:[%s7927_s24 + $0xc0] sm:$0xff]  }
0x1800   : > { %6012 = vmatmul.mubr.msk.bf16.vlgmr.msra.gmra.mrb[60].mxu1 %vm957_vm2, %v3104_v8 }
0x1801   : > { %6028 = vmatpush3.bf16.msra.mxu1 %v6339_v7  ;;  %6035 = vmatprep.mubr.msk.bf16.mxu1 %vm6554_vm1, %v6553_v15 }
0x1802   : > { %6029 = vmatprep.subr.bf16.mxu1 %v6553_v15 }
0x1805   : > { %6030 = vmatpush3.bf16.msra.mxu1 %v6340_v37  ;;  %v6350_v37 = vld [vmem:[%s7927_s24 + $0xc8] sm:$0xff]  }
0x1806   : > { %6031 = vmatprep.subr.bf16.mxu1 %v6553_v15 }
0x1809   : > { %6032 = vmatpush3.bf16.msra.mxu1 %v6341_v9 }
0x180a   : > { %6033 = vmatprep.subr.bf16.mxu1 %v6553_v15 }
0x180d   : > { %6034 = vmatpush3.bf16.msra.mxu1 %v6342_v41 }
0x180e   : > { %6051 = vmatprep.subr.bf16.mxu1 %v6553_v15 }
0x1810   : > { %6036 = vmatmul.mubr.msk.bf16.vlgmr.msra.gmra.mrb[64].mxu1 %vm667_vm0, %v7322_v47 }
0x1811   : > { %6053 = vmatprep.mubr.msk.bf16.mxu1 %vm6554_vm1, %v6553_v15 }
0x18d3   : > { %v7447_v10 = vpop.f32.mrb[60].mxu1 }
0x18d4   : > { %v6013_v11 = vpop.f32.mrb[61].mxu1 }
0x18d5   : > { %v3146_v12 = vpop.f32.mrb[62].mxu1  ;;  %v6351_v11 = vld [vmem:[%s7927_s24 + $0xd0] sm:$0xff]  }
0x18d6   : > { %v3150_v13 = vpack.c.bf16 %v3146_v12, %v7447_v10  ;;  %v6014_v14 = vpop.f32.mrb[63].mxu1 }
0x18d7   : > { %v6353_v14 = vld [vmem:[%s7931_s7 + $0xc0] sm:$0xff]  }
0x18e3   : > { %v3311_v20 = vpop.f32.mrb[64].mxu1 }
0x18e4   : > { %v6037_v23 = vpop.f32.mrb[65].mxu1  ;;  %v3312_v18 = vadd.f32 %v5314_v17, %v3311_v20  ;;  %v5367_v20 = vld [vmem:[%s7934_s6 + $0x6] ss:$0 sm:$0xff] }
0x18e5   : > { %v3314_v24 = vpop.f32.mrb[66].mxu1 }
0x18e6   : > { %v3315_v19 = vadd.f32 %v5314_v17, %v3314_v24  ;;  %v6038_v21 = vpop.f32.mrb[67].mxu1  ;;  %v6354_v17 = vld [vmem:[%s7931_s7 + $0xc8] sm:$0xff]  }
0x18e8   : > { %v3401_v25 = vpack.c.bf16 %v3315_v19, %v3312_v18  ;;  %v6355_v19 = vld [vmem:[%s7931_s7 + $0xd0] sm:$0xff]  }
0x18ea   : > { %v3406_v26 = vsel %vm957_vm2, %v3401_v25, 0 }
0x18eb   : > { %6052 = vmatpush3.bf16.xpose.msra.mxu1 %v3406_v26 }
0x18ec   : > { %6057 = vmatprep.subr.bf16.mxu1 %v6553_v15 }
0x18f2   : > { %6054 = vmatmul.mubr.msk.bf16.vlgmr.msra.gmra.mrb[68].mxu1 %vm957_vm2, %v3400_v45 }
0x18f3   : > { %6058 = vmatpush3.bf16.msra.mxu1 %v3474_v53  ;;  %6059 = vmatprep.mubr.msk.bf16.mxu1 %vm6554_vm1, %v6553_v15  ;;  %v6348_v53 = vld [vmem:[%s7879_s9 + $0x28] sm:$0xff]  }
0x18f4   : > { %6069 = vmatprep.subr.bf16.mxu1 %v6553_v15  ;;  %6064 = vmatpush3.bf16.msra.mxu0 %v6348_v53 }
0x18f5   : > { %6075 = vmatprep.subr.bf16.mxu0 %v6553_v15 }
0x19c5   : > { %v3442_v27 = vpop.f32.mrb[68].mxu1 }
0x19c6   : > { %v3449_v28 = vsel %vm6881_vm3, %v3442_v27, -inf  ;;  %v6055_v29 = vpop.f32.mrb[69].mxu1 }
0x19c7   : > { %v3445_v30 = vpop.f32.mrb[70].mxu1  ;;  %v3451_v32 = vsel %vm957_vm2, %v3449_v28, -inf }
0x19c8   : > { %v3450_v35 = vsel %vm6885_vm4, %v3445_v30, -inf  ;;  %3452 = vmax.xlane.f32.xlu0 %v3451_v32  ;;  %v6056_v39 = vpop.f32.mrb[71].mxu1 }
0x19c9   : > { %v3454_v42 = vsel %vm957_vm2, %v3450_v35, -inf }
0x19ca   : > { %3455 = vmax.xlane.f32.xlu1 %v3454_v42 }
0x1a55   : > { %v3453_v43 = vpop.xlane.xlu0 %3452 }
0x1a56   : > { %v3457_v44 = vsub.f32 %v3449_v28, %v3453_v43  ;;  %v6356_v28 = vld [vmem:[%s7931_s7 + $0xd8] sm:$0xff]  }
0x1a57   : > { %v3456_v45 = vpop.xlane.xlu1 %3455 }
0x1a58   : > { %v3459_v46 = vmul.f32 1.442695, %v3457_v44  ;;  %v3458_v40 = vsub.f32 %v3450_v35, %v3456_v45  ;;  %v5352_v44 = vld [vmem:[%s7933_s22 + $0x6] ss:$0 sm:$0xff] }
0x1a5a   : > { %6455 = vpow2.f32 %v3459_v46  ;;  %v3461_v48 = vmul.f32 1.442695, %v3458_v40 }
0x1a5c   : > { %6457 = vpow2.f32 %v3461_v48 }
0x1a64   : > { %v6456_v49 = vpop.eup %6455 }
0x1a65   : > { %v3463_v50 = vsel %vm957_vm2, %v6456_v49, 0.0 }
0x1a66   : > { %v6458_v51 = vpop.eup %6457  ;;  %3464 = vadd.xlane.f32.xlu0 %v3463_v50 }
0x1a67   : > { %v3466_v52 = vsel %vm957_vm2, %v6458_v51, 0.0 }
0x1a68   : > { %3467 = vadd.xlane.f32.xlu1 %v3466_v52  ;;  %v5382_v52 = vld [vmem:[%s7935_s8 + $0x6] ss:$0 sm:$0xff] }
0x1af3   : > { %v3465_v54 = vpop.xlane.xlu0 %3464 }
0x1af4   : > { %6459 = vrcp.f32 %v3465_v54 }
0x1af5   : > { %v3468_v55 = vpop.xlane.xlu1 %3467 }
0x1af6   : > { %6461 = vrcp.f32 %v3468_v55 }
0x1afe   : > { %v6460_v56 = vpop.eup %6459 }
0x1aff   : > { %v3470_v22 = vmul.f32 %v6460_v56, %v6456_v49 }
0x1b00   : > { %v6462_v16 = vpop.eup %6461 }
0x1b01   : > { %v3472_v57 = vmul.f32 %v6462_v16, %v6458_v51 }
0x1b03   : > { %v3473_v60 = vpack.c.bf16 %v3472_v57, %v3470_v22 }
0x1b05   : > { %6060 = vmatmul.mubr.msk.bf16.vlgmr.msra.gmra.mrb[72].mxu1 %vm957_vm2, %v3473_v60 }
0x1b06   : > { %6070 = vmatpush3.bf16.msra.mxu1 %v6343_v58  ;;  %6071 = vmatprep.mubr.msk.bf16.mxu1 %vm6554_vm1, %v6553_v15 }
0x1b07   : > { %6087 = vmatprep.subr.bf16.mxu1 %v6553_v15 }
0x1b0d   : > { %6072 = vmatmul.mubr.msk.bf16.vlgmr.msra.gmra.mrb[76].mxu1 %vm957_vm2, %v3150_v13  ;;  %v6352_v13 = vld [vmem:[%s7927_s24 + $0xd8] sm:$0xff]  }
0x1b0e   : > { %6088 = vmatpush3.bf16.msra.mxu1 %v6344_v61  ;;  %6095 = vmatprep.mubr.msk.bf16.mxu1 %vm6554_vm1, %v6553_v15 }
0x1b0f   : > { %6089 = vmatprep.subr.bf16.mxu1 %v6553_v15 }
0x1b12   : > { %6090 = vmatpush3.bf16.msra.mxu1 %v6345_v62 }
0x1b13   : > { %6091 = vmatprep.subr.bf16.mxu1 %v6553_v15 }
0x1b16   : > { %6092 = vmatpush3.bf16.msra.mxu1 %v6346_v0 }
0x1b17   : > { %6093 = vmatprep.subr.bf16.mxu1 %v6553_v15 }
0x1b1a   : > { %6094 = vmatpush3.bf16.msra.mxu1 %v6347_v2 }
0x1b1b   : > { %6111 = vmatprep.subr.bf16.mxu1 %v6553_v15 }
0x1b1d   : > { %6096 = vmatmul.mubr.msk.bf16.vlgmr.msra.gmra.mrb[80].mxu1 %vm667_vm0, %v7322_v47 }
0x1b1e   : > { %6113 = vmatprep.mubr.msk.bf16.mxu1 %vm6554_vm1, %v6553_v15 }
0x1bd8   : > { %v3512_v3 = vpop.f32.mrb[72].mxu1 }
0x1bd9   : > { %v6061_v4 = vpop.f32.mrb[73].mxu1 }
0x1bda   : > { %v3515_v5 = vpop.f32.mrb[74].mxu1 }
0x1bdb   : > { %v3519_v7 = vpack.c.bf16 %v3515_v5, %v3512_v3  ;;  %v6062_v8 = vpop.f32.mrb[75].mxu1 }
0x1bdd   : > { %6066 = vmatmul.mubr.msk.bf16.vlgmr.msra.gmra.mrb[68].mxu0 %vm957_vm2, %v3519_v7 }
0x1bde   : > { %6076 = vmatpush3.bf16.msra.mxu0 %v6349_v6  ;;  %6083 = vmatprep.mubr.msk.bf16.mxu0 %vm6554_vm1, %v6553_v15 }
0x1bdf   : > { %6077 = vmatprep.subr.bf16.mxu0 %v6553_v15 }
0x1be0   : > { %v3616_v9 = vpop.f32.mrb[76].mxu1 }
0x1be1   : > { %v6073_v41 = vpop.f32.mrb[77].mxu1 }
0x1be2   : > { %6078 = vmatpush3.bf16.msra.mxu0 %v6350_v37  ;;  %v3619_v10 = vpop.f32.mrb[78].mxu1 }
0x1be3   : > { %v6074_v12 = vpop.f32.mrb[79].mxu1  ;;  %6079 = vmatprep.subr.bf16.mxu0 %v6553_v15 }
0x1be6   : > { %6080 = vmatpush3.bf16.msra.mxu0 %v6351_v11 }
0x1be7   : > { %6081 = vmatprep.subr.bf16.mxu0 %v6553_v15 }
0x1bea   : > { %6082 = vmatpush3.bf16.msra.mxu0 %v6352_v13  ;;  %v6365_v13 = vld [vmem:[%s7879_s9 + $0x30] sm:$0xff]  }
0x1beb   : > { %6099 = vmatprep.subr.bf16.mxu0 %v6553_v15 }
0x1bed   : > { %6084 = vmatmul.mubr.msk.bf16.vlgmr.msra.gmra.mrb[72].mxu0 %vm667_vm0, %v7322_v47 }
0x1bee   : > { %6100 = vmatpush3.bf16.msra.mxu0 %v6353_v14  ;;  %6107 = vmatprep.mubr.msk.bf16.mxu0 %vm6554_vm1, %v6553_v15 }
0x1bef   : > { %6101 = vmatprep.subr.bf16.mxu0 %v6553_v15 }
0x1bf0   : > { %v3780_v23 = vpop.f32.mrb[80].mxu1 }
0x1bf1   : > { %v6097_v24 = vpop.f32.mrb[81].mxu1  ;;  %v3781_v21 = vadd.f32 %v5367_v20, %v3780_v23 }
0x1bf2   : > { %v3783_v18 = vpop.f32.mrb[82].mxu1  ;;  %6102 = vmatpush3.bf16.msra.mxu0 %v6354_v17 }
0x1bf3   : > { %v3784_v25 = vadd.f32 %v5367_v20, %v3783_v18  ;;  %v6098_v26 = vpop.f32.mrb[83].mxu1  ;;  %6103 = vmatprep.subr.bf16.mxu0 %v6553_v15 }
0x1bf4   : > { %v6359_v26 = vld [vmem:[%s7927_s24 + $0xf0] sm:$0xff]  }
0x1bf5   : > { %v3870_v27 = vpack.c.bf16 %v3784_v25, %v3781_v21  ;;  %v6358_v25 = vld [vmem:[%s7927_s24 + $0xe8] sm:$0xff]  }
0x1bf6   : > { %6104 = vmatpush3.bf16.msra.mxu0 %v6355_v19  ;;  %v6357_v19 = vld [vmem:[%s7927_s24 + $0xe0] sm:$0xff]  }
0x1bf7   : > { %v3875_v29 = vsel %vm957_vm2, %v3870_v27, 0  ;;  %6105 = vmatprep.subr.bf16.mxu0 %v6553_v15  ;;  %v6360_v27 = vld [vmem:[%s7927_s24 + $0xf8] sm:$0xff]  }
0x1bf8   : > { %6112 = vmatpush3.bf16.xpose.msra.mxu1 %v3875_v29  ;;  %v6362_v29 = vld [vmem:[%s7931_s7 + $0xe8] sm:$0xff]  }
0x1bf9   : > { %6117 = vmatprep.subr.bf16.mxu1 %v6553_v15 }
0x1bfa   : > { %6106 = vmatpush3.bf16.msra.mxu0 %v6356_v28  ;;  %v6361_v28 = vld [vmem:[%s7931_s7 + $0xe0] sm:$0xff]  }
0x1bfb   : > { %6123 = vmatprep.subr.bf16.mxu0 %v6553_v15 }
0x1bfd   : > { %6108 = vmatmul.mubr.msk.bf16.vlgmr.msra.gmra.mrb[76].mxu0 %vm667_vm0, %v7322_v47 }
0x1bfe   : > { %6125 = vmatprep.mubr.msk.bf16.mxu0 %vm6554_vm1, %v6553_v15  ;;  %6124 = vmatpush3.bf16.msra.mxu0 %v6365_v13 }
0x1bff   : > { %6141 = vmatprep.subr.bf16.mxu0 %v6553_v15 }
0x1cb0   : > { %v3566_v30 = vpop.f32.mrb[68].mxu0 }
0x1cb1   : > { %v7552_v32 = vadd.f32 %v3616_v9, %v3566_v30  ;;  %v6067_v35 = vpop.f32.mrb[69].mxu0  ;;  %v6363_v30 = vld [vmem:[%s7931_s7 + $0xf0] sm:$0xff]  }
0x1cb2   : > { %v3569_v39 = vpop.f32.mrb[70].mxu0  ;;  %v6364_v35 = vld [vmem:[%s7931_s7 + $0xf8] sm:$0xff]   ;;  %s7942_s7 = sld [smem:[#allocation22_spill]] }
0x1cb3   : > { %v7554_v42 = vadd.f32 %v3619_v10, %v3569_v39  ;;  %v6068_v43 = vpop.f32.mrb[71].mxu0 }
0x1cc0   : > { %v3698_v45 = vpop.f32.mrb[72].mxu0 }
0x1cc1   : > { %v6085_v46 = vpop.f32.mrb[73].mxu0  ;;  %v3699_v48 = vadd.f32 %v5352_v44, %v3698_v45  ;;  %v6366_v45 = vld [vmem:[%s7928_s30 + $0xe0] sm:$0xff]  }
0x1cc2   : > { %v3701_v40 = vpop.f32.mrb[74].mxu0 }
0x1cc3   : > { %v3702_v49 = vadd.f32 %v5352_v44, %v3701_v40  ;;  %v6086_v50 = vpop.f32.mrb[75].mxu0 }
0x1cc4   : > { %v6369_v50 = vld [vmem:[%s7928_s30 + $0xf8] sm:$0xff]  }
0x1cc5   : > { %v3869_v51 = vpack.c.bf16 %v3702_v49, %v3699_v48  ;;  %v6367_v48 = vld [vmem:[%s7928_s30 + $0xe8] sm:$0xff]   ;;  %v6368_v49 = vld [vmem:[%s7928_s30 + $0xf0] sm:$0xff]  }
0x1cc7   : > { %6114 = vmatmul.mubr.msk.bf16.vlgmr.msra.gmra.mrb[84].mxu1 %vm957_vm2, %v3869_v51  ;;  %v5403_v51 = vld [vmem:[%s7933_s22 + $0x7] ss:$0 sm:$0xff] }
0x1cc8   : > { %6119 = vmatprep.mubr.msk.bf16.mxu1 %vm6554_vm1, %v6553_v15 }
0x1cd0   : > { %v3862_v53 = vpop.f32.mrb[76].mxu0 }
0x1cd1   : > { %v6109_v54 = vpop.f32.mrb[77].mxu0  ;;  %v3863_v56 = vadd.f32 %v5382_v52, %v3862_v53 }
0x1cd2   : > { %v3865_v55 = vpop.f32.mrb[78].mxu0 }
0x1cd3   : > { %v3866_v16 = vadd.f32 %v5382_v52, %v3865_v55  ;;  %v6110_v22 = vpop.f32.mrb[79].mxu0 }
0x1cd5   : > { %v3943_v57 = vpack.c.bf16 %v3866_v16, %v3863_v56 }
0x1cd7   : > { %6118 = vmatpush3.bf16.msra.mxu1 %v3943_v57  ;;  %v5433_v57 = vld [vmem:[%s7935_s8 + $0x7] ss:$0 sm:$0xff] }
0x1cd8   : > { %6129 = vmatprep.subr.bf16.mxu1 %v6553_v15 }
0x1d9a   : > { %v3911_v58 = vpop.f32.mrb[84].mxu1 }
0x1d9b   : > { %v3918_v60 = vsel %vm6881_vm3, %v3911_v58, -inf  ;;  %v6115_v61 = vpop.f32.mrb[85].mxu1 }
0x1d9c   : > { %v3914_v62 = vpop.f32.mrb[86].mxu1  ;;  %v3920_v0 = vsel %vm957_vm2, %v3918_v60, -inf }
0x1d9d   : > { %v3919_v2 = vsel %vm6885_vm4, %v3914_v62, -inf  ;;  %3921 = vmax.xlane.f32.xlu0 %v3920_v0  ;;  %v6116_v3 = vpop.f32.mrb[87].mxu1 }
0x1d9e   : > { %v3923_v4 = vsel %vm957_vm2, %v3919_v2, -inf }
0x1d9f   : > { %3924 = vmax.xlane.f32.xlu1 %v3923_v4 }
0x1e2a   : > { %v3922_v5 = vpop.xlane.xlu0 %3921 }
0x1e2b   : > { %v3926_v6 = vsub.f32 %v3918_v60, %v3922_v5 }
0x1e2c   : > { %v3925_v7 = vpop.xlane.xlu1 %3924 }
0x1e2d   : > { %v3928_v8 = vmul.f32 1.442695, %v3926_v6  ;;  %v3927_v37 = vsub.f32 %v3919_v2, %v3925_v7 }
0x1e2f   : > { %6463 = vpow2.f32 %v3928_v8  ;;  %v3930_v9 = vmul.f32 1.442695, %v3927_v37  ;;  %v5418_v37 = vld [vmem:[%s7934_s6 + $0x7] ss:$0 sm:$0xff]  ;;  %s5533_s6 = sshll.u32 %s6690_s3, 8  ;;  %s6489_s3 = scalar_lea.vmem %s7822_s2, 256 }
0x1e30   : > { %s7827_s8 = scalar_lea.hbm %s7942_s7, %s5533_s6  ;;  %p6490_p11 = scmp.ne.s32.totalorder %s7822_s2, %s6489_s3 }
0x1e31   : > { %6465 = vpow2.f32 %v3930_v9 }
0x1e32   : > { %p6491_p12 = pnand %p6490_p11, %p6707_p5 }
0x1e34   : > { %p6492_p13 = pneg %p6491_p12 }
0x1e39   : > { %v6464_v41 = vpop.eup %6463 }
0x1e3a   : > { %v3932_v10 = vsel %vm957_vm2, %v6464_v41, 0.0 }
0x1e3b   : > { %v6466_v11 = vpop.eup %6465  ;;  %3933 = vadd.xlane.f32.xlu0 %v3932_v10 }
0x1e3c   : > { %v3935_v12 = vsel %vm957_vm2, %v6466_v11, 0.0 }
0x1e3d   : > { %3936 = vadd.xlane.f32.xlu1 %v3935_v12 }
0x1ec8   : > { %v3934_v14 = vpop.xlane.xlu0 %3933 }
0x1ec9   : > { %6467 = vrcp.f32 %v3934_v14 }
0x1eca   : > { %v3937_v17 = vpop.xlane.xlu1 %3936 }
0x1ecb   : > { %6469 = vrcp.f32 %v3937_v17 }
0x1ed3   : > { %v6468_v20 = vpop.eup %6467 }
0x1ed4   : > { %v3939_v24 = vmul.f32 %v6468_v20, %v6464_v41 }
0x1ed5   : > { %v6470_v23 = vpop.eup %6469 }
0x1ed6   : > { %v3941_v18 = vmul.f32 %v6470_v23, %v6466_v11 }
0x1ed8   : > { %v3942_v21 = vpack.c.bf16 %v3941_v18, %v3939_v24 }
0x1eda   : > { %6120 = vmatmul.mubr.msk.bf16.vlgmr.msra.gmra.mrb[88].mxu1 %vm957_vm2, %v3942_v21 }
0x1edb   : > { %6130 = vmatpush3.bf16.msra.mxu1 %v6357_v19  ;;  %6137 = vmatprep.mubr.msk.bf16.mxu1 %vm6554_vm1, %v6553_v15 }
0x1edc   : > { %6131 = vmatprep.subr.bf16.mxu1 %v6553_v15 }
0x1edf   : > { %6132 = vmatpush3.bf16.msra.mxu1 %v6358_v25 }
0x1ee0   : > { %6133 = vmatprep.subr.bf16.mxu1 %v6553_v15 }
0x1ee3   : > { %6134 = vmatpush3.bf16.msra.mxu1 %v6359_v26 }
0x1ee4   : > { %6135 = vmatprep.subr.bf16.mxu1 %v6553_v15 }
0x1ee7   : > { %6136 = vmatpush3.bf16.msra.mxu1 %v6360_v27 }
0x1ee8   : > { %6153 = vmatprep.subr.bf16.mxu1 %v6553_v15 }
0x1eea   : > { %6138 = vmatmul.mubr.msk.bf16.vlgmr.msra.gmra.mrb[92].mxu1 %vm667_vm0, %v7322_v47 }
0x1eeb   : > { %6154 = vmatpush3.bf16.msra.mxu1 %v6361_v28  ;;  %6161 = vmatprep.mubr.msk.bf16.mxu1 %vm6554_vm1, %v6553_v15 }
0x1eec   : > { %6155 = vmatprep.subr.bf16.mxu1 %v6553_v15 }
0x1eef   : > { %6156 = vmatpush3.bf16.msra.mxu1 %v6362_v29 }
0x1ef0   : > { %6157 = vmatprep.subr.bf16.mxu1 %v6553_v15 }
0x1ef3   : > { %6158 = vmatpush3.bf16.msra.mxu1 %v6363_v30 }
0x1ef4   : > { %6159 = vmatprep.subr.bf16.mxu1 %v6553_v15 }
0x1ef7   : > { %6160 = vmatpush3.bf16.msra.mxu1 %v6364_v35 }
0x1ef8   : > { %6177 = vmatprep.subr.bf16.mxu1 %v6553_v15 }
0x1efa   : > { %6162 = vmatmul.mubr.msk.bf16.vlgmr.msra.gmra.mrb[96].mxu1 %vm667_vm0, %v7322_v47 }
0x1efb   : > { %6179 = vmatprep.mubr.msk.bf16.mxu1 %vm6554_vm1, %v6553_v15 }
0x1fad   : > { %v3981_v39 = vpop.f32.mrb[88].mxu1 }
0x1fae   : > { %v6121_v43 = vpop.f32.mrb[89].mxu1 }
0x1faf   : > { %v3984_v44 = vpop.f32.mrb[90].mxu1  ;;  %v6370_v43 = vld [vmem:[%s7879_s9 + $0x38] sm:$0xff]  }
0x1fb0   : > { %v3988_v46 = vpack.c.bf16 %v3984_v44, %v3981_v39  ;;  %v6122_v40 = vpop.f32.mrb[91].mxu1  ;;  %6178 = vmatpush3.bf16.msra.mxu1 %v6370_v43 }
0x1fb2   : > { %6126 = vmatmul.mubr.msk.bf16.vlgmr.msra.gmra.mrb[80].mxu0 %vm957_vm2, %v3988_v46 }
0x1fb3   : > { %6142 = vmatpush3.bf16.msra.mxu0 %v6366_v45  ;;  %6149 = vmatprep.mubr.msk.bf16.mxu0 %vm6554_vm1, %v6553_v15 }
0x1fb4   : > { %6143 = vmatprep.subr.bf16.mxu0 %v6553_v15 }
0x1fb7   : > { %6144 = vmatpush3.bf16.msra.mxu0 %v6367_v48 }
0x1fb8   : > { %6145 = vmatprep.subr.bf16.mxu0 %v6553_v15 }
0x1fbb   : > { %6146 = vmatpush3.bf16.msra.mxu0 %v6368_v49 }
0x1fbc   : > { %6147 = vmatprep.subr.bf16.mxu0 %v6553_v15 }
0x1fbd   : > { %v4119_v52 = vpop.f32.mrb[92].mxu1 }
0x1fbe   : > { %v6139_v53 = vpop.f32.mrb[93].mxu1  ;;  %v4120_v55 = vadd.f32 %v5403_v51, %v4119_v52 }
0x1fbf   : > { %v4122_v54 = vpop.f32.mrb[94].mxu1  ;;  %6148 = vmatpush3.bf16.msra.mxu0 %v6369_v50 }
0x1fc0   : > { %v4123_v56 = vadd.f32 %v5403_v51, %v4122_v54  ;;  %v6140_v16 = vpop.f32.mrb[95].mxu1  ;;  %6165 = vmatprep.subr.bf16.mxu0 %v6553_v15 }
0x1fc2   : > { %v4290_v22 = vpack.c.bf16 %v4123_v56, %v4120_v55  ;;  %6150 = vmatmul.mubr.msk.bf16.vlgmr.msra.gmra.mrb[84].mxu0 %vm667_vm0, %v7322_v47 }
0x1fc3   : > { %6167 = vmatprep.mubr.msk.bf16.mxu0 %vm6554_vm1, %v6553_v15 }
0x1fcd   : > { %v4283_v58 = vpop.f32.mrb[96].mxu1 }
0x1fce   : > { %v6163_v60 = vpop.f32.mrb[97].mxu1  ;;  %v4284_v62 = vadd.f32 %v5433_v57, %v4283_v58 }
0x1fcf   : > { %v4286_v61 = vpop.f32.mrb[98].mxu1 }
0x1fd0   : > { %v4287_v0 = vadd.f32 %v5433_v57, %v4286_v61  ;;  %v6164_v2 = vpop.f32.mrb[99].mxu1  ;;  %v5446_v57 = vld [vmem:[%s7880_s10 + $0x1] ss:$0 sm:$0xff] }
0x1fd2   : > { %v4364_v3 = vpack.c.bf16 %v4287_v0, %v4284_v62 }
0x2085   : > { %v4035_v4 = vpop.f32.mrb[80].mxu0 }
0x2086   : > { %v7651_v5 = vadd.f32 %v4035_v4, %v7552_v32  ;;  %v6127_v6 = vpop.f32.mrb[81].mxu0 }
0x2087   : > { %v4038_v47 = vpop.f32.mrb[82].mxu0 }
0x2088   : > { %v7654_v7 = vadd.f32 %v4038_v47, %v7554_v42  ;;  %v6128_v8 = vpop.f32.mrb[83].mxu0 }
0x2095   : > { %v4201_v9 = vpop.f32.mrb[84].mxu0 }
0x2096   : > { %v6151_v41 = vpop.f32.mrb[85].mxu0  ;;  %v4202_v11 = vadd.f32 %v5418_v37, %v4201_v9 }
0x2097   : > { %v4204_v10 = vpop.f32.mrb[86].mxu0 }
0x2098   : > { %v4205_v12 = vadd.f32 %v5418_v37, %v4204_v10  ;;  %v6152_v13 = vpop.f32.mrb[87].mxu0  ;;  %v6373_v10 = vld [vmem:[%s7883_s13 + $0x44] ss:$8 sps:$4 sm:$0xff]  }
0x2099   : > { %v6374_v13 = vld [vmem:[%s7883_s13 + $0x50] ss:$8 sps:$4 sm:$0xff]  }
0x209a   : > { %v4291_v14 = vpack.c.bf16 %v4205_v12, %v4202_v11  ;;  %v6371_v11 = vld [vmem:[%s7883_s13 + $0x40] ss:$8 sps:$4 sm:$0xff]   ;;  %v6376_v12 = vld [vmem:[%s7883_s13 + $0x54] ss:$8 sps:$4 sm:$0xff]  }
0x209c   : > { %v4296_v32 = vsel %vm957_vm2, %v4291_v14, 0  ;;  %v6379_v14 = vld [vmem:[%s7883_s13 + $0x64] ss:$8 sps:$4 sm:$0xff]  }
0x209d   : > { %6166 = vmatpush3.bf16.xpose.msra.mxu0 %v4296_v32  ;;  %v6377_v32 = vld [vmem:[%s7883_s13 + $0x60] ss:$8 sps:$4 sm:$0xff]  }
0x209e   : > { %6171 = vmatprep.subr.bf16.mxu0 %v6553_v15 }
0x20a4   : > { %6168 = vmatmul.mubr.msk.bf16.vlgmr.msra.gmra.mrb[88].mxu0 %vm957_vm2, %v4290_v22 }
0x20a5   : > { %6172 = vmatpush3.bf16.msra.mxu0 %v4364_v3  ;;  %6173 = vmatprep.mubr.msk.bf16.mxu0 %vm6554_vm1, %v6553_v15 }
0x20a6   : > { %4589 = vmatprep.subr.bf16.mxu0 %v6373_v10 }
0x2177   : > { %v4332_v42 = vpop.f32.mrb[88].mxu0 }
0x2178   : > { %v4339_v17 = vsel %vm6881_vm3, %v4332_v42, -inf  ;;  %v6169_v20 = vpop.f32.mrb[89].mxu0  ;;  %v6380_v42 = vld [vmem:[%s7883_s13 + $0x70] ss:$8 sps:$4 sm:$0xff]  }
0x2179   : > { %v4335_v23 = vpop.f32.mrb[90].mxu0  ;;  %v4341_v24 = vsel %vm957_vm2, %v4339_v17, -inf  ;;  %v6383_v20 = vld [vmem:[%s7885_s15 + $0xc0] sm:$0xff]  }
0x217a   : > { %v4340_v18 = vsel %vm6885_vm4, %v4335_v23, -inf  ;;  %4342 = vmax.xlane.f32.xlu0 %v4341_v24  ;;  %v6170_v19 = vpop.f32.mrb[91].mxu0  ;;  %v6384_v23 = vld [vmem:[%s7885_s15 + $0x80] sm:$0xff]   ;;  %v6385_v24 = vld [vmem:[%s7885_s15 + $0xc8] sm:$0xff]   ;;  %5724 = vmatprep.subr.bf16.mxu1 %v6383_v20 }
0x217b   : > { %v4344_v21 = vsel %vm957_vm2, %v4340_v18, -inf  ;;  %v6387_v19 = vld [vmem:[%s7885_s15 + $0xd0] sm:$0xff]  }
0x217c   : > { %4345 = vmax.xlane.f32.xlu1 %v4344_v21  ;;  %v6388_v21 = vld [vmem:[%s7885_s15 + $0x90] sm:$0xff]  }
0x2207   : > { %v4343_v25 = vpop.xlane.xlu0 %4342 }
0x2208   : > { %v4347_v26 = vsub.f32 %v4339_v17, %v4343_v25  ;;  %v6382_v17 = vld [vmem:[%s7883_s13 + $0x74] ss:$8 sps:$4 sm:$0xff]  }
0x2209   : > { %v4346_v27 = vpop.xlane.xlu1 %4345  ;;  %v6389_v25 = vld [vmem:[%s7885_s15 + $0xd8] sm:$0xff]  }
0x220a   : > { %v4349_v28 = vmul.f32 1.442695, %v4347_v26  ;;  %v4348_v29 = vsub.f32 %v4340_v18, %v4346_v27  ;;  %v6386_v18 = vld [vmem:[%s7885_s15 + $0x88] sm:$0xff]   ;;  %v6390_v26 = vld [vmem:[%s7885_s15 + $0x98] sm:$0xff]   ;;  %v6391_v27 = vld [vmem:[%s7885_s15 + $0xe0] sm:$0xff]  }
0x220c   : > { %6471 = vpow2.f32 %v4349_v28  ;;  %v4351_v34 = vmul.f32 1.442695, %v4348_v29  ;;  %v6392_v28 = vld [vmem:[%s7885_s15 + $0xa0] sm:$0xff]   ;;  %v6393_v29 = vld [vmem:[%s7885_s15 + $0xe8] sm:$0xff]  }
0x220e   : > { %6473 = vpow2.f32 %v4351_v34 }
0x2216   : > { %v6472_v30 = vpop.eup %6471 }
0x2217   : > { %v4353_v35 = vsel %vm957_vm2, %v6472_v30, 0.0 }
0x2218   : > { %v6474_v39 = vpop.eup %6473  ;;  %4354 = vadd.xlane.f32.xlu0 %v4353_v35 }
0x2219   : > { %v4356_v36 = vsel %vm957_vm2, %v6474_v39, 0.0 }
0x221a   : > { %4357 = vadd.xlane.f32.xlu1 %v4356_v36 }
0x22a5   : > { %v4355_v44 = vpop.xlane.xlu0 %4354 }
0x22a6   : > { %6475 = vrcp.f32 %v4355_v44 }
0x22a7   : > { %v4358_v45 = vpop.xlane.xlu1 %4357 }
0x22a8   : > { %6477 = vrcp.f32 %v4358_v45  ;;  %v5449_v45 = vld [vmem:[%s7881_s11 + $0x1] ss:$0 sm:$0xff] }
0x22b0   : > { %v6476_v46 = vpop.eup %6475 }
0x22b1   : > { %v4360_v48 = vmul.f32 %v6476_v46, %v6472_v30 }
0x22b2   : > { %v6478_v40 = vpop.eup %6477 }
0x22b3   : > { %v4362_v49 = vmul.f32 %v6478_v40, %v6474_v39 }
0x22b5   : > { %v4363_v50 = vpack.c.bf16 %v4362_v49, %v4360_v48 }
0x22b7   : > { %6174 = vmatmul.mubr.msk.bf16.vlgmr.msra.gmra.mrb[92].mxu0 %vm957_vm2, %v4363_v50  ;;  %v5450_v50 = vld [vmem:[%s7882_s12 + $0x1] ss:$0 sm:$0xff] }
0x22b8   : > { %4621 = vmatprep.mubr.bf16.mxu0 %v6555_v59  ;;  %4590 = vmatpush1.bf16.msra.mxu0 %v6371_v11 }
0x22b9   : > { %4591 = vmatprep.subr.bf16.mxu0 %v6376_v12 }
0x22bc   : > { %4592 = vmatpush1.bf16.msra.mxu0 %v6374_v13 }
0x22bd   : > { %4593 = vmatprep.subr.bf16.mxu0 %v6379_v14 }
0x22c0   : > { %4594 = vmatpush1.bf16.msra.mxu0 %v6377_v32 }
0x22c1   : > { %4595 = vmatprep.subr.bf16.mxu0 %v6382_v17 }
0x22c4   : > { %4596 = vmatpush1.bf16.msra.mxu0 %v6380_v42 }
0x22c5   : > { %6183 = vmatprep.subr.bf16.mxu0 %v6553_v15 }
0x238a   : > { %v4402_v51 = vpop.f32.mrb[92].mxu0 }
0x238b   : > { %v6175_v52 = vpop.f32.mrb[93].mxu0 }
0x238c   : > { %v4405_v53 = vpop.f32.mrb[94].mxu0 }
0x238d   : > { %v4409_v54 = vpack.c.bf16 %v4405_v53, %v4402_v51  ;;  %v6176_v55 = vpop.f32.mrb[95].mxu0 }
0x238e   : > { %v6394_v55 = vld [vmem:[%s7885_s15 + $0xa8] sm:$0xff]  }
0x238f   : > { %6180 = vmatmul.mubr.msk.bf16.vlgmr.msra.gmra.mrb[100].mxu1 %vm957_vm2, %v4409_v54 }
0x2390   : > { %5725 = vmatpush3.bf16.msra.mxu1 %v6384_v23 }
0x2391   : > { %5726 = vmatprep.subr.bf16.mxu1 %v6385_v24 }
0x2394   : > { %5727 = vmatpush3.bf16.msra.mxu1 %v6386_v18 }
0x2395   : > { %5728 = vmatprep.subr.bf16.mxu1 %v6387_v19 }
0x2398   : > { %5729 = vmatpush3.bf16.msra.mxu1 %v6388_v21 }
0x2399   : > { %5730 = vmatprep.subr.bf16.mxu1 %v6389_v25 }
0x239c   : > { %5731 = vmatpush3.bf16.msra.mxu1 %v6390_v26 }
0x239d   : > { %5732 = vmatprep.subr.bf16.mxu1 %v6391_v27 }
0x23a0   : > { %5733 = vmatpush3.bf16.msra.mxu1 %v6392_v28 }
0x23a1   : > { %5734 = vmatprep.subr.bf16.mxu1 %v6393_v29 }
0x23a4   : > { %5735 = vmatpush3.bf16.msra.mxu1 %v6394_v55 }
0x2462   : > { %v4456_v56 = vpop.f32.mrb[100].mxu1 }
0x2463   : > { %v4463_v16 = vadd.f32 %v4456_v56, %v7651_v5  ;;  %v6181_v22 = vpop.f32.mrb[101].mxu1  ;;  %v6395_v56 = vld [vmem:[%s7885_s15 + $0xf0] sm:$0xff]  }
0x2464   : > { %v4459_v58 = vpop.f32.mrb[102].mxu1  ;;  %5736 = vmatprep.subr.bf16.mxu1 %v6395_v56  ;;  %v6397_v22 = vld [vmem:[%s7885_s15 + $0xf8] sm:$0xff]  }
0x2465   : > { %v4465_v60 = vadd.f32 %v4463_v16, %v7268_v63  ;;  %v4464_v59 = vadd.f32 %v4459_v58, %v7654_v7  ;;  %v6182_v61 = vpop.f32.mrb[103].mxu1  ;;  %v6396_v16 = vld [vmem:[%s7885_s15 + $0xb0] sm:$0xff]   ;;  %v5459_v58 = vld [vmem:[%s7884_s14 + $0x2] sm:$0x3] }
0x2466   : > { %5737 = vmatpush3.bf16.msra.mxu1 %v6396_v16  ;;  %v5521_v16 = vld [vmem:[%s7940_s26] ss:$0 sm:$0xff]  ;;  %s6495_s26 = scalar_lea.vmem %s6494_s0, 512 }
0x2467   : > { %v7684_v62 = vadd.f32 %v5446_v57, %v4465_v60  ;;  %v4466_v0 = vadd.f32 %v4464_v59, %v7271_v1  ;;  %5738 = vmatprep.subr.bf16.mxu1 %v6397_v22  ;;  %v4539_v60 = vrot.slane %v5459_v58, %v2457_v33  ;;  %v4543_v59 = vrot.slane %v5459_v58, %v2461_v38  ;;  %p6497_p1 = scmp.lt.s32.totalorder %s6495_s26, %s6489_s3 }
0x2469   : > { %v7687_v2 = vadd.f32 %v5446_v57, %v4466_v0  ;;  %v4481_v3 = vsel %vm667_vm0, %v7684_v62, 0.0  ;;  %v6398_v57 = vld [vmem:[%s7885_s15 + $0xb8] sm:$0xff]   ;;  %p6498_p2 = por %p6497_p1, %p6496_p0 }
0x246a   : > { %4482 = vadd.xlane.f32.xlu0 %v4481_v3  ;;  %5739 = vmatpush3.bf16.msra.mxu1 %v6398_v57 }
0x246b   : > { %v4484_v4 = vsel %vm667_vm0, %v7687_v2, 0.0  ;;  %p6499_p3 = pnand %p6498_p2, %p6492_p13 }
0x246c   : > { %4485 = vadd.xlane.f32.xlu1 %v4484_v4 }
0x24f7   : > { %v4483_v5 = vpop.xlane.xlu0 %4482 }
0x24f8   : > { %v4487_v6 = vmul.f32 0.015625, %v4483_v5 }
0x24f9   : > { %v4486_v63 = vpop.xlane.xlu1 %4485 }
0x24fa   : > { %v4489_v47 = vsub.f32 %v7684_v62, %v4487_v6  ;;  %v4488_v7 = vmul.f32 0.015625, %v4486_v63 }
0x24fc   : > { %v4490_v8 = vsub.f32 %v7687_v2, %v4488_v7  ;;  %v4491_v37 = vmul.f32 %v4489_v47, %v4489_v47 }
0x24fe   : > { %v4493_v1 = vsel %vm667_vm0, %v4491_v37, 0.0  ;;  %v4492_v9 = vmul.f32 %v4490_v8, %v4490_v8 }
0x24ff   : > { %4494 = vadd.xlane.f32.xlu0 %v4493_v1 }
0x2500   : > { %v4496_v41 = vsel %vm667_vm0, %v4492_v9, 0.0 }
0x2501   : > { %4497 = vadd.xlane.f32.xlu1 %v4496_v41 }
0x258c   : > { %v4495_v34 = vpop.xlane.xlu0 %4494 }
0x258d   : > { %v4499_v30 = vmul.f32 0.015625, %v4495_v34  ;;  %v6400_v34 = vld [vmem:[%s7889_s19 + $0x8] sm:$0xff]  }
0x258e   : > { %v4498_v35 = vpop.xlane.xlu1 %4497 }
0x258f   : > { %v4501_v39 = vadd.f32 1e-05, %v4499_v30  ;;  %v4500_v36 = vmul.f32 0.015625, %v4498_v35  ;;  %v6401_v30 = vld [vmem:[%s7889_s19 + $0x10] sm:$0xff]   ;;  %v6402_v35 = vld [vmem:[%s7889_s19 + $0x18] sm:$0xff]  }
0x2591   : > { %6479 = vrsqrt.f32 %v4501_v39  ;;  %v4502_v43 = vadd.f32 1e-05, %v4500_v36 }
0x2593   : > { %6481 = vrsqrt.f32 %v4502_v43 }
0x259b   : > { %v6480_v44 = vpop.eup %6479 }
0x259c   : > { %v4505_v46 = vmul.f32 %v6480_v44, %v4489_v47 }
0x259d   : > { %v6482_v40 = vpop.eup %6481 }
0x259e   : > { %v4513_v48 = vmul.f32 %v5449_v45, %v4505_v46  ;;  %v4506_v49 = vmul.f32 %v6482_v40, %v4490_v8 }
0x25a0   : > { %v4514_v51 = vmul.f32 %v5449_v45, %v4506_v49  ;;  %v4521_v52 = vadd.f32 %v5450_v50, %v4513_v48  ;;  %v5519_v48 = vld [vmem:[%s7887_s17] ss:$0 sm:$0xff] }
0x25a2   : > { %v4522_v53 = vadd.f32 %v5450_v50, %v4514_v51 }
0x25a4   : > { %v4523_v54 = vpack.c.bf16 %v4522_v53, %v4521_v52  ;;  %v5520_v52 = vld [vmem:[%s7888_s18] ss:$0 sm:$0xff] }
0x25a6   : > { %5468 = vmatmul.mubr.msk.bf16.vlgmr.msra.gmra.mrb[96].mxu0 %vm667_vm0, %v4523_v54 }
0x25a7   : > { %6191 = vmatprep.mubr.msk.bf16.mxu0 %vm6554_vm1, %v6553_v15 }
0x2679   : > { %v4623_v61 = vpop.f32.mrb[96].mxu0 }
0x267a   : > { %v4624_v0 = vadd.f32 %v4623_v61, %v4539_v60  ;;  %v4625_v3 = vpop.f32.mrb[97].mxu0 }
0x267b   : > { %v4626_v4 = vadd.f32 %v4625_v3, %v4543_v59  ;;  %v4627_v5 = vpop.f32.mrb[98].mxu0 }
0x267c   : > { %v4628_v6 = vadd.f32 %v4627_v5, %v4539_v60  ;;  %v4629_v63 = vpop.f32.mrb[99].mxu0  ;;  %v4632_v7 = vmax.f32 %v4624_v0, 0.0 }
0x267d   : > { %v4630_v47 = vadd.f32 %v4629_v63, %v4543_v59  ;;  %v4633_v37 = vmax.f32 %v4626_v4, 0.0 }
0x267e   : > { %v4634_v8 = vmax.f32 %v4628_v6, 0.0 }
0x267f   : > { %v4635_v1 = vmax.f32 %v4630_v47, 0.0 }
0x2680   : > { %v4636_v9 = vpack.c.bf16 %v4634_v8, %v4632_v7 }
0x2681   : > { %v4637_v41 = vpack.c.bf16 %v4635_v1, %v4633_v37 }
0x2683   : > { %4807 = vmatprep.mubr.bf16.mxu1 %v4637_v41 }
0x2684   : > { %4808 = vmatmul.mubr.bf16.vlgmr.msra.gmra.mrb[104].mxu1 %v4636_v9 }
0x2757   : > { %v5740_v33 = vpop.f32.mrb[104].mxu1 }
0x2758   : > { %v5741_v38 = vpop.f32.mrb[105].mxu1 }
0x2759   : > { %v5742_v10 = vadd.f32 %v5741_v38, %v5740_v33  ;;  %v5743_v11 = vpop.f32.mrb[106].mxu1 }
0x275a   : > { %v5744_v12 = vpop.f32.mrb[107].mxu1 }
0x275b   : > { %v4810_v13 = vadd.f32 %v5742_v10, %v5502_v31  ;;  %v5745_v14 = vadd.f32 %v5744_v12, %v5743_v11 }
0x275d   : > { %v4813_v32 = vadd.f32 %v5745_v14, %v5502_v31  ;;  %v4816_v42 = vadd.f32 %v4810_v13, %v7684_v62 }
0x275f   : > { %v4820_v17 = vsel %vm667_vm0, %v4816_v42, 0.0  ;;  %v4817_v20 = vadd.f32 %v4813_v32, %v7687_v2  ;;  %v6399_v2 = vld [vmem:[%s7889_s19] sm:$0xff]  }
0x2760   : > { %4821 = vadd.xlane.f32.xlu0 %v4820_v17  ;;  %6184 = vmatpush3.bf16.msra.mxu0 %v6399_v2 }
0x2761   : > { %v4823_v23 = vsel %vm667_vm0, %v4817_v20, 0.0  ;;  %6185 = vmatprep.subr.bf16.mxu0 %v6553_v15 }
0x2762   : > { %4824 = vadd.xlane.f32.xlu1 %v4823_v23 }
0x2764   : > { %6186 = vmatpush3.bf16.msra.mxu0 %v6400_v34 }
0x2765   : > { %6187 = vmatprep.subr.bf16.mxu0 %v6553_v15 }
0x2768   : > { %6188 = vmatpush3.bf16.msra.mxu0 %v6401_v30 }
0x2769   : > { %6189 = vmatprep.subr.bf16.mxu0 %v6553_v15 }
0x276c   : > { %6190 = vmatpush3.bf16.msra.mxu0 %v6402_v35 }
0x27ed   : > { %v4822_v24 = vpop.xlane.xlu0 %4821 }
0x27ee   : > { %v4826_v18 = vmul.f32 0.015625, %v4822_v24 }
0x27ef   : > { %v4825_v19 = vpop.xlane.xlu1 %4824 }
0x27f0   : > { %v4828_v21 = vsub.f32 %v4816_v42, %v4826_v18  ;;  %v4827_v25 = vmul.f32 0.015625, %v4825_v19 }
0x27f2   : > { %v4829_v26 = vsub.f32 %v4817_v20, %v4827_v25  ;;  %v4830_v27 = vmul.f32 %v4828_v21, %v4828_v21 }
0x27f4   : > { %v4832_v28 = vsel %vm667_vm0, %v4830_v27, 0.0  ;;  %v4831_v29 = vmul.f32 %v4829_v26, %v4829_v26 }
0x27f5   : > { %4833 = vadd.xlane.f32.xlu0 %v4832_v28 }
0x27f6   : > { %v4835_v62 = vsel %vm667_vm0, %v4831_v29, 0.0 }
0x27f7   : > { %4836 = vadd.xlane.f32.xlu1 %v4835_v62 }
0x2882   : > { %v4834_v39 = vpop.xlane.xlu0 %4833 }
0x2883   : > { %v4838_v36 = vmul.f32 0.015625, %v4834_v39 }
0x2884   : > { %v4837_v43 = vpop.xlane.xlu1 %4836 }
0x2885   : > { %v4840_v44 = vadd.f32 1e-05, %v4838_v36  ;;  %v4839_v45 = vmul.f32 0.015625, %v4837_v43 }
0x2887   : > { %6483 = vrsqrt.f32 %v4840_v44  ;;  %v4841_v46 = vadd.f32 1e-05, %v4839_v45 }
0x2889   : > { %6485 = vrsqrt.f32 %v4841_v46 }
0x2891   : > { %v6484_v40 = vpop.eup %6483 }
0x2892   : > { %v4844_v15 = vmul.f32 %v6484_v40, %v4828_v21 }
0x2893   : > { %v6486_v49 = vpop.eup %6485 }
0x2894   : > { %v4852_v50 = vmul.f32 %v5519_v48, %v4844_v15  ;;  %v4845_v51 = vmul.f32 %v6486_v49, %v4829_v26 }
0x2896   : > { %v4853_v53 = vmul.f32 %v5519_v48, %v4845_v51  ;;  %v4860_v54 = vadd.f32 %v5520_v52, %v4852_v50 }
0x2898   : > { %v4861_v55 = vadd.f32 %v5520_v52, %v4853_v53 }
0x289a   : > { %v4862_v56 = vpack.c.bf16 %v4861_v55, %v4860_v54 }
0x289c   : > { %6192 = vmatmul.mubr.msk.bf16.vlgmr.msra.gmra.mrb[100].mxu0 %vm667_vm0, %v4862_v56 }
0x296f   : > { %v4939_v22 = vpop.f32.mrb[100].mxu0 }
0x2970   : > { %v4940_v57 = vadd.f32 %v5521_v16, %v4939_v22  ;;  %v6193_v58 = vpop.f32.mrb[101].mxu0 }
0x2971   : > { %v4942_v60 = vpop.f32.mrb[102].mxu0 }
0x2972   : > { %4946 = vst [vmem:[%s649_s23] sm:$0xff] %v4940_v57  ;;  %v4943_v59 = vadd.f32 %v5521_v16, %v4942_v60  ;;  %v6194_v61 = vpop.f32.mrb[103].mxu0 }
0x2974   : > { %4947 = vst [vmem:[%s649_s23 + $0x8] sm:$0xff] %v4943_v59 }
0x2975   : > { %6502 = shalt.err (!%p6499_p3)
}
0x2976   : > { %s6503_s6 = scalar_lea.hbm %s7827_s8, 256  ;;  %s6507_s20 = scalar_lea.hbm %s7942_s7, 512 }
0x2977   : > { %p6504_p4 = scmp.ne.s32.totalorder %s7827_s8, %s6503_s6  ;;  %p6508_p9 = scmp.lt.u32.totalorder %s7827_s8, %s7942_s7 }
0x2978   : > { %p6509_p10 = scmp.lt.u32.totalorder %s6507_s20, %s6503_s6  ;;  %p6511_p12 = scmp.lt.u32.totalorder %s6503_s6, %s7827_s8 }
0x2979   : > { %p6505_p7 = pnand %p6504_p4, %p6707_p5 }
0x297a   : > { %p6510_p11 = por %p6509_p10, %p6508_p9 }
0x297b   : > { %p6506_p8 = pneg %p6505_p7 }
0x297c   : > { %p6512_p13 = por %p6511_p12, %p6510_p11 }
0x297e   : > { %p6513_p0 = pnand %p6512_p13, %p6506_p8 }
0x2980   : > { %6516 = shalt.err (!%p6513_p0)
}
0x2981   : > { %s6557_s3 = smov 128   ;;  %s6558_s0 = smov 8  }
0x2982   : > { %6195 = dma.vmem_to_hbm [thread:$0]  (%p6707_p5), %s7822_s2, 256, %s7827_s8, %s7829_s27, %s6557_s3, %s6557_s3, %s6558_s0  }
0x2983 PF: > { %s7943_s26 = sld [smem:[#allocation7_spill]]  ;;  %s7944_s21 = sld [smem:[#allocation5_spill]] }
0x2989   : > { %p6201_p1 = scmp.ge.s32.totalorder %s7943_s26, 2  ;;  %s4977_s5 = sand.u32 1, %s7944_s21  }
0x298a   : > { %s4978_s6 = scalar_lea.sflag [#allocation3], %s4977_s5 }
0x298b   : > { %p6198_p2 = pnand %p6201_p1, %p6711_p6 }
0x298d   : > { %6534 = dma.done.wait (!%p6198_p2), %s4978_s6, 256  }
0x298e   : > { %6536 = vsyncadd (!%p6198_p2), %s4978_s6, 4294967040  ;;  %s7946_s27 = sld [smem:[#allocation8_spill]]  ;;  %s7947_s20 = sld [smem:[#allocation6_spill]] }
0x298f   : > { %s7948_s26 = sld [smem:[#allocation9_spill]]  ;;  %s7949_s2 = smov %s6543_s25 }
0x2994   : > { %p31_p3 = scmp.ge.s32.totalorder %s7946_s27, 4   ;;  %s7950_s25 = smov %s7947_s20 }
0x2996   :  { %33 = sbr.rel (!%p31_p3) target bundleno = 15 (0xf), region = 197 }
0x299d   :  { %4983 = vsyncpa [#allocation3], 1 }
0x299e   :  { %4985 = vsyncpa [#allocation3 + $0x1], 1 }

</bundles_post_ra>
